<compile_context>
chip_gen: v6e
topology: v6e:2x2x1
jax: 0.10.0
libtpu: 0.0.40
codegen_flags: <defaults>
</compile_context>

<pallas_src>
import functools

import jax
import jax.numpy as jnp
from jax.experimental import pallas as pl
from jax.experimental.pallas import tpu as pltpu


CPAD = 128          # conv output channels padded to one full lane tile
NEG_BIG = -1e30     # padded-atom logit filler; exp() underflows to exactly 0
VMEM_LIMIT = 64 << 20


# ----------------------------- Pallas kernels -----------------------------

def _linear_kernel(x_ref, w_ref, b_ref, o_ref, *, relu):
    # x: (tm, K) bf16   w: (K, N) bf16   b: (1, N) f32   ->  o: (tm, N)
    y = jnp.dot(x_ref[...], w_ref[...], preferred_element_type=jnp.float32)
    y = y + b_ref[...]
    if relu:
        y = jnp.maximum(y, 0.0)
    o_ref[...] = y.astype(o_ref.dtype)


def pallas_linear(x, w, b, *, relu=False, out_dtype=jnp.bfloat16, tile_m=512):
    """y = x @ w + b (optional ReLU): bf16 MXU operands, f32 accumulate.

    Tiled over M with a 1-D "parallel" grid (v7x shards row tiles across its
    two TensorCores); K and N stay whole so the weight block is VMEM resident
    across the grid.  Inputs are expected pre-cast (x/w bf16, b f32 (1,N)).
    """
    m, k = x.shape
    n = w.shape[1]
    if m <= tile_m:
        tm, m_pad = m, m
    else:
        tm = tile_m
        m_pad = pl.cdiv(m, tm) * tm
        if m_pad != m:
            x = jnp.pad(x, ((0, m_pad - m), (0, 0)))
    grid = (m_pad // tm,)

    cost = pl.CostEstimate(
        flops=2 * m_pad * k * n,
        transcendentals=0,
        bytes_accessed=m_pad * k * 2 + k * n * 2 + n * 4
        + m_pad * n * jnp.dtype(out_dtype).itemsize)

    out = pl.pallas_call(
        functools.partial(_linear_kernel, relu=relu),
        out_shape=jax.ShapeDtypeStruct((m_pad, n), out_dtype),
        grid=grid,
        in_specs=[pl.BlockSpec((tm, k), lambda i: (i, 0)),
                  pl.BlockSpec((k, n), lambda i: (0, 0)),
                  pl.BlockSpec((1, n), lambda i: (0, 0))],
        out_specs=pl.BlockSpec((tm, n), lambda i: (i, 0)),
        compiler_params=pltpu.CompilerParams(
            dimension_semantics=("parallel",),
            vmem_limit_bytes=VMEM_LIMIT),
        cost_estimate=cost,
    )(x, w, b)
    return out[:m] if m_pad != m else out


def _head_kernel(x_ref, w1_ref, b1_ref, wq_ref, bq_ref, wqm_ref, bqm_ref,
                 wv_ref, bv_ref, o_ref, *, action_num, atom_pad, hidden):
    """Dueling distributional head, one batch tile per grid step.

    x:   (tb, Fpad) bf16      w1: (Fpad, 2H) bf16  ([q1_w | v1_w])
    wq:  (H, A*ATOM_PAD) bf16 (per-action lane slabs, atoms padded to 128)
    wqm: (H, ATOM_PAD)   bf16 (mean over actions of wq slabs)
    wv:  (H, ATOM_PAD)   bf16 (padded bias lanes of bv are -1e30)
    o:   (tb, A*ATOM_PAD) f32 softmax probs (padded lanes are exactly 0).
    """
    # Fused first Q/V linear + ReLU: one MXU pass feeds both branches.
    h = jnp.dot(x_ref[...], w1_ref[...], preferred_element_type=jnp.float32)
    h = jnp.maximum(h + b1_ref[...], 0.0).astype(jnp.bfloat16)
    hq = h[:, :hidden]
    hv = h[:, hidden:]

    # Single lane-dense matmul for all actions, plus one small matmul for the
    # action-mean and one for the V branch.
    q = jnp.dot(hq, wq_ref[...], preferred_element_type=jnp.float32) + bq_ref[...]
    qm = jnp.dot(hq, wqm_ref[...], preferred_element_type=jnp.float32) + bqm_ref[...]
    v = jnp.dot(hv, wv_ref[...], preferred_element_type=jnp.float32) + bv_ref[...]
    adj = v - qm                                     # (tb, ATOM_PAD)

    # Dueling combine + unmasked softmax over the padded 128 atom lanes.
    for a in range(action_num):                      # small static unroll
        lo = a * atom_pad
        logits = q[:, lo:lo + atom_pad] + adj        # padded lanes == -1e30
        mx = jnp.max(logits, axis=1, keepdims=True)
        e = jnp.exp(logits - mx)                     # padded lanes -> 0
        d = jnp.sum(e, axis=1, keepdims=True)
        r = pl.reciprocal(d, approx=True)            # EUP seed
        r = r * (2.0 - d * r)                        # one Newton step (VPU)
        o_ref[:, lo:lo + atom_pad] = e * r           # unmasked 128-lane store


def pallas_rainbow_head(feats, pk, *, action_num, num_atoms, atom_pad,
                        hidden, tile_b=256):
    bsz, fpad = feats.shape
    n_out = action_num * atom_pad
    if bsz <= tile_b:
        tb, b_pad = bsz, bsz
    else:
        tb = tile_b
        b_pad = pl.cdiv(bsz, tb) * tb
        if b_pad != bsz:
            feats = jnp.pad(feats, ((0, b_pad - bsz), (0, 0)))
    grid = (b_pad // tb,)

    out = pl.pallas_call(
        functools.partial(_head_kernel, action_num=action_num,
                          atom_pad=atom_pad, hidden=hidden),
        out_shape=jax.ShapeDtypeStruct((b_pad, n_out), jnp.float32),
        grid=grid,
        in_specs=[pl.BlockSpec((tb, fpad), lambda i: (i, 0)),
                  pl.BlockSpec((fpad, 2 * hidden), lambda i: (0, 0)),
                  pl.BlockSpec((1, 2 * hidden), lambda i: (0, 0)),
                  pl.BlockSpec((hidden, n_out), lambda i: (0, 0)),
                  pl.BlockSpec((1, n_out), lambda i: (0, 0)),
                  pl.BlockSpec((hidden, atom_pad), lambda i: (0, 0)),
                  pl.BlockSpec((1, atom_pad), lambda i: (0, 0)),
                  pl.BlockSpec((hidden, atom_pad), lambda i: (0, 0)),
                  pl.BlockSpec((1, atom_pad), lambda i: (0, 0))],
        out_specs=pl.BlockSpec((tb, n_out), lambda i: (i, 0)),
        compiler_params=pltpu.CompilerParams(
            dimension_semantics=("parallel",),
            vmem_limit_bytes=VMEM_LIMIT),
    )(feats, pk["w1"], pk["b1"], pk["wq"], pk["bq"], pk["wqm"], pk["bqm"],
      pk["wv"], pk["bv"])

    if b_pad != bsz:
        out = out[:bsz]
    # Lane-dense slab -> (B, A, ATOM_PAD) is a free reshape; slice off padding.
    return out.reshape(bsz, action_num, atom_pad)[:, :, :num_atoms]


# ------------------------------- JAX glue ---------------------------------

def _im2col_nhwc(x, k, stride):
    """x: (B, H, W, C) bf16 -> patches (B*Ho*Wo, K*K*C) in (kh, kw, c) order."""
    b, h, w, c = x.shape
    ho = (h - k) // stride + 1
    wo = (w - k) // stride + 1
    if ho == 1 and wo == 1 and h == k and w == k:
        # Window covers the whole map (e.g. the final 3x3 conv): pure reshape.
        return x.reshape(b, k * k * c), ho, wo
    cols = []
    for i in range(k):
        for j in range(k):
            cols.append(x[:, i:i + stride * ho:stride,
                          j:j + stride * wo:stride, :])
    p = jnp.stack(cols, axis=3)                     # (B, Ho, Wo, K*K, C)
    return p.reshape(b * ho * wo, k * k * c), ho, wo


def conv2d_relu(x, wm, bm, k, stride):
    """Valid-padding Conv2d + ReLU via im2col GEMM, channels-last.

    x: (B, H, W, Cin_pad) bf16; wm: (K*K*Cin_pad, 128) bf16 pre-packed;
    bm: (1, 128) f32.  Returns (B, Ho, Wo, 128) bf16 (padded channels are 0).
    """
    bsz = x.shape[0]
    patches, ho, wo = _im2col_nhwc(x, k, stride)
    y = pallas_linear(patches, wm, bm, relu=True, out_dtype=jnp.bfloat16)
    return y.reshape(bsz, ho, wo, wm.shape[1])


def rainbow_forward(obs, packed, *, action_num, num_atoms, atom_pad, hidden):
    # NCHW (PyTorch) -> NHWC once, bf16 once; stay channels-last bf16 through
    # the conv head (im2col duplicates pixels, so halving its dtype halves the
    # dominant HBM traffic).
    x = jnp.transpose(obs.astype(jnp.bfloat16), (0, 2, 3, 1))
    x = conv2d_relu(x, packed["c1_w"], packed["c1_b"], 8, 4)
    x = conv2d_relu(x, packed["c2_w"], packed["c2_b"], 4, 2)
    x = conv2d_relu(x, packed["c3_w"], packed["c3_b"], 3, 1)
    bsz = x.shape[0]
    # Flatten in (h, w, c_pad) order; the head weights were packed to match
    # (padded-channel rows are zero), so no transpose back to NCHW is needed.
    feats = x.reshape(bsz, -1)
    return pallas_rainbow_head(feats, packed, action_num=action_num,
                               num_atoms=num_atoms, atom_pad=atom_pad,
                               hidden=hidden)


# -------------------- one-time weight packing (off hot path) ---------------

def pack_params(params, *, state_shape, action_num, num_atoms, hidden=512):
    """Pad / transpose / cast all weights once, outside the jitted step."""
    in_channels, h0, w0 = state_shape
    atom_pad = pl.cdiv(num_atoms, 128) * 128

    def conv_out(s, k, st):
        return (s - k) // st + 1
    h1, w1_ = conv_out(h0, 8, 4), conv_out(w0, 8, 4)
    h2, w2_ = conv_out(h1, 4, 2), conv_out(w1_, 4, 2)
    h3, w3_ = conv_out(h2, 3, 1), conv_out(w2_, 3, 1)

    def conv_mat(w, b, cin_pad):
        # w: (Cout, Cin, K, K) torch layout -> (K*K*cin_pad, CPAD) bf16.
        cout, cin, k, _ = w.shape
        wt = jnp.transpose(w, (2, 3, 1, 0))                 # (K, K, Cin, Cout)
        wt = jnp.pad(wt, ((0, 0), (0, 0),
                          (0, cin_pad - cin), (0, CPAD - cout)))
        wm = wt.reshape(k * k * cin_pad, CPAD).astype(jnp.bfloat16)
        bm = jnp.pad(b, (0, CPAD - cout)).reshape(1, CPAD).astype(jnp.float32)
        return wm, bm

    c1_w, c1_b = conv_mat(params["conv1_w"], params["conv1_b"], in_channels)
    c2_w, c2_b = conv_mat(params["conv2_w"], params["conv2_b"], CPAD)
    c3_w, c3_b = conv_mat(params["conv3_w"], params["conv3_b"], CPAD)

    c3_out = params["conv3_w"].shape[0]

    def feat_rows(wt):
        # torch flatten order (c, h, w) -> our (h, w, c_pad), zero-padded c.
        out = wt.shape[1]
        wr = wt.reshape(c3_out, h3, w3_, out)
        wr = jnp.pad(wr, ((0, CPAD - c3_out), (0, 0), (0, 0), (0, 0)))
        return jnp.transpose(wr, (1, 2, 0, 3)).reshape(h3 * w3_ * CPAD, out)

    q1p = feat_rows(params["q1_w"])
    v1p = feat_rows(params["v1_w"])
    w1 = jnp.concatenate([q1p, v1p], axis=1).astype(jnp.bfloat16)
    b1 = jnp.concatenate([params["q1_b"], params["v1_b"]]
                         ).reshape(1, 2 * hidden).astype(jnp.float32)

    # Second Q linear: (H, A, atoms) -> lane-dense per-action slabs, plus the
    # pre-averaged weights for q_mean.
    q2 = params["q2_w"].reshape(hidden, action_num, num_atoms)
    q2 = jnp.pad(q2, ((0, 0), (0, 0), (0, atom_pad - num_atoms)))
    wq = q2.reshape(hidden, action_num * atom_pad).astype(jnp.bfloat16)
    wqm = jnp.mean(q2, axis=1).astype(jnp.bfloat16)           # (H, atom_pad)
    bq2 = params["q2_b"].reshape(action_num, num_atoms)
    bq2 = jnp.pad(bq2, ((0, 0), (0, atom_pad - num_atoms)))
    bq = bq2.reshape(1, action_num * atom_pad).astype(jnp.float32)
    bqm = jnp.mean(bq2, axis=0).reshape(1, atom_pad).astype(jnp.float32)

    wv = jnp.pad(params["v2_w"],
                 ((0, 0), (0, atom_pad - num_atoms))).astype(jnp.bfloat16)
    bv = jnp.concatenate(
        [params["v2_b"].astype(jnp.float32),
         jnp.full((atom_pad - num_atoms,), NEG_BIG, jnp.float32)]
    ).reshape(1, atom_pad)

    packed = {"c1_w": c1_w, "c1_b": c1_b, "c2_w": c2_w, "c2_b": c2_b,
              "c3_w": c3_w, "c3_b": c3_b, "w1": w1, "b1": b1,
              "wq": wq, "bq": bq, "wqm": wqm, "bqm": bqm,
              "wv": wv, "bv": bv}
    return packed, atom_pad


# ----------------------------- parameter init -----------------------------

def init_params(key, in_channels, feat_dim, action_num, num_atoms, hidden=512):
    keys = jax.random.split(key, 14)
    s = 0.05

    def nrm(k, shape):
        return jax.random.normal(k, shape, dtype=jnp.float32) * s

    return {
        # conv head: PyTorch weight layout (Cout, Cin, K, K)
        "conv1_w": nrm(keys[0], (32, in_channels, 8, 8)),
        "conv1_b": nrm(keys[1], (32,)),
        "conv2_w": nrm(keys[2], (64, 32, 4, 4)),
        "conv2_b": nrm(keys[3], (64,)),
        "conv3_w": nrm(keys[4], (64, 64, 3, 3)),
        "conv3_b": nrm(keys[5], (64,)),
        # Q head (weights stored as (in, out); columns of q2 in (a, atom) order)
        "q1_w": nrm(keys[6], (feat_dim, hidden)),
        "q1_b": nrm(keys[7], (hidden,)),
        "q2_w": nrm(keys[8], (hidden, action_num * num_atoms)),
        "q2_b": nrm(keys[9], (action_num * num_atoms,)),
        # V head (dueling)
        "v1_w": nrm(keys[10], (feat_dim, hidden)),
        "v1_b": nrm(keys[11], (hidden,)),
        "v2_w": nrm(keys[12], (hidden, num_atoms)),
        "v2_b": nrm(keys[13], (num_atoms,)),
    }


# --------------------------------- main ------------------------------------

if __name__ == "__main__":
    # state_shape=(4, 36, 36): spatial 36 -> 8 -> 3 -> 1, feature dim 64*1*1.
    batch, in_channels, spatial = 2, 4, 36
    action_num, num_atoms, hidden = 6, 51, 512
    feat_dim = 64

    key = jax.random.PRNGKey(0)
    k_obs, k_params = jax.random.split(key)
    obs = jax.random.normal(k_obs, (batch, in_channels, spatial, spatial),
                            dtype=jnp.float32)
    params = init_params(k_params, in_channels, feat_dim, action_num,
                         num_atoms, hidden)

    # One-time weight packing, outside the per-step jitted forward.
    packed, atom_pad = pack_params(
        params, state_shape=(in_channels, spatial, spatial),
        action_num=action_num, num_atoms=num_atoms, hidden=hidden)
    packed = jax.block_until_ready(packed)

    fwd = jax.jit(functools.partial(rainbow_forward,
                                    action_num=action_num,
                                    num_atoms=num_atoms,
                                    atom_pad=atom_pad,
                                    hidden=hidden))
    probs = jax.block_until_ready(fwd(obs, packed))

    assert probs.shape == (batch, action_num, num_atoms)
    assert bool(jnp.all(probs >= 0.0))
    assert bool(jnp.allclose(jnp.sum(probs, axis=-1), 1.0, atol=1e-4))
    print("KERNEL_OK")
</pallas_src>

<mosaic_0001>
module attributes {stable_mosaic.version = 11 : i64} {
  func.func @_linear_kernel(%arg0: i32, %arg1: memref<128x256xbf16, #tpu.memory_space<vmem>>, %arg2: memref<256x128xbf16, #tpu.memory_space<vmem>>, %arg3: memref<1x128xf32, #tpu.memory_space<vmem>>, %arg4: memref<128x128xbf16, #tpu.memory_space<vmem>>) attributes {dimension_semantics = [#tpu.dimension_semantics<parallel>], iteration_bounds = array<i64: 1>, scalar_prefetch = 0 : i64, scratch_operands = 0 : i64, tpu.core_type = #tpu.core_type<tc>, window_params = [{transform_indices = @transform_0, window_bounds = array<i64: 128, 256>}, {pipeline_mode = #tpu.pipeline_mode<synchronous>, transform_indices = @transform_1, window_bounds = array<i64: 256, 128>}, {pipeline_mode = #tpu.pipeline_mode<synchronous>, transform_indices = @transform_2, window_bounds = array<i64: 1, 128>}, {transform_indices = @transform_3, window_bounds = array<i64: 128, 128>}]} {
    %c0 = arith.constant 0 : index
    %c0_0 = arith.constant 0 : index
    %0 = vector.load %arg1[%c0, %c0_0] : memref<128x256xbf16, #tpu.memory_space<vmem>>, vector<128x256xbf16>
    %c0_1 = arith.constant 0 : index
    %c0_2 = arith.constant 0 : index
    %1 = vector.load %arg2[%c0_1, %c0_2] : memref<256x128xbf16, #tpu.memory_space<vmem>>, vector<256x128xbf16>
    %cst = arith.constant dense<0.000000e+00> : vector<128x128xf32>
    %2 = tpu.matmul %0, %1, %cst {dimension_numbers = #tpu.dot_dimension_numbers<[1], [0], [0], [1], [0, 0, 1, 1], [], []>} : vector<128x256xbf16>, vector<256x128xbf16>, vector<128x128xf32> -> vector<128x128xf32>
    %c0_3 = arith.constant 0 : index
    %c0_4 = arith.constant 0 : index
    %3 = vector.load %arg3[%c0_3, %c0_4] : memref<1x128xf32, #tpu.memory_space<vmem>>, vector<1x128xf32>
    %4 = vector.broadcast %3 : vector<1x128xf32> to vector<128x128xf32>
    %5 = arith.addf %2, %4 : vector<128x128xf32>
    %cst_5 = arith.constant 0.000000e+00 : f32
    %6 = vector.broadcast %cst_5 : f32 to vector<128x128xf32>
    %7 = arith.maximumf %5, %6 : vector<128x128xf32>
    %8 = arith.truncf %7 : vector<128x128xf32> to vector<128x128xbf16>
    %c0_6 = arith.constant 0 : index
    %c0_7 = arith.constant 0 : index
    %9 = vector.load %arg4[%c0_6, %c0_7] : memref<128x128xbf16, #tpu.memory_space<vmem>>, vector<128x128xbf16>
    tpu.vector_store %arg4[%c0_6, %c0_7], %8 {strides = array<i32>} : memref<128x128xbf16, #tpu.memory_space<vmem>>, vector<128x128xbf16>,
    return
  }
  func.func @transform_0(%arg0: i32) -> (i32, i32) {
    %c0_i32 = arith.constant 0 : i32
    %c0_i32_0 = arith.constant 0 : i32
    return %arg0, %c0_i32 : i32, i32
  }
  func.func @transform_1(%arg0: i32) -> (i32, i32) {
    %c0_i32 = arith.constant 0 : i32
    %c0_i32_0 = arith.constant 0 : i32
    %c0_i32_1 = arith.constant 0 : i32
    return %c0_i32, %c0_i32_0 : i32, i32
  }
  func.func @transform_2(%arg0: i32) -> (i32, i32) {
    %c0_i32 = arith.constant 0 : i32
    %c0_i32_0 = arith.constant 0 : i32
    %c0_i32_1 = arith.constant 0 : i32
    return %c0_i32, %c0_i32_0 : i32, i32
  }
  func.func @transform_3(%arg0: i32) -> (i32, i32) {
    %c0_i32 = arith.constant 0 : i32
    %c0_i32_0 = arith.constant 0 : i32
    return %arg0, %c0_i32 : i32, i32
  }
}

module attributes {stable_mosaic.version = 11 : i64} {
  func.func @_linear_kernel(%arg0: i32, %arg1: memref<18x2048xbf16, #tpu.memory_space<vmem>>, %arg2: memref<2048x128xbf16, #tpu.memory_space<vmem>>, %arg3: memref<1x128xf32, #tpu.memory_space<vmem>>, %arg4: memref<18x128xbf16, #tpu.memory_space<vmem>>) attributes {dimension_semantics = [#tpu.dimension_semantics<parallel>], iteration_bounds = array<i64: 1>, scalar_prefetch = 0 : i64, scratch_operands = 0 : i64, tpu.core_type = #tpu.core_type<tc>, window_params = [{transform_indices = @transform_0, window_bounds = array<i64: 18, 2048>}, {pipeline_mode = #tpu.pipeline_mode<synchronous>, transform_indices = @transform_1, window_bounds = array<i64: 2048, 128>}, {pipeline_mode = #tpu.pipeline_mode<synchronous>, transform_indices = @transform_2, window_bounds = array<i64: 1, 128>}, {transform_indices = @transform_3, window_bounds = array<i64: 18, 128>}]} {
    %c0 = arith.constant 0 : index
    %c0_0 = arith.constant 0 : index
    %0 = vector.load %arg1[%c0, %c0_0] : memref<18x2048xbf16, #tpu.memory_space<vmem>>, vector<18x2048xbf16>
    %c0_1 = arith.constant 0 : index
    %c0_2 = arith.constant 0 : index
    %1 = vector.load %arg2[%c0_1, %c0_2] : memref<2048x128xbf16, #tpu.memory_space<vmem>>, vector<2048x128xbf16>
    %cst = arith.constant dense<0.000000e+00> : vector<18x128xf32>
    %2 = tpu.matmul %0, %1, %cst {dimension_numbers = #tpu.dot_dimension_numbers<[1], [0], [0], [1], [0, 0, 1, 1], [], []>} : vector<18x2048xbf16>, vector<2048x128xbf16>, vector<18x128xf32> -> vector<18x128xf32>
    %c0_3 = arith.constant 0 : index
    %c0_4 = arith.constant 0 : index
    %3 = vector.load %arg3[%c0_3, %c0_4] : memref<1x128xf32, #tpu.memory_space<vmem>>, vector<1x128xf32>
    %4 = vector.broadcast %3 : vector<1x128xf32> to vector<18x128xf32>
    %5 = arith.addf %2, %4 : vector<18x128xf32>
    %cst_5 = arith.constant 0.000000e+00 : f32
    %6 = vector.broadcast %cst_5 : f32 to vector<18x128xf32>
    %7 = arith.maximumf %5, %6 : vector<18x128xf32>
    %8 = arith.truncf %7 : vector<18x128xf32> to vector<18x128xbf16>
    %c0_6 = arith.constant 0 : index
    %c0_7 = arith.constant 0 : index
    %9 = vector.load %arg4[%c0_6, %c0_7] : memref<18x128xbf16, #tpu.memory_space<vmem>>, vector<18x128xbf16>
    tpu.vector_store %arg4[%c0_6, %c0_7], %8 {strides = array<i32>} : memref<18x128xbf16, #tpu.memory_space<vmem>>, vector<18x128xbf16>,
    return
  }
  func.func @transform_0(%arg0: i32) -> (i32, i32) {
    %c0_i32 = arith.constant 0 : i32
    %c0_i32_0 = arith.constant 0 : i32
    return %arg0, %c0_i32 : i32, i32
  }
  func.func @transform_1(%arg0: i32) -> (i32, i32) {
    %c0_i32 = arith.constant 0 : i32
    %c0_i32_0 = arith.constant 0 : i32
    %c0_i32_1 = arith.constant 0 : i32
    return %c0_i32, %c0_i32_0 : i32, i32
  }
  func.func @transform_2(%arg0: i32) -> (i32, i32) {
    %c0_i32 = arith.constant 0 : i32
    %c0_i32_0 = arith.constant 0 : i32
    %c0_i32_1 = arith.constant 0 : i32
    return %c0_i32, %c0_i32_0 : i32, i32
  }
  func.func @transform_3(%arg0: i32) -> (i32, i32) {
    %c0_i32 = arith.constant 0 : i32
    %c0_i32_0 = arith.constant 0 : i32
    return %arg0, %c0_i32 : i32, i32
  }
}

module attributes {stable_mosaic.version = 11 : i64} {
  func.func @_head_kernel(%arg0: i32, %arg1: memref<2x128xbf16, #tpu.memory_space<vmem>>, %arg2: memref<128x1024xbf16, #tpu.memory_space<vmem>>, %arg3: memref<1x1024xf32, #tpu.memory_space<vmem>>, %arg4: memref<512x768xbf16, #tpu.memory_space<vmem>>, %arg5: memref<1x768xf32, #tpu.memory_space<vmem>>, %arg6: memref<512x128xbf16, #tpu.memory_space<vmem>>, %arg7: memref<1x128xf32, #tpu.memory_space<vmem>>, %arg8: memref<512x128xbf16, #tpu.memory_space<vmem>>, %arg9: memref<1x128xf32, #tpu.memory_space<vmem>>, %arg10: memref<2x768xf32, #tpu.memory_space<vmem>>) attributes {dimension_semantics = [#tpu.dimension_semantics<parallel>], iteration_bounds = array<i64: 1>, scalar_prefetch = 0 : i64, scratch_operands = 0 : i64, tpu.core_type = #tpu.core_type<tc>, window_params = [{transform_indices = @transform_0, window_bounds = array<i64: 2, 128>}, {pipeline_mode = #tpu.pipeline_mode<synchronous>, transform_indices = @transform_1, window_bounds = array<i64: 128, 1024>}, {pipeline_mode = #tpu.pipeline_mode<synchronous>, transform_indices = @transform_2, window_bounds = array<i64: 1, 1024>}, {pipeline_mode = #tpu.pipeline_mode<synchronous>, transform_indices = @transform_3, window_bounds = array<i64: 512, 768>}, {pipeline_mode = #tpu.pipeline_mode<synchronous>, transform_indices = @transform_4, window_bounds = array<i64: 1, 768>}, {pipeline_mode = #tpu.pipeline_mode<synchronous>, transform_indices = @transform_5, window_bounds = array<i64: 512, 128>}, {pipeline_mode = #tpu.pipeline_mode<synchronous>, transform_indices = @transform_6, window_bounds = array<i64: 1, 128>}, {pipeline_mode = #tpu.pipeline_mode<synchronous>, transform_indices = @transform_7, window_bounds = array<i64: 512, 128>}, {pipeline_mode = #tpu.pipeline_mode<synchronous>, transform_indices = @transform_8, window_bounds = array<i64: 1, 128>}, {transform_indices = @transform_9, window_bounds = array<i64: 2, 768>}]} {
    %c0 = arith.constant 0 : index
    %c0_0 = arith.constant 0 : index
    %0 = vector.load %arg1[%c0, %c0_0] : memref<2x128xbf16, #tpu.memory_space<vmem>>, vector<2x128xbf16>
    %c0_1 = arith.constant 0 : index
    %c0_2 = arith.constant 0 : index
    %1 = vector.load %arg2[%c0_1, %c0_2] : memref<128x1024xbf16, #tpu.memory_space<vmem>>, vector<128x1024xbf16>
    %cst = arith.constant dense<0.000000e+00> : vector<2x1024xf32>
    %2 = tpu.matmul %0, %1, %cst {dimension_numbers = #tpu.dot_dimension_numbers<[1], [0], [0], [1], [0, 0, 1, 1], [], []>} : vector<2x128xbf16>, vector<128x1024xbf16>, vector<2x1024xf32> -> vector<2x1024xf32>
    %c0_3 = arith.constant 0 : index
    %c0_4 = arith.constant 0 : index
    %3 = vector.load %arg3[%c0_3, %c0_4] : memref<1x1024xf32, #tpu.memory_space<vmem>>, vector<1x1024xf32>
    %4 = vector.broadcast %3 : vector<1x1024xf32> to vector<2x1024xf32>
    %5 = arith.addf %2, %4 : vector<2x1024xf32>
    %cst_5 = arith.constant 0.000000e+00 : f32
    %6 = vector.broadcast %cst_5 : f32 to vector<2x1024xf32>
    %7 = arith.maximumf %5, %6 : vector<2x1024xf32>
    %8 = arith.truncf %7 : vector<2x1024xf32> to vector<2x1024xbf16>
    %9 = vector.extract_strided_slice %8 {offsets = [0, 0], sizes = [2, 512], strides = [1, 1]} : vector<2x1024xbf16> to vector<2x512xbf16>
    %10 = vector.extract_strided_slice %8 {offsets = [0, 512], sizes = [2, 512], strides = [1, 1]} : vector<2x1024xbf16> to vector<2x512xbf16>
    %c0_6 = arith.constant 0 : index
    %c0_7 = arith.constant 0 : index
    %11 = vector.load %arg4[%c0_6, %c0_7] : memref<512x768xbf16, #tpu.memory_space<vmem>>, vector<512x768xbf16>
    %cst_8 = arith.constant dense<0.000000e+00> : vector<2x768xf32>
    %12 = tpu.matmul %9, %11, %cst_8 {dimension_numbers = #tpu.dot_dimension_numbers<[1], [0], [0], [1], [0, 0, 1, 1], [], []>} : vector<2x512xbf16>, vector<512x768xbf16>, vector<2x768xf32> -> vector<2x768xf32>
    %c0_9 = arith.constant 0 : index
    %c0_10 = arith.constant 0 : index
    %13 = vector.load %arg5[%c0_9, %c0_10] : memref<1x768xf32, #tpu.memory_space<vmem>>, vector<1x768xf32>
    %14 = vector.broadcast %13 : vector<1x768xf32> to vector<2x768xf32>
    %15 = arith.addf %12, %14 : vector<2x768xf32>
    %c0_11 = arith.constant 0 : index
    %c0_12 = arith.constant 0 : index
    %16 = vector.load %arg6[%c0_11, %c0_12] : memref<512x128xbf16, #tpu.memory_space<vmem>>, vector<512x128xbf16>
    %cst_13 = arith.constant dense<0.000000e+00> : vector<2x128xf32>
    %17 = tpu.matmul %9, %16, %cst_13 {dimension_numbers = #tpu.dot_dimension_numbers<[1], [0], [0], [1], [0, 0, 1, 1], [], []>} : vector<2x512xbf16>, vector<512x128xbf16>, vector<2x128xf32> -> vector<2x128xf32>
    %c0_14 = arith.constant 0 : index
    %c0_15 = arith.constant 0 : index
    %18 = vector.load %arg7[%c0_14, %c0_15] : memref<1x128xf32, #tpu.memory_space<vmem>>, vector<1x128xf32>
    %19 = vector.broadcast %18 : vector<1x128xf32> to vector<2x128xf32>
    %20 = arith.addf %17, %19 : vector<2x128xf32>
    %c0_16 = arith.constant 0 : index
    %c0_17 = arith.constant 0 : index
    %21 = vector.load %arg8[%c0_16, %c0_17] : memref<512x128xbf16, #tpu.memory_space<vmem>>, vector<512x128xbf16>
    %cst_18 = arith.constant dense<0.000000e+00> : vector<2x128xf32>
    %22 = tpu.matmul %10, %21, %cst_18 {dimension_numbers = #tpu.dot_dimension_numbers<[1], [0], [0], [1], [0, 0, 1, 1], [], []>} : vector<2x512xbf16>, vector<512x128xbf16>, vector<2x128xf32> -> vector<2x128xf32>
    %c0_19 = arith.constant 0 : index
    %c0_20 = arith.constant 0 : index
    %23 = vector.load %arg9[%c0_19, %c0_20] : memref<1x128xf32, #tpu.memory_space<vmem>>, vector<1x128xf32>
    %24 = vector.broadcast %23 : vector<1x128xf32> to vector<2x128xf32>
    %25 = arith.addf %22, %24 : vector<2x128xf32>
    %26 = arith.subf %25, %20 : vector<2x128xf32>
    %27 = vector.extract_strided_slice %15 {offsets = [0, 0], sizes = [2, 128], strides = [1, 1]} : vector<2x768xf32> to vector<2x128xf32>
    %28 = arith.addf %27, %26 : vector<2x128xf32>
    %cst_21 = arith.constant dense<0xFF800000> : vector<2xf32>
    %29 = vector.multi_reduction <maximumf>, %28, %cst_21 [1] : vector<2x128xf32> to vector<2xf32>
    %30 = vector.shape_cast %29 : vector<2xf32> to vector<2x1xf32>
    %31 = vector.broadcast %30 : vector<2x1xf32> to vector<2x128xf32>
    %32 = arith.subf %28, %31 : vector<2x128xf32>
    %33 = math.exp %32 : vector<2x128xf32>
    %cst_22 = arith.constant dense<0.000000e+00> : vector<2xf32>
    %34 = vector.multi_reduction <add>, %33, %cst_22 [1] : vector<2x128xf32> to vector<2xf32>
    %35 = vector.shape_cast %34 : vector<2xf32> to vector<2x1xf32>
    %36 = tpu.reciprocal %35 {approx = true} : vector<2x1xf32> -> vector<2x1xf32>
    %37 = arith.mulf %35, %36 : vector<2x1xf32>
    %cst_23 = arith.constant 2.000000e+00 : f32
    %38 = vector.broadcast %cst_23 : f32 to vector<2x1xf32>
    %39 = arith.subf %38, %37 : vector<2x1xf32>
    %40 = arith.mulf %36, %39 : vector<2x1xf32>
    %41 = vector.broadcast %40 : vector<2x1xf32> to vector<2x128xf32>
    %42 = arith.mulf %33, %41 : vector<2x128xf32>
    %c0_24 = arith.constant 0 : index
    %c0_25 = arith.constant 0 : index
    %43 = vector.load %arg10[%c0_24, %c0_25] : memref<2x768xf32, #tpu.memory_space<vmem>>, vector<2x128xf32>
    tpu.vector_store %arg10[%c0_24, %c0_25], %42 {strides = array<i32>} : memref<2x768xf32, #tpu.memory_space<vmem>>, vector<2x128xf32>,
    %44 = vector.extract_strided_slice %15 {offsets = [0, 128], sizes = [2, 128], strides = [1, 1]} : vector<2x768xf32> to vector<2x128xf32>
    %45 = arith.addf %44, %26 : vector<2x128xf32>
    %cst_26 = arith.constant dense<0xFF800000> : vector<2xf32>
    %46 = vector.multi_reduction <maximumf>, %45, %cst_26 [1] : vector<2x128xf32> to vector<2xf32>
    %47 = vector.shape_cast %46 : vector<2xf32> to vector<2x1xf32>
    %48 = vector.broadcast %47 : vector<2x1xf32> to vector<2x128xf32>
    %49 = arith.subf %45, %48 : vector<2x128xf32>
    %50 = math.exp %49 : vector<2x128xf32>
    %cst_27 = arith.constant dense<0.000000e+00> : vector<2xf32>
    %51 = vector.multi_reduction <add>, %50, %cst_27 [1] : vector<2x128xf32> to vector<2xf32>
    %52 = vector.shape_cast %51 : vector<2xf32> to vector<2x1xf32>
    %53 = tpu.reciprocal %52 {approx = true} : vector<2x1xf32> -> vector<2x1xf32>
    %54 = arith.mulf %52, %53 : vector<2x1xf32>
    %cst_28 = arith.constant 2.000000e+00 : f32
    %55 = vector.broadcast %cst_28 : f32 to vector<2x1xf32>
    %56 = arith.subf %55, %54 : vector<2x1xf32>
    %57 = arith.mulf %53, %56 : vector<2x1xf32>
    %58 = vector.broadcast %57 : vector<2x1xf32> to vector<2x128xf32>
    %59 = arith.mulf %50, %58 : vector<2x128xf32>
    %c0_29 = arith.constant 0 : index
    %c128 = arith.constant 128 : index
    %60 = vector.load %arg10[%c0_29, %c128] : memref<2x768xf32, #tpu.memory_space<vmem>>, vector<2x128xf32>
    tpu.vector_store %arg10[%c0_29, %c128], %59 {strides = array<i32>} : memref<2x768xf32, #tpu.memory_space<vmem>>, vector<2x128xf32>,
    %61 = vector.extract_strided_slice %15 {offsets = [0, 256], sizes = [2, 128], strides = [1, 1]} : vector<2x768xf32> to vector<2x128xf32>
    %62 = arith.addf %61, %26 : vector<2x128xf32>
    %cst_30 = arith.constant dense<0xFF800000> : vector<2xf32>
    %63 = vector.multi_reduction <maximumf>, %62, %cst_30 [1] : vector<2x128xf32> to vector<2xf32>
    %64 = vector.shape_cast %63 : vector<2xf32> to vector<2x1xf32>
    %65 = vector.broadcast %64 : vector<2x1xf32> to vector<2x128xf32>
    %66 = arith.subf %62, %65 : vector<2x128xf32>
    %67 = math.exp %66 : vector<2x128xf32>
    %cst_31 = arith.constant dense<0.000000e+00> : vector<2xf32>
    %68 = vector.multi_reduction <add>, %67, %cst_31 [1] : vector<2x128xf32> to vector<2xf32>
    %69 = vector.shape_cast %68 : vector<2xf32> to vector<2x1xf32>
    %70 = tpu.reciprocal %69 {approx = true} : vector<2x1xf32> -> vector<2x1xf32>
    %71 = arith.mulf %69, %70 : vector<2x1xf32>
    %cst_32 = arith.constant 2.000000e+00 : f32
    %72 = vector.broadcast %cst_32 : f32 to vector<2x1xf32>
    %73 = arith.subf %72, %71 : vector<2x1xf32>
    %74 = arith.mulf %70, %73 : vector<2x1xf32>
    %75 = vector.broadcast %74 : vector<2x1xf32> to vector<2x128xf32>
    %76 = arith.mulf %67, %75 : vector<2x128xf32>
    %c0_33 = arith.constant 0 : index
    %c256 = arith.constant 256 : index
    %77 = vector.load %arg10[%c0_33, %c256] : memref<2x768xf32, #tpu.memory_space<vmem>>, vector<2x128xf32>
    tpu.vector_store %arg10[%c0_33, %c256], %76 {strides = array<i32>} : memref<2x768xf32, #tpu.memory_space<vmem>>, vector<2x128xf32>,
    %78 = vector.extract_strided_slice %15 {offsets = [0, 384], sizes = [2, 128], strides = [1, 1]} : vector<2x768xf32> to vector<2x128xf32>
    %79 = arith.addf %78, %26 : vector<2x128xf32>
    %cst_34 = arith.constant dense<0xFF800000> : vector<2xf32>
    %80 = vector.multi_reduction <maximumf>, %79, %cst_34 [1] : vector<2x128xf32> to vector<2xf32>
    %81 = vector.shape_cast %80 : vector<2xf32> to vector<2x1xf32>
    %82 = vector.broadcast %81 : vector<2x1xf32> to vector<2x128xf32>
    %83 = arith.subf %79, %82 : vector<2x128xf32>
    %84 = math.exp %83 : vector<2x128xf32>
    %cst_35 = arith.constant dense<0.000000e+00> : vector<2xf32>
    %85 = vector.multi_reduction <add>, %84, %cst_35 [1] : vector<2x128xf32> to vector<2xf32>
    %86 = vector.shape_cast %85 : vector<2xf32> to vector<2x1xf32>
    %87 = tpu.reciprocal %86 {approx = true} : vector<2x1xf32> -> vector<2x1xf32>
    %88 = arith.mulf %86, %87 : vector<2x1xf32>
    %cst_36 = arith.constant 2.000000e+00 : f32
    %89 = vector.broadcast %cst_36 : f32 to vector<2x1xf32>
    %90 = arith.subf %89, %88 : vector<2x1xf32>
    %91 = arith.mulf %87, %90 : vector<2x1xf32>
    %92 = vector.broadcast %91 : vector<2x1xf32> to vector<2x128xf32>
    %93 = arith.mulf %84, %92 : vector<2x128xf32>
    %c0_37 = arith.constant 0 : index
    %c384 = arith.constant 384 : index
    %94 = vector.load %arg10[%c0_37, %c384] : memref<2x768xf32, #tpu.memory_space<vmem>>, vector<2x128xf32>
    tpu.vector_store %arg10[%c0_37, %c384], %93 {strides = array<i32>} : memref<2x768xf32, #tpu.memory_space<vmem>>, vector<2x128xf32>,
    %95 = vector.extract_strided_slice %15 {offsets = [0, 512], sizes = [2, 128], strides = [1, 1]} : vector<2x768xf32> to vector<2x128xf32>
    %96 = arith.addf %95, %26 : vector<2x128xf32>
    %cst_38 = arith.constant dense<0xFF800000> : vector<2xf32>
    %97 = vector.multi_reduction <maximumf>, %96, %cst_38 [1] : vector<2x128xf32> to vector<2xf32>
    %98 = vector.shape_cast %97 : vector<2xf32> to vector<2x1xf32>
    %99 = vector.broadcast %98 : vector<2x1xf32> to vector<2x128xf32>
    %100 = arith.subf %96, %99 : vector<2x128xf32>
    %101 = math.exp %100 : vector<2x128xf32>
    %cst_39 = arith.constant dense<0.000000e+00> : vector<2xf32>
    %102 = vector.multi_reduction <add>, %101, %cst_39 [1] : vector<2x128xf32> to vector<2xf32>
    %103 = vector.shape_cast %102 : vector<2xf32> to vector<2x1xf32>
    %104 = tpu.reciprocal %103 {approx = true} : vector<2x1xf32> -> vector<2x1xf32>
    %105 = arith.mulf %103, %104 : vector<2x1xf32>
    %cst_40 = arith.constant 2.000000e+00 : f32
    %106 = vector.broadcast %cst_40 : f32 to vector<2x1xf32>
    %107 = arith.subf %106, %105 : vector<2x1xf32>
    %108 = arith.mulf %104, %107 : vector<2x1xf32>
    %109 = vector.broadcast %108 : vector<2x1xf32> to vector<2x128xf32>
    %110 = arith.mulf %101, %109 : vector<2x128xf32>
    %c0_41 = arith.constant 0 : index
    %c512 = arith.constant 512 : index
    %111 = vector.load %arg10[%c0_41, %c512] : memref<2x768xf32, #tpu.memory_space<vmem>>, vector<2x128xf32>
    tpu.vector_store %arg10[%c0_41, %c512], %110 {strides = array<i32>} : memref<2x768xf32, #tpu.memory_space<vmem>>, vector<2x128xf32>,
    %112 = vector.extract_strided_slice %15 {offsets = [0, 640], sizes = [2, 128], strides = [1, 1]} : vector<2x768xf32> to vector<2x128xf32>
    %113 = arith.addf %112, %26 : vector<2x128xf32>
    %cst_42 = arith.constant dense<0xFF800000> : vector<2xf32>
    %114 = vector.multi_reduction <maximumf>, %113, %cst_42 [1] : vector<2x128xf32> to vector<2xf32>
    %115 = vector.shape_cast %114 : vector<2xf32> to vector<2x1xf32>
    %116 = vector.broadcast %115 : vector<2x1xf32> to vector<2x128xf32>
    %117 = arith.subf %113, %116 : vector<2x128xf32>
    %118 = math.exp %117 : vector<2x128xf32>
    %cst_43 = arith.constant dense<0.000000e+00> : vector<2xf32>
    %119 = vector.multi_reduction <add>, %118, %cst_43 [1] : vector<2x128xf32> to vector<2xf32>
    %120 = vector.shape_cast %119 : vector<2xf32> to vector<2x1xf32>
    %121 = tpu.reciprocal %120 {approx = true} : vector<2x1xf32> -> vector<2x1xf32>
    %122 = arith.mulf %120, %121 : vector<2x1xf32>
    %cst_44 = arith.constant 2.000000e+00 : f32
    %123 = vector.broadcast %cst_44 : f32 to vector<2x1xf32>
    %124 = arith.subf %123, %122 : vector<2x1xf32>
    %125 = arith.mulf %121, %124 : vector<2x1xf32>
    %126 = vector.broadcast %125 : vector<2x1xf32> to vector<2x128xf32>
    %127 = arith.mulf %118, %126 : vector<2x128xf32>
    %c0_45 = arith.constant 0 : index
    %c640 = arith.constant 640 : index
    %128 = vector.load %arg10[%c0_45, %c640] : memref<2x768xf32, #tpu.memory_space<vmem>>, vector<2x128xf32>
    tpu.vector_store %arg10[%c0_45, %c640], %127 {strides = array<i32>} : memref<2x768xf32, #tpu.memory_space<vmem>>, vector<2x128xf32>,
    return
  }
  func.func @transform_0(%arg0: i32) -> (i32, i32) {
    %c0_i32 = arith.constant 0 : i32
    %c0_i32_0 = arith.constant 0 : i32
    return %arg0, %c0_i32 : i32, i32
  }
  func.func @transform_1(%arg0: i32) -> (i32, i32) {
    %c0_i32 = arith.constant 0 : i32
    %c0_i32_0 = arith.constant 0 : i32
    %c0_i32_1 = arith.constant 0 : i32
    return %c0_i32, %c0_i32_0 : i32, i32
  }
  func.func @transform_2(%arg0: i32) -> (i32, i32) {
    %c0_i32 = arith.constant 0 : i32
    %c0_i32_0 = arith.constant 0 : i32
    %c0_i32_1 = arith.constant 0 : i32
    return %c0_i32, %c0_i32_0 : i32, i32
  }
  func.func @transform_3(%arg0: i32) -> (i32, i32) {
    %c0_i32 = arith.constant 0 : i32
    %c0_i32_0 = arith.constant 0 : i32
    %c0_i32_1 = arith.constant 0 : i32
    return %c0_i32, %c0_i32_0 : i32, i32
  }
  func.func @transform_4(%arg0: i32) -> (i32, i32) {
    %c0_i32 = arith.constant 0 : i32
    %c0_i32_0 = arith.constant 0 : i32
    %c0_i32_1 = arith.constant 0 : i32
    return %c0_i32, %c0_i32_0 : i32, i32
  }
  func.func @transform_5(%arg0: i32) -> (i32, i32) {
    %c0_i32 = arith.constant 0 : i32
    %c0_i32_0 = arith.constant 0 : i32
    %c0_i32_1 = arith.constant 0 : i32
    return %c0_i32, %c0_i32_0 : i32, i32
  }
  func.func @transform_6(%arg0: i32) -> (i32, i32) {
    %c0_i32 = arith.constant 0 : i32
    %c0_i32_0 = arith.constant 0 : i32
    %c0_i32_1 = arith.constant 0 : i32
    return %c0_i32, %c0_i32_0 : i32, i32
  }
  func.func @transform_7(%arg0: i32) -> (i32, i32) {
    %c0_i32 = arith.constant 0 : i32
    %c0_i32_0 = arith.constant 0 : i32
    %c0_i32_1 = arith.constant 0 : i32
    return %c0_i32, %c0_i32_0 : i32, i32
  }
  func.func @transform_8(%arg0: i32) -> (i32, i32) {
    %c0_i32 = arith.constant 0 : i32
    %c0_i32_0 = arith.constant 0 : i32
    %c0_i32_1 = arith.constant 0 : i32
    return %c0_i32, %c0_i32_0 : i32, i32
  }
  func.func @transform_9(%arg0: i32) -> (i32, i32) {
    %c0_i32 = arith.constant 0 : i32
    %c0_i32_0 = arith.constant 0 : i32
    return %arg0, %c0_i32 : i32, i32
  }
}

module attributes {stable_mosaic.version = 11 : i64} {
  func.func @_linear_kernel(%arg0: i32, %arg1: memref<2x1152xbf16, #tpu.memory_space<vmem>>, %arg2: memref<1152x128xbf16, #tpu.memory_space<vmem>>, %arg3: memref<1x128xf32, #tpu.memory_space<vmem>>, %arg4: memref<2x128xbf16, #tpu.memory_space<vmem>>) attributes {dimension_semantics = [#tpu.dimension_semantics<parallel>], iteration_bounds = array<i64: 1>, scalar_prefetch = 0 : i64, scratch_operands = 0 : i64, tpu.core_type = #tpu.core_type<tc>, window_params = [{transform_indices = @transform_0, window_bounds = array<i64: 2, 1152>}, {pipeline_mode = #tpu.pipeline_mode<synchronous>, transform_indices = @transform_1, window_bounds = array<i64: 1152, 128>}, {pipeline_mode = #tpu.pipeline_mode<synchronous>, transform_indices = @transform_2, window_bounds = array<i64: 1, 128>}, {transform_indices = @transform_3, window_bounds = array<i64: 2, 128>}]} {
    %c0 = arith.constant 0 : index
    %c0_0 = arith.constant 0 : index
    %0 = vector.load %arg1[%c0, %c0_0] : memref<2x1152xbf16, #tpu.memory_space<vmem>>, vector<2x1152xbf16>
    %c0_1 = arith.constant 0 : index
    %c0_2 = arith.constant 0 : index
    %1 = vector.load %arg2[%c0_1, %c0_2] : memref<1152x128xbf16, #tpu.memory_space<vmem>>, vector<1152x128xbf16>
    %cst = arith.constant dense<0.000000e+00> : vector<2x128xf32>
    %2 = tpu.matmul %0, %1, %cst {dimension_numbers = #tpu.dot_dimension_numbers<[1], [0], [0], [1], [0, 0, 1, 1], [], []>} : vector<2x1152xbf16>, vector<1152x128xbf16>, vector<2x128xf32> -> vector<2x128xf32>
    %c0_3 = arith.constant 0 : index
    %c0_4 = arith.constant 0 : index
    %3 = vector.load %arg3[%c0_3, %c0_4] : memref<1x128xf32, #tpu.memory_space<vmem>>, vector<1x128xf32>
    %4 = vector.broadcast %3 : vector<1x128xf32> to vector<2x128xf32>
    %5 = arith.addf %2, %4 : vector<2x128xf32>
    %cst_5 = arith.constant 0.000000e+00 : f32
    %6 = vector.broadcast %cst_5 : f32 to vector<2x128xf32>
    %7 = arith.maximumf %5, %6 : vector<2x128xf32>
    %8 = arith.truncf %7 : vector<2x128xf32> to vector<2x128xbf16>
    %c0_6 = arith.constant 0 : index
    %c0_7 = arith.constant 0 : index
    %9 = vector.load %arg4[%c0_6, %c0_7] : memref<2x128xbf16, #tpu.memory_space<vmem>>, vector<2x128xbf16>
    tpu.vector_store %arg4[%c0_6, %c0_7], %8 {strides = array<i32>} : memref<2x128xbf16, #tpu.memory_space<vmem>>, vector<2x128xbf16>,
    return
  }
  func.func @transform_0(%arg0: i32) -> (i32, i32) {
    %c0_i32 = arith.constant 0 : i32
    %c0_i32_0 = arith.constant 0 : i32
    return %arg0, %c0_i32 : i32, i32
  }
  func.func @transform_1(%arg0: i32) -> (i32, i32) {
    %c0_i32 = arith.constant 0 : i32
    %c0_i32_0 = arith.constant 0 : i32
    %c0_i32_1 = arith.constant 0 : i32
    return %c0_i32, %c0_i32_0 : i32, i32
  }
  func.func @transform_2(%arg0: i32) -> (i32, i32) {
    %c0_i32 = arith.constant 0 : i32
    %c0_i32_0 = arith.constant 0 : i32
    %c0_i32_1 = arith.constant 0 : i32
    return %c0_i32, %c0_i32_0 : i32, i32
  }
  func.func @transform_3(%arg0: i32) -> (i32, i32) {
    %c0_i32 = arith.constant 0 : i32
    %c0_i32_0 = arith.constant 0 : i32
    return %arg0, %c0_i32 : i32, i32
  }
}

</mosaic_0001>

<bundles_post_ra>
// kernel: rainbow_forward.4
= control target key start
LH: loop header
LB: loop body
LE: loop exit
PB: predicated region body
PF: predicated region fallthrough
CT: control target
= control target key end

     0   :  { %s836_s1 = inlined_call_operand.vmem [shape: bf16[256,128], index: 1, kind: input, shape index: {}]   ;;  %s837_s0 = inlined_call_operand.vmem [shape: bf16[128,256], index: 0, kind: input, shape index: {}]   ;;  %s838_s2 = inlined_call_operand.vmem [shape: f32[1,128], index: 2, kind: input, shape index: {}]   ;;  %s839_s3 = inlined_call_operand.vmem [shape: bf16[128,128], index: 3, kind: output, shape index: {}]  }
   0x1   :  { %v635_v0 = vld [vmem:[%s836_s1 + $0x78] sm:$0xff]   ;;  %v637_v2 = vld [vmem:[%s836_s1 + $0x70] sm:$0xff]   ;;  %v639_v4 = vld [vmem:[%s836_s1 + $0x68] sm:$0xff]  }
   0x2   :  { %v636_v1 = vld [vmem:[%s836_s1 + $0x38] sm:$0xff]   ;;  %555 = vmatprep.subr.bf16.mxu0 %v635_v0  ;;  %619 = vmatprep.subr.bf16.mxu1 %v635_v0  ;;  %v638_v3 = vld [vmem:[%s836_s1 + $0x30] sm:$0xff]   ;;  %v640_v5 = vld [vmem:[%s836_s1 + $0x28] sm:$0xff]  }
   0x3   :  { %556 = vmatpush3.bf16.msra.mxu0 %v636_v1  ;;  %627 = vmatpush3.bf16.msra.mxu1 %v636_v1  ;;  %v641_v6 = vld [vmem:[%s836_s1 + $0x60] sm:$0xff]   ;;  %v643_v8 = vld [vmem:[%s836_s1 + $0x58] sm:$0xff]   ;;  %v645_v10 = vld [vmem:[%s836_s1 + $0x50] sm:$0xff]  }
   0x4   :  { %557 = vmatprep.subr.bf16.mxu0 %v637_v2  ;;  %620 = vmatprep.subr.bf16.mxu1 %v637_v2  ;;  %v642_v7 = vld [vmem:[%s836_s1 + $0x20] sm:$0xff]   ;;  %v644_v9 = vld [vmem:[%s836_s1 + $0x18] sm:$0xff]   ;;  %v646_v13 = vld [vmem:[%s836_s1 + $0x10] sm:$0xff]  }
   0x5   :  { %v653_v11 = vld [vmem:[%s837_s0 + $0x4] ss:$8 sps:$4 sm:$0xff]   ;;  %v651_v18 = vld [vmem:[%s837_s0] ss:$8 sps:$4 sm:$0xff]   ;;  %v657_v20 = vld [vmem:[%s837_s0 + $0x14] ss:$8 sps:$4 sm:$0xff]  }
   0x6   :  { %v656_v12 = vld [vmem:[%s837_s0 + $0x44] ss:$8 sps:$4 sm:$0xff]   ;;  %278 = vmatprep.mubr.bf16.mxu0 %v653_v11  ;;  %v654_v19 = vld [vmem:[%s837_s0 + $0x40] ss:$8 sps:$4 sm:$0xff]   ;;  %v659_v21 = vld [vmem:[%s837_s0 + $0x54] ss:$8 sps:$4 sm:$0xff]  }
   0x7   :  { %558 = vmatpush3.bf16.msra.mxu0 %v638_v3  ;;  %628 = vmatpush3.bf16.msra.mxu1 %v638_v3  ;;  %v647_v14 = vld [vmem:[%s836_s1 + $0x48] sm:$0xff]   ;;  %v649_v16 = vld [vmem:[%s836_s1 + $0x40] sm:$0xff]   ;;  %v661_v22 = vld [vmem:[%s837_s0 + $0x10] ss:$8 sps:$4 sm:$0xff]  }
   0x8   :  { %559 = vmatprep.subr.bf16.mxu0 %v639_v4  ;;  %621 = vmatprep.subr.bf16.mxu1 %v639_v4  ;;  %v648_v15 = vld [vmem:[%s836_s1 + $0x8] sm:$0xff]   ;;  %v650_v17 = vld [vmem:[%s836_s1] sm:$0xff]   ;;  %v662_v23 = vld [vmem:[%s837_s0 + $0x50] ss:$8 sps:$4 sm:$0xff]  }
   0x9   :  { %310 = vmatprep.mubr.bf16.mxu1 %v656_v12  ;;  %v663_v24 = vld [vmem:[%s837_s0 + $0x24] ss:$8 sps:$4 sm:$0xff]   ;;  %v667_v26 = vld [vmem:[%s837_s0 + $0x20] ss:$8 sps:$4 sm:$0xff]   ;;  %v669_v28 = vld [vmem:[%s837_s0 + $0x34] ss:$8 sps:$4 sm:$0xff]  }
   0xa   :  { %v665_v25 = vld [vmem:[%s837_s0 + $0x64] ss:$8 sps:$4 sm:$0xff]   ;;  %v668_v27 = vld [vmem:[%s837_s0 + $0x60] ss:$8 sps:$4 sm:$0xff]   ;;  %v671_v29 = vld [vmem:[%s837_s0 + $0x74] ss:$8 sps:$4 sm:$0xff]  }
   0xb   :  { %560 = vmatpush3.bf16.msra.mxu0 %v640_v5  ;;  %629 = vmatpush3.bf16.msra.mxu1 %v640_v5  ;;  %v673_v30 = vld [vmem:[%s837_s0 + $0x30] ss:$8 sps:$4 sm:$0xff]   ;;  %v794_v36 = vld [vmem:[%s838_s2] ss:$0 sm:$0xff] }
   0xc   :  { %561 = vmatprep.subr.bf16.mxu0 %v641_v6  ;;  %622 = vmatprep.subr.bf16.mxu1 %v641_v6  ;;  %v674_v31 = vld [vmem:[%s837_s0 + $0x70] ss:$8 sps:$4 sm:$0xff]  }
   0xf   :  { %562 = vmatpush3.bf16.msra.mxu0 %v642_v7  ;;  %630 = vmatpush3.bf16.msra.mxu1 %v642_v7 }
  0x10   :  { %563 = vmatprep.subr.bf16.mxu0 %v643_v8  ;;  %623 = vmatprep.subr.bf16.mxu1 %v643_v8 }
  0x13   :  { %564 = vmatpush3.bf16.msra.mxu0 %v644_v9  ;;  %631 = vmatpush3.bf16.msra.mxu1 %v644_v9 }
  0x14   :  { %565 = vmatprep.subr.bf16.mxu0 %v645_v10  ;;  %624 = vmatprep.subr.bf16.mxu1 %v645_v10 }
  0x17   :  { %566 = vmatpush3.bf16.msra.mxu0 %v646_v13  ;;  %632 = vmatpush3.bf16.msra.mxu1 %v646_v13 }
  0x18   :  { %567 = vmatprep.subr.bf16.mxu0 %v647_v14  ;;  %625 = vmatprep.subr.bf16.mxu1 %v647_v14 }
  0x1b   :  { %568 = vmatpush3.bf16.msra.mxu0 %v648_v15  ;;  %633 = vmatpush3.bf16.msra.mxu1 %v648_v15 }
  0x1c   :  { %569 = vmatprep.subr.bf16.mxu0 %v649_v16  ;;  %626 = vmatprep.subr.bf16.mxu1 %v649_v16 }
  0x1f   :  { %570 = vmatpush3.bf16.msra.mxu0 %v650_v17  ;;  %634 = vmatpush3.bf16.msra.mxu1 %v650_v17 }
  0x22   :  { %279 = vmatmul.mubr.bf16.vlgmr.msra.gmra.mxu0 %v651_v18  ;;  %311 = vmatmul.mubr.bf16.vlgmr.msra.gmra.mxu1 %v654_v19 }
  0x23   :  { %286 = vmatprep.mubr.bf16.mxu0 %v657_v20  ;;  %318 = vmatprep.mubr.bf16.mxu1 %v659_v21 }
  0x2a   :  { %287 = vmatmul.mubr.bf16.gmra.mxu0 %v661_v22  ;;  %319 = vmatmul.mubr.bf16.gmra.mxu1 %v662_v23 }
  0x2b   :  { %294 = vmatprep.mubr.bf16.mxu0 %v663_v24  ;;  %326 = vmatprep.mubr.bf16.mxu1 %v665_v25 }
  0x32   :  { %295 = vmatmul.mubr.bf16.gmra.mxu0 %v667_v26  ;;  %327 = vmatmul.mubr.bf16.gmra.mxu1 %v668_v27 }
  0x33   :  { %302 = vmatprep.mubr.bf16.mxu0 %v669_v28  ;;  %334 = vmatprep.mubr.bf16.mxu1 %v671_v29 }
  0x3a   :  { %303 = vmatmul.mubr.bf16.gmra.mxu0 %v673_v30  ;;  %335 = vmatmul.mubr.bf16.gmra.mxu1 %v674_v31 }
  0xe2   :  { %v571_v32 = vpop.f32.mrf.mxu0  ;;  %v595_v33 = vpop.f32.mrf.mxu1 }
  0xe4   :  { %v572_v34 = vpop.f32.mrf.mxu0  ;;  %v596_v35 = vpop.f32.mrf.mxu1 }
  0xe5   :  { %v573_v37 = vadd.f32 %v572_v34, %v571_v32  ;;  %v597_v38 = vadd.f32 %v596_v35, %v595_v33 }
  0xe6   :  { %v574_v39 = vpop.f32.mrf.mxu0  ;;  %v598_v40 = vpop.f32.mrf.mxu1 }
  0xe7   :  { %v281_v41 = vadd.f32 %v573_v37, %v794_v36  ;;  %v313_v42 = vadd.f32 %v597_v38, %v794_v36 }
  0xe8   :  { %v575_v43 = vpop.f32.mrf.mxu0  ;;  %v599_v44 = vpop.f32.mrf.mxu1 }
  0xe9   :  { %v576_v45 = vadd.f32 %v575_v43, %v574_v39  ;;  %v600_v46 = vadd.f32 %v599_v44, %v598_v40  ;;  %v343_v51 = vmax.f32 %v281_v41, 0.0  ;;  %v351_v52 = vmax.f32 %v313_v42, 0.0 }
  0xea   :  { %v577_v47 = vpop.f32.mrf.mxu0  ;;  %v601_v48 = vpop.f32.mrf.mxu1 }
  0xeb   :  { %v284_v49 = vadd.f32 %v576_v45, %v794_v36  ;;  %v316_v50 = vadd.f32 %v600_v46, %v794_v36 }
  0xec   :  { %v578_v53 = vpop.f32.mrf.mxu0  ;;  %v602_v54 = vpop.f32.mrf.mxu1 }
  0xed   :  { %v344_v55 = vmax.f32 %v284_v49, 0.0  ;;  %v352_v56 = vmax.f32 %v316_v50, 0.0  ;;  %v579_v57 = vadd.f32 %v578_v53, %v577_v47  ;;  %v603_v58 = vadd.f32 %v602_v54, %v601_v48 }
  0xee   :  { %v580_v59 = vpop.f32.mrf.mxu0  ;;  %v604_v60 = vpop.f32.mrf.mxu1 }
  0xef   :  { %v511_v61 = vpack.c.bf16 %v344_v55, %v343_v51  ;;  %v531_v62 = vpack.c.bf16 %v352_v56, %v351_v52  ;;  %v289_v63 = vadd.f32 %v579_v57, %v794_v36  ;;  %v321_v0 = vadd.f32 %v603_v58, %v794_v36 }
  0xf0   :  { %v581_v1 = vpop.f32.mrf.mxu0  ;;  %v605_v2 = vpop.f32.mrf.mxu1 }
  0xf1   :  { %512 = vst [vmem:[%s839_s3] sm:$0xff] %v511_v61   ;;  %551 = vst [vmem:[%s839_s3 + $0x20] sm:$0xff] %v531_v62   ;;  %v582_v3 = vadd.f32 %v581_v1, %v580_v59  ;;  %v606_v4 = vadd.f32 %v605_v2, %v604_v60  ;;  %v345_v9 = vmax.f32 %v289_v63, 0.0  ;;  %v353_v10 = vmax.f32 %v321_v0, 0.0 }
  0xf2   :  { %v583_v5 = vpop.f32.mrf.mxu0  ;;  %v607_v6 = vpop.f32.mrf.mxu1 }
  0xf3   :  { %v292_v7 = vadd.f32 %v582_v3, %v794_v36  ;;  %v324_v8 = vadd.f32 %v606_v4, %v794_v36 }
  0xf4   :  { %v584_v11 = vpop.f32.mrf.mxu0  ;;  %v608_v12 = vpop.f32.mrf.mxu1 }
  0xf5   :  { %v346_v13 = vmax.f32 %v292_v7, 0.0  ;;  %v354_v14 = vmax.f32 %v324_v8, 0.0  ;;  %v585_v15 = vadd.f32 %v584_v11, %v583_v5  ;;  %v609_v16 = vadd.f32 %v608_v12, %v607_v6 }
  0xf6   :  { %v586_v17 = vpop.f32.mrf.mxu0  ;;  %v610_v18 = vpop.f32.mrf.mxu1 }
  0xf7   :  { %v516_v19 = vpack.c.bf16 %v346_v13, %v345_v9  ;;  %v536_v20 = vpack.c.bf16 %v354_v14, %v353_v10  ;;  %v297_v21 = vadd.f32 %v585_v15, %v794_v36  ;;  %v329_v22 = vadd.f32 %v609_v16, %v794_v36 }
  0xf8   :  { %v587_v23 = vpop.f32.mrf.mxu0  ;;  %v611_v24 = vpop.f32.mrf.mxu1 }
  0xf9   :  { %548 = vst [vmem:[%s839_s3 + $0x8] sm:$0xff] %v516_v19   ;;  %552 = vst [vmem:[%s839_s3 + $0x28] sm:$0xff] %v536_v20   ;;  %v588_v25 = vadd.f32 %v587_v23, %v586_v17  ;;  %v612_v26 = vadd.f32 %v611_v24, %v610_v18  ;;  %v347_v31 = vmax.f32 %v297_v21, 0.0  ;;  %v355_v32 = vmax.f32 %v329_v22, 0.0 }
  0xfa   :  { %v589_v27 = vpop.f32.mrf.mxu0  ;;  %v613_v28 = vpop.f32.mrf.mxu1 }
  0xfb   :  { %v300_v29 = vadd.f32 %v588_v25, %v794_v36  ;;  %v332_v30 = vadd.f32 %v612_v26, %v794_v36 }
  0xfc   :  { %v590_v33 = vpop.f32.mrf.mxu0  ;;  %v614_v34 = vpop.f32.mrf.mxu1 }
  0xfd   :  { %v348_v35 = vmax.f32 %v300_v29, 0.0  ;;  %v356_v37 = vmax.f32 %v332_v30, 0.0  ;;  %v591_v38 = vadd.f32 %v590_v33, %v589_v27  ;;  %v615_v39 = vadd.f32 %v614_v34, %v613_v28 }
  0xfe   :  { %v592_v40 = vpop.f32.mrf.mxu0  ;;  %v616_v41 = vpop.f32.mrf.mxu1 }
  0xff   :  { %v521_v42 = vpack.c.bf16 %v348_v35, %v347_v31  ;;  %v541_v43 = vpack.c.bf16 %v356_v37, %v355_v32  ;;  %v305_v46 = vadd.f32 %v591_v38, %v794_v36  ;;  %v337_v47 = vadd.f32 %v615_v39, %v794_v36 }
 0x100   :  { %v593_v44 = vpop.f32.mrf.mxu0  ;;  %v617_v45 = vpop.f32.mrf.mxu1 }
 0x101   :  { %549 = vst [vmem:[%s839_s3 + $0x10] sm:$0xff] %v521_v42   ;;  %553 = vst [vmem:[%s839_s3 + $0x30] sm:$0xff] %v541_v43   ;;  %v594_v48 = vadd.f32 %v593_v44, %v592_v40  ;;  %v618_v49 = vadd.f32 %v617_v45, %v616_v41  ;;  %v349_v52 = vmax.f32 %v305_v46, 0.0  ;;  %v357_v53 = vmax.f32 %v337_v47, 0.0 }
 0x103   :  { %v308_v50 = vadd.f32 %v594_v48, %v794_v36  ;;  %v340_v51 = vadd.f32 %v618_v49, %v794_v36 }
 0x105   :  { %v350_v54 = vmax.f32 %v308_v50, 0.0  ;;  %v358_v55 = vmax.f32 %v340_v51, 0.0 }
 0x107   :  { %v526_v56 = vpack.c.bf16 %v350_v54, %v349_v52  ;;  %v546_v57 = vpack.c.bf16 %v358_v55, %v357_v53 }
 0x109   :  { %550 = vst [vmem:[%s839_s3 + $0x18] sm:$0xff] %v526_v56   ;;  %554 = vst [vmem:[%s839_s3 + $0x38] sm:$0xff] %v546_v57  }

// kernel: rainbow_forward.6
= control target key start
LH: loop header
LB: loop body
LE: loop exit
PB: predicated region body
PF: predicated region fallthrough
CT: control target
= control target key end

     0   :  { %v1148_v21 = vmov 1966171168   ;;  %v174_v23 = vlaneseq  ;;  %vm1150_vm0 = vmmov 0   ;;  %s1413_s1 = inlined_call_operand.vmem [shape: bf16[1152,128], index: 1, kind: input, shape index: {}]   ;;  %s1414_s0 = inlined_call_operand.vmem [shape: bf16[2,1152], index: 0, kind: input, shape index: {}]   ;;  %s1415_s2 = inlined_call_operand.vmem [shape: f32[1,128], index: 2, kind: input, shape index: {}]   ;;  %s1416_s3 = inlined_call_operand.vmem [shape: bf16[2,128], index: 3, kind: output, shape index: {}]  }
   0x1   :  { %v1075_v0 = vld [vmem:[%s1413_s1 + $0x78] sm:$0xff]   ;;  %v1079_v4 = vld [vmem:[%s1413_s1 + $0x70] sm:$0xff]   ;;  %v1083_v8 = vld [vmem:[%s1413_s1 + $0x68] sm:$0xff]   ;;  %v172_v22 = vunpack.c.l.s4 %v1148_v21 }
   0x2   :  { %v1076_v1 = vld [vmem:[%s1413_s1 + $0x38] sm:$0xff]   ;;  %955 = vmatprep.subr.bf16.mxu0 %v1075_v0  ;;  %v1080_v5 = vld [vmem:[%s1413_s1 + $0x30] sm:$0xff]   ;;  %v1084_v9 = vld [vmem:[%s1413_s1 + $0x28] sm:$0xff]   ;;  %v175_v29 = vshrl.u32 %v174_v23, 7 }
   0x3   :  { %v1077_v2 = vld [vmem:[%s1413_s1 + $0xf8] sm:$0xff]   ;;  %956 = vmatpush3.bf16.msra.mxu0 %v1076_v1  ;;  %v1081_v6 = vld [vmem:[%s1413_s1 + $0xf0] sm:$0xff]   ;;  %v1085_v10 = vld [vmem:[%s1413_s1 + $0xe8] sm:$0xff]   ;;  %v173_v28 = vunpack.c.0.s8 %v172_v22 }
   0x4   :  { %v1078_v3 = vld [vmem:[%s1413_s1 + $0xb8] sm:$0xff]   ;;  %977 = vmatprep.subr.bf16.mxu1 %v1077_v2  ;;  %957 = vmatprep.subr.bf16.mxu0 %v1079_v4  ;;  %v1082_v7 = vld [vmem:[%s1413_s1 + $0xb0] sm:$0xff]   ;;  %v1086_v11 = vld [vmem:[%s1413_s1 + $0xa8] sm:$0xff]  }
   0x5   :  { %978 = vmatpush3.bf16.msra.mxu1 %v1078_v3  ;;  %v1087_v12 = vld [vmem:[%s1413_s1 + $0x60] sm:$0xff]   ;;  %v1091_v16 = vld [vmem:[%s1413_s1 + $0x58] sm:$0xff]   ;;  %v1095_v20 = vld [vmem:[%s1413_s1 + $0x50] sm:$0xff]   ;;  %v1258_v34 = vsub.s32 %v173_v28, %v175_v29 }
   0x6   :  { %979 = vmatprep.subr.bf16.mxu1 %v1081_v6  ;;  %v1088_v13 = vld [vmem:[%s1413_s1 + $0x20] sm:$0xff]   ;;  %v1092_v17 = vld [vmem:[%s1413_s1 + $0x18] sm:$0xff]   ;;  %v1096_v24 = vld [vmem:[%s1413_s1 + $0x10] sm:$0xff]  }
   0x7   :  { %958 = vmatpush3.bf16.msra.mxu0 %v1080_v5  ;;  %v1089_v14 = vld [vmem:[%s1413_s1 + $0xe0] sm:$0xff]   ;;  %v1093_v18 = vld [vmem:[%s1413_s1 + $0xd8] sm:$0xff]   ;;  %v1097_v25 = vld [vmem:[%s1413_s1 + $0xd0] sm:$0xff]  }
   0x8   :  { %959 = vmatprep.subr.bf16.mxu0 %v1083_v8  ;;  %v1090_v15 = vld [vmem:[%s1413_s1 + $0xa0] sm:$0xff]   ;;  %v1094_v19 = vld [vmem:[%s1413_s1 + $0x98] sm:$0xff]   ;;  %v1098_v26 = vld [vmem:[%s1413_s1 + $0x90] sm:$0xff]  }
   0x9   :  { %980 = vmatpush3.bf16.msra.mxu1 %v1082_v7  ;;  %v1099_v27 = vld [vmem:[%s1413_s1 + $0x48] sm:$0xff]   ;;  %v1103_v33 = vld [vmem:[%s1413_s1 + $0x40] sm:$0xff]   ;;  %v1108_v41 = vld [vmem:[%s1413_s1 + $0x178] sm:$0xff]  }
   0xa   :  { %981 = vmatprep.subr.bf16.mxu1 %v1085_v10  ;;  %v1100_v30 = vld [vmem:[%s1413_s1 + $0x8] sm:$0xff]   ;;  %v1104_v35 = vld [vmem:[%s1413_s1] sm:$0xff]   ;;  %v1110_v45 = vld [vmem:[%s1413_s1 + $0x1f8] sm:$0xff]  }
   0xb   :  { %960 = vmatpush3.bf16.msra.mxu0 %v1084_v9  ;;  %v1101_v31 = vld [vmem:[%s1413_s1 + $0xc8] sm:$0xff]   ;;  %v1105_v36 = vld [vmem:[%s1413_s1 + $0xc0] sm:$0xff]   ;;  %v1109_v47 = vld [vmem:[%s1413_s1 + $0x138] sm:$0xff]  }
   0xc   :  { %961 = vmatprep.subr.bf16.mxu0 %v1087_v12  ;;  %v1102_v32 = vld [vmem:[%s1413_s1 + $0x88] sm:$0xff]   ;;  %v15_v37 = vld [vmem:[%s1414_s0] sm:$0xff]  ;;  %v1112_v50 = vld [vmem:[%s1413_s1 + $0x170] sm:$0xff]  }
   0xd   :  { %982 = vmatpush3.bf16.msra.mxu1 %v1086_v11  ;;  %v170_v38 = vcombine.high %v15_v37, %v15_v37  ;;  %v177_v39 = vrot.slane %v15_v37, %v1258_v34  ;;  %v1107_v40 = vld [vmem:[%s1413_s1 + $0x80] sm:$0xff]   ;;  %v1111_v52 = vld [vmem:[%s1413_s1 + $0x1b8] sm:$0xff]   ;;  %v1114_v54 = vld [vmem:[%s1413_s1 + $0x1f0] sm:$0xff]  }
   0xe   :  { %983 = vmatprep.subr.bf16.mxu1 %v1089_v14  ;;  %v1113_v55 = vld [vmem:[%s1413_s1 + $0x130] sm:$0xff]   ;;  %v1116_v57 = vld [vmem:[%s1413_s1 + $0x168] sm:$0xff]   ;;  %v1120_v61 = vld [vmem:[%s1413_s1 + $0x160] sm:$0xff]  }
   0xf   :  { %962 = vmatpush3.bf16.msra.mxu0 %v1088_v13  ;;  %v185_v42 = vcombine.high %v177_v39, %v177_v39  ;;  %v193_v43 = vrot.slane %v177_v39, %v1258_v34  ;;  %v1278_v44 = vrot.slane %v170_v38, %v1258_v34  ;;  %v1115_v58 = vld [vmem:[%s1413_s1 + $0x1b0] sm:$0xff]   ;;  %v1118_v59 = vld [vmem:[%s1413_s1 + $0x1e8] sm:$0xff]   ;;  %v1122_v63 = vld [vmem:[%s1413_s1 + $0x1e0] sm:$0xff]  }
  0x10   :  { %963 = vmatprep.subr.bf16.mxu0 %v1091_v16  ;;  %v1117_v60 = vld [vmem:[%s1413_s1 + $0x128] sm:$0xff]   ;;  %v1121_v0 = vld [vmem:[%s1413_s1 + $0x120] sm:$0xff]   ;;  %v1124_v1 = vld [vmem:[%s1413_s1 + $0x158] sm:$0xff]  }
  0x11   :  { %984 = vmatpush3.bf16.msra.mxu1 %v1090_v15  ;;  %v207_v46 = vrot.slane %v185_v42, %v1258_v34  ;;  %v186_v48 = vcombine.high %v1278_v44, %v1278_v44  ;;  %v215_v49 = vcombine.high %v193_v43, %v193_v43  ;;  %v1119_v62 = vld [vmem:[%s1413_s1 + $0x1a8] sm:$0xff]   ;;  %v1123_v2 = vld [vmem:[%s1413_s1 + $0x1a0] sm:$0xff]   ;;  %v1126_v3 = vld [vmem:[%s1413_s1 + $0x1d8] sm:$0xff]  }
  0x12   :  { %985 = vmatprep.subr.bf16.mxu1 %v1093_v18  ;;  %v1125_v4 = vld [vmem:[%s1413_s1 + $0x118] sm:$0xff]   ;;  %v1128_v5 = vld [vmem:[%s1413_s1 + $0x150] sm:$0xff]   ;;  %v1132_v9 = vld [vmem:[%s1413_s1 + $0x148] sm:$0xff]  }
  0x13   :  { %964 = vmatpush3.bf16.msra.mxu0 %v1092_v17  ;;  %706 = vmatprep.mubr.bf16.mxu0 %v207_v46  ;;  %v217_v51 = vcombine.high %v207_v46, %v207_v46  ;;  %v214_v53 = vrot.slane %v186_v48, %v1258_v34  ;;  %v1127_v6 = vld [vmem:[%s1413_s1 + $0x198] sm:$0xff]   ;;  %v1130_v7 = vld [vmem:[%s1413_s1 + $0x1d0] sm:$0xff]   ;;  %v1134_v11 = vld [vmem:[%s1413_s1 + $0x1c8] sm:$0xff]   ;;  %v200_v17 = vrot.slane %v1278_v44, %v1258_v34 }
  0x14   :  { %965 = vmatprep.subr.bf16.mxu0 %v1095_v20  ;;  %v1129_v8 = vld [vmem:[%s1413_s1 + $0x110] sm:$0xff]   ;;  %v1133_v12 = vld [vmem:[%s1413_s1 + $0x108] sm:$0xff]   ;;  %v1136_v13 = vld [vmem:[%s1413_s1 + $0x140] sm:$0xff]   ;;  %v1149_v20 = vmov 0.0  }
  0x15   :  { %986 = vmatpush3.bf16.msra.mxu1 %v1094_v19  ;;  %746 = vmatprep.mubr.bf16.mxu1 %v217_v51  ;;  %v218_v56 = vcombine.high %v214_v53, %v214_v53  ;;  %v1131_v10 = vld [vmem:[%s1413_s1 + $0x190] sm:$0xff]   ;;  %v1135_v14 = vld [vmem:[%s1413_s1 + $0x188] sm:$0xff]   ;;  %v1138_v15 = vld [vmem:[%s1413_s1 + $0x1c0] sm:$0xff]   ;;  %v216_v21 = vcombine.high %v200_v17, %v200_v17 }
  0x16   :  { %987 = vmatprep.subr.bf16.mxu1 %v1097_v25  ;;  %v1137_v16 = vld [vmem:[%s1413_s1 + $0x100] sm:$0xff]   ;;  %v1140_v19 = vld [vmem:[%s1413_s1 + $0x238] sm:$0xff]   ;;  %v1141_v22 = vld [vmem:[%s1413_s1 + $0x230] sm:$0xff]  }
  0x17   :  { %966 = vmatpush3.bf16.msra.mxu0 %v1096_v24  ;;  %v1139_v18 = vld [vmem:[%s1413_s1 + $0x180] sm:$0xff]   ;;  %v882_v23 = vld.sshfl [vmem:[%s1414_s0 + $0x8] sm:$0x1 pattern:$0x75316420]  ;;  %v1145_v28 = vld [vmem:[%s1413_s1 + $0x210] sm:$0xff]  }
  0x18   :  { %967 = vmatprep.subr.bf16.mxu0 %v1099_v27  ;;  %v232_v24 = vrot.slane %v882_v23, %v1258_v34  ;;  %v1142_v25 = vld [vmem:[%s1413_s1 + $0x228] sm:$0xff]   ;;  %v1144_v27 = vld [vmem:[%s1413_s1 + $0x218] sm:$0xff]   ;;  %v881_v48 = vld [vmem:[%s1415_s2] ss:$0 sm:$0xff] }
  0x19   :  { %988 = vmatpush3.bf16.msra.mxu1 %v1098_v26  ;;  %v1143_v26 = vld [vmem:[%s1413_s1 + $0x220] sm:$0xff]   ;;  %v1146_v29 = vld [vmem:[%s1413_s1 + $0x208] sm:$0xff]  }
  0x1a   :  { %989 = vmatprep.subr.bf16.mxu1 %v1101_v31 }
  0x1b   :  { %968 = vmatpush3.bf16.msra.mxu0 %v1100_v30  ;;  %v1147_v30 = vld [vmem:[%s1413_s1 + $0x200] sm:$0xff]  }
  0x1c   :  { %969 = vmatprep.subr.bf16.mxu0 %v1103_v33 }
  0x1d   :  { %990 = vmatpush3.bf16.msra.mxu1 %v1102_v32 }
  0x1e   :  { %991 = vmatprep.subr.bf16.mxu1 %v1105_v36 }
  0x1f   :  { %970 = vmatpush3.bf16.msra.mxu0 %v1104_v35 }
  0x20   :  { %999 = vmatprep.subr.bf16.mxu0 %v1108_v41 }
  0x21   :  { %992 = vmatpush3.bf16.msra.mxu1 %v1107_v40 }
  0x22   :  { %1021 = vmatprep.subr.bf16.mxu1 %v1110_v45  ;;  %707 = vmatmul.mubr.bf16.vlgmr.msra.gmra.mxu0 %v193_v43 }
  0x23   :  { %1000 = vmatpush3.bf16.msra.mxu0 %v1109_v47  ;;  %786 = vmatprep.mubr.bf16.mxu0 %v214_v53 }
  0x24   :  { %747 = vmatmul.mubr.bf16.vlgmr.msra.gmra.mxu1 %v215_v49  ;;  %1001 = vmatprep.subr.bf16.mxu0 %v1112_v50 }
  0x25   :  { %1022 = vmatpush3.bf16.msra.mxu1 %v1111_v52  ;;  %826 = vmatprep.mubr.bf16.mxu1 %v218_v56 }
  0x26   :  { %1023 = vmatprep.subr.bf16.mxu1 %v1114_v54 }
  0x27   :  { %1002 = vmatpush3.bf16.msra.mxu0 %v1113_v55 }
  0x28   :  { %1003 = vmatprep.subr.bf16.mxu0 %v1116_v57 }
  0x29   :  { %1024 = vmatpush3.bf16.msra.mxu1 %v1115_v58 }
  0x2a   :  { %1025 = vmatprep.subr.bf16.mxu1 %v1118_v59 }
  0x2b   :  { %1004 = vmatpush3.bf16.msra.mxu0 %v1117_v60 }
  0x2c   :  { %1005 = vmatprep.subr.bf16.mxu0 %v1120_v61 }
  0x2d   :  { %1026 = vmatpush3.bf16.msra.mxu1 %v1119_v62 }
  0x2e   :  { %1027 = vmatprep.subr.bf16.mxu1 %v1122_v63 }
  0x2f   :  { %1006 = vmatpush3.bf16.msra.mxu0 %v1121_v0 }
  0x30   :  { %1007 = vmatprep.subr.bf16.mxu0 %v1124_v1 }
  0x31   :  { %1028 = vmatpush3.bf16.msra.mxu1 %v1123_v2 }
  0x32   :  { %1029 = vmatprep.subr.bf16.mxu1 %v1126_v3 }
  0x33   :  { %1008 = vmatpush3.bf16.msra.mxu0 %v1125_v4 }
  0x34   :  { %1009 = vmatprep.subr.bf16.mxu0 %v1128_v5 }
  0x35   :  { %1030 = vmatpush3.bf16.msra.mxu1 %v1127_v6 }
  0x36   :  { %1031 = vmatprep.subr.bf16.mxu1 %v1130_v7 }
  0x37   :  { %1010 = vmatpush3.bf16.msra.mxu0 %v1129_v8 }
  0x38   :  { %1011 = vmatprep.subr.bf16.mxu0 %v1132_v9 }
  0x39   :  { %1032 = vmatpush3.bf16.msra.mxu1 %v1131_v10 }
  0x3a   :  { %1033 = vmatprep.subr.bf16.mxu1 %v1134_v11 }
  0x3b   :  { %1012 = vmatpush3.bf16.msra.mxu0 %v1133_v12 }
  0x3c   :  { %1013 = vmatprep.subr.bf16.mxu0 %v1136_v13 }
  0x3d   :  { %1034 = vmatpush3.bf16.msra.mxu1 %v1135_v14 }
  0x3e   :  { %1035 = vmatprep.subr.bf16.mxu1 %v1138_v15 }
  0x3f   :  { %1014 = vmatpush3.bf16.msra.mxu0 %v1137_v16 }
  0x40   :  { %1052 = vmatprep.subr.bf16.mxu0 %v1149_v20 }
  0x41   :  { %1036 = vmatpush3.bf16.msra.mxu1 %v1139_v18 }
  0x42   :  { %787 = vmatmul.mubr.bf16.vlgmr.msra.gmra.mxu0 %v200_v17 }
  0x43   :  { %1053 = vmatpush3.bf16.msra.mxu0 %v1140_v19  ;;  %1068 = vmatprep.mubr.msk.bf16.mxu0 %vm1150_vm0, %v1149_v20 }
  0x44   :  { %827 = vmatmul.mubr.bf16.vlgmr.msra.gmra.mxu1 %v216_v21  ;;  %1054 = vmatprep.subr.bf16.mxu0 %v1149_v20 }
  0x47   :  { %1055 = vmatpush3.bf16.msra.mxu0 %v1141_v22 }
  0x48   :  { %1056 = vmatprep.subr.bf16.mxu0 %v1149_v20 }
  0x4b   :  { %1057 = vmatpush3.bf16.msra.mxu0 %v1142_v25 }
  0x4c   :  { %1058 = vmatprep.subr.bf16.mxu0 %v1149_v20 }
  0x4f   :  { %1059 = vmatpush3.bf16.msra.mxu0 %v1143_v26 }
  0x50   :  { %1060 = vmatprep.subr.bf16.mxu0 %v1149_v20 }
  0x53   :  { %1061 = vmatpush3.bf16.msra.mxu0 %v1144_v27 }
  0x54   :  { %1062 = vmatprep.subr.bf16.mxu0 %v1149_v20 }
  0x57   :  { %1063 = vmatpush3.bf16.msra.mxu0 %v1145_v28 }
  0x58   :  { %1064 = vmatprep.subr.bf16.mxu0 %v1149_v20 }
  0x5b   :  { %1065 = vmatpush3.bf16.msra.mxu0 %v1146_v29 }
  0x5c   :  { %1066 = vmatprep.subr.bf16.mxu0 %v1149_v20 }
  0x5f   :  { %1067 = vmatpush3.bf16.msra.mxu0 %v1147_v30 }
  0x62   :  { %1069 = vmatmul.mubr.bf16.vlgmr.msra.gmra.mxu0 %v232_v24 }
  0xe2   :  { %v971_v31 = vpop.f32.mrf.mxu0 }
  0xe4   :  { %v972_v32 = vpop.f32.mrf.mxu0  ;;  %v993_v33 = vpop.f32.mrf.mxu1 }
  0xe5   :  { %v973_v47 = vadd.f32 %v972_v32, %v971_v31 }
  0xe6   :  { %v974_v34 = vpop.f32.mrf.mxu0  ;;  %v994_v35 = vpop.f32.mrf.mxu1 }
  0xe7   :  { %v709_v49 = vadd.f32 %v973_v47, %v881_v48  ;;  %v995_v50 = vadd.f32 %v994_v35, %v993_v33 }
  0xe8   :  { %v975_v36 = vpop.f32.mrf.mxu0  ;;  %v996_v37 = vpop.f32.mrf.mxu1 }
  0xe9   :  { %v749_v52 = vadd.f32 %v995_v50, %v709_v49 }
  0xea   :  { %v997_v38 = vpop.f32.mrf.mxu1 }
 0x102   :  { %v1015_v39 = vpop.f32.mrf.mxu0 }
 0x104   :  { %v1016_v40 = vpop.f32.mrf.mxu0  ;;  %v1037_v41 = vpop.f32.mrf.mxu1 }
 0x105   :  { %v1017_v51 = vadd.f32 %v1016_v40, %v1015_v39 }
 0x106   :  { %v1018_v42 = vpop.f32.mrf.mxu0  ;;  %v1038_v43 = vpop.f32.mrf.mxu1 }
 0x107   :  { %v789_v53 = vadd.f32 %v1017_v51, %v749_v52  ;;  %v1039_v54 = vadd.f32 %v1038_v43, %v1037_v41 }
 0x108   :  { %v1019_v44 = vpop.f32.mrf.mxu0  ;;  %v1040_v45 = vpop.f32.mrf.mxu1 }
 0x109   :  { %v829_v55 = vadd.f32 %v1039_v54, %v789_v53 }
 0x10a   :  { %v1041_v46 = vpop.f32.mrf.mxu1 }
 0x122   :  { %v868_v56 = vpop.f32.mrf.mxu0 }
 0x123   :  { %v869_v57 = vadd.f32 %v868_v56, %v829_v55 }
 0x124   :  { %v1070_v58 = vpop.f32.mrf.mxu0 }
 0x125   :  { %v874_v59 = vmax.f32 %v869_v57, 0.0 }
 0x126   :  { %v871_v60 = vpop.f32.mrf.mxu0 }
 0x127   :  { %v875_v61 = vpack.c.bf16 %v874_v59, %v874_v59 }
 0x128   :  { %v1071_v62 = vpop.f32.mrf.mxu0 }
 0x129   :  { %876 = vst [vmem:[%s1416_s3] sm:$0x1] %v875_v61 }

// kernel: rainbow_forward.5
= control target key start
LH: loop header
LB: loop body
LE: loop exit
PB: predicated region body
PF: predicated region fallthrough
CT: control target
= control target key end

     0   :  { %s2638_s1 = inlined_call_operand.vmem [shape: bf16[2048,128], index: 1, kind: input, shape index: {}]   ;;  %s2639_s0 = inlined_call_operand.vmem [shape: bf16[18,2048], index: 0, kind: input, shape index: {}]   ;;  %s2640_s2 = inlined_call_operand.vmem [shape: f32[1,128], index: 2, kind: input, shape index: {}]   ;;  %s2641_s3 = inlined_call_operand.vmem [shape: bf16[18,128], index: 3, kind: output, shape index: {}]  }
   0x1   :  { %v2009_v0 = vld [vmem:[%s2638_s1 + $0x78] sm:$0xff]   ;;  %v2013_v4 = vld [vmem:[%s2638_s1 + $0x70] sm:$0xff]   ;;  %v2017_v8 = vld [vmem:[%s2638_s1 + $0x68] sm:$0xff]  }
   0x2   :  { %v2010_v1 = vld [vmem:[%s2638_s1 + $0xf8] sm:$0xff]   ;;  %1785 = vmatprep.subr.bf16.mxu0 %v2009_v0  ;;  %v2014_v5 = vld [vmem:[%s2638_s1 + $0xf0] sm:$0xff]   ;;  %v2018_v9 = vld [vmem:[%s2638_s1 + $0xe8] sm:$0xff]  }
   0x3   :  { %v2011_v2 = vld [vmem:[%s2638_s1 + $0x38] sm:$0xff]   ;;  %1813 = vmatprep.subr.bf16.mxu1 %v2010_v1  ;;  %v2015_v6 = vld [vmem:[%s2638_s1 + $0x30] sm:$0xff]   ;;  %v2019_v10 = vld [vmem:[%s2638_s1 + $0x28] sm:$0xff]  }
   0x4   :  { %v2012_v3 = vld [vmem:[%s2638_s1 + $0xb8] sm:$0xff]   ;;  %1786 = vmatpush3.bf16.msra.mxu0 %v2011_v2  ;;  %v2016_v7 = vld [vmem:[%s2638_s1 + $0xb0] sm:$0xff]   ;;  %v2020_v11 = vld [vmem:[%s2638_s1 + $0xa8] sm:$0xff]  }
   0x5   :  { %1814 = vmatpush3.bf16.msra.mxu1 %v2012_v3  ;;  %1787 = vmatprep.subr.bf16.mxu0 %v2013_v4  ;;  %v2021_v12 = vld [vmem:[%s2638_s1 + $0x60] sm:$0xff]   ;;  %v2025_v16 = vld [vmem:[%s2638_s1 + $0x58] sm:$0xff]   ;;  %v2029_v20 = vld [vmem:[%s2638_s1 + $0x50] sm:$0xff]  }
   0x6   :  { %1815 = vmatprep.subr.bf16.mxu1 %v2014_v5  ;;  %v2022_v13 = vld [vmem:[%s2638_s1 + $0xe0] sm:$0xff]   ;;  %v2026_v17 = vld [vmem:[%s2638_s1 + $0xd8] sm:$0xff]   ;;  %v2030_v21 = vld [vmem:[%s2638_s1 + $0xd0] sm:$0xff]  }
   0x7   :  { %v2023_v14 = vld [vmem:[%s2638_s1 + $0x20] sm:$0xff]   ;;  %v2027_v18 = vld [vmem:[%s2638_s1 + $0x18] sm:$0xff]   ;;  %v2031_v22 = vld [vmem:[%s2638_s1 + $0x10] sm:$0xff]  }
   0x8   :  { %1788 = vmatpush3.bf16.msra.mxu0 %v2015_v6  ;;  %v2024_v15 = vld [vmem:[%s2638_s1 + $0xa0] sm:$0xff]   ;;  %v2028_v19 = vld [vmem:[%s2638_s1 + $0x98] sm:$0xff]   ;;  %v2032_v23 = vld [vmem:[%s2638_s1 + $0x90] sm:$0xff]  }
   0x9   :  { %1816 = vmatpush3.bf16.msra.mxu1 %v2016_v7  ;;  %1789 = vmatprep.subr.bf16.mxu0 %v2017_v8  ;;  %v2033_v24 = vld [vmem:[%s2638_s1 + $0x48] sm:$0xff]   ;;  %v2037_v28 = vld [vmem:[%s2638_s1 + $0x40] sm:$0xff]   ;;  %v2041_v40 = vld [vmem:[%s2638_s1 + $0x178] sm:$0xff]  }
   0xa   :  { %1817 = vmatprep.subr.bf16.mxu1 %v2018_v9  ;;  %v2034_v25 = vld [vmem:[%s2638_s1 + $0xc8] sm:$0xff]   ;;  %v2038_v29 = vld [vmem:[%s2638_s1 + $0xc0] sm:$0xff]   ;;  %v2042_v41 = vld [vmem:[%s2638_s1 + $0x1f8] sm:$0xff]  }
   0xb   :  { %v2035_v26 = vld [vmem:[%s2638_s1 + $0x8] sm:$0xff]   ;;  %v2039_v30 = vld [vmem:[%s2638_s1] sm:$0xff]   ;;  %v2043_v42 = vld [vmem:[%s2638_s1 + $0x138] sm:$0xff]  }
   0xc   :  { %1790 = vmatpush3.bf16.msra.mxu0 %v2019_v10  ;;  %v2036_v27 = vld [vmem:[%s2638_s1 + $0x88] sm:$0xff]   ;;  %v2040_v31 = vld [vmem:[%s2638_s1 + $0x80] sm:$0xff]   ;;  %v2044_v43 = vld [vmem:[%s2638_s1 + $0x1b8] sm:$0xff]  }
   0xd   :  { %1818 = vmatpush3.bf16.msra.mxu1 %v2020_v11  ;;  %1791 = vmatprep.subr.bf16.mxu0 %v2021_v12  ;;  %v15_v32 = vld [vmem:[%s2639_s0] sm:$0xff]  ;;  %v16_v34 = vld [vmem:[%s2639_s0 + $0x8] sm:$0xff]  ;;  %v2045_v44 = vld [vmem:[%s2638_s1 + $0x170] sm:$0xff]  }
   0xe   :  { %1819 = vmatprep.subr.bf16.mxu1 %v2022_v13  ;;  %v23_v33 = vld [vmem:[%s2639_s0 + $0x40] sm:$0xff]  ;;  %v24_v37 = vld [vmem:[%s2639_s0 + $0x48] sm:$0xff]  ;;  %v2046_v45 = vld [vmem:[%s2638_s1 + $0x1f0] sm:$0xff]  }
   0xf   :  { %v1614_v35 = vcombine.low %v15_v32, %v23_v33  ;;  %v1615_v36 = vcombine.high %v15_v32, %v23_v33  ;;  %v1616_v38 = vcombine.low %v16_v34, %v24_v37  ;;  %v1617_v39 = vcombine.high %v16_v34, %v24_v37  ;;  %v2047_v46 = vld [vmem:[%s2638_s1 + $0x130] sm:$0xff]   ;;  %v2049_v48 = vld [vmem:[%s2638_s1 + $0x168] sm:$0xff]   ;;  %v2053_v52 = vld [vmem:[%s2638_s1 + $0x160] sm:$0xff]  }
  0x10   :  { %1792 = vmatpush3.bf16.msra.mxu0 %v2023_v14  ;;  %v2048_v47 = vld [vmem:[%s2638_s1 + $0x1b0] sm:$0xff]   ;;  %v2050_v49 = vld [vmem:[%s2638_s1 + $0x1e8] sm:$0xff]   ;;  %v2054_v53 = vld [vmem:[%s2638_s1 + $0x1e0] sm:$0xff]  }
  0x11   :  { %1820 = vmatpush3.bf16.msra.mxu1 %v2024_v15  ;;  %1793 = vmatprep.subr.bf16.mxu0 %v2025_v16  ;;  %v2051_v50 = vld [vmem:[%s2638_s1 + $0x128] sm:$0xff]   ;;  %v2055_v54 = vld [vmem:[%s2638_s1 + $0x120] sm:$0xff]   ;;  %v2057_v56 = vld [vmem:[%s2638_s1 + $0x158] sm:$0xff]  }
  0x12   :  { %1821 = vmatprep.subr.bf16.mxu1 %v2026_v17  ;;  %1238 = vmatprep.mubr.bf16.mxu0 %v1615_v36  ;;  %v2052_v51 = vld [vmem:[%s2638_s1 + $0x1a8] sm:$0xff]   ;;  %v2056_v55 = vld [vmem:[%s2638_s1 + $0x1a0] sm:$0xff]   ;;  %v2058_v57 = vld [vmem:[%s2638_s1 + $0x1d8] sm:$0xff]  }
  0x13   :  { %1286 = vmatprep.mubr.bf16.mxu1 %v1617_v39  ;;  %v2059_v58 = vld [vmem:[%s2638_s1 + $0x118] sm:$0xff]   ;;  %v31_v60 = vld [vmem:[%s2639_s0 + $0x80] sm:$0x11]  ;;  %v32_v61 = vld [vmem:[%s2639_s0 + $0x88] sm:$0x11] }
  0x14   :  { %1794 = vmatpush3.bf16.msra.mxu0 %v2027_v18  ;;  %v2060_v59 = vld [vmem:[%s2638_s1 + $0x198] sm:$0xff]   ;;  %v1631_v62 = vcombine.high %v31_v60, %v31_v60  ;;  %v1630_v63 = vcombine.low %v31_v60, %v31_v60  ;;  %v1633_v0 = vcombine.high %v32_v61, %v32_v61  ;;  %v2064_v1 = vld [vmem:[%s2638_s1 + $0x150] sm:$0xff]   ;;  %v1632_v2 = vcombine.low %v32_v61, %v32_v61  ;;  %v2069_v6 = vld [vmem:[%s2638_s1 + $0x148] sm:$0xff]  }
  0x15   :  { %1822 = vmatpush3.bf16.msra.mxu1 %v2028_v19  ;;  %1795 = vmatprep.subr.bf16.mxu0 %v2029_v20  ;;  %v2065_v3 = vld [vmem:[%s2638_s1 + $0x1d0] sm:$0xff]   ;;  %v2070_v7 = vld [vmem:[%s2638_s1 + $0x1c8] sm:$0xff]   ;;  %v2073_v10 = vld [vmem:[%s2638_s1 + $0x140] sm:$0xff]  }
  0x16   :  { %1823 = vmatprep.subr.bf16.mxu1 %v2030_v21  ;;  %v2067_v4 = vld [vmem:[%s2638_s1 + $0x110] sm:$0xff]   ;;  %v2071_v8 = vld [vmem:[%s2638_s1 + $0x108] sm:$0xff]   ;;  %v2074_v11 = vld [vmem:[%s2638_s1 + $0x1c0] sm:$0xff]  }
  0x17   :  { %v2068_v5 = vld [vmem:[%s2638_s1 + $0x190] sm:$0xff]   ;;  %v2072_v9 = vld [vmem:[%s2638_s1 + $0x188] sm:$0xff]   ;;  %v2075_v12 = vld [vmem:[%s2638_s1 + $0x100] sm:$0xff]  }
  0x18   :  { %1796 = vmatpush3.bf16.msra.mxu0 %v2031_v22  ;;  %v2076_v13 = vld [vmem:[%s2638_s1 + $0x180] sm:$0xff]   ;;  %v17_v14 = vld [vmem:[%s2639_s0 + $0x10] sm:$0xff]  ;;  %v18_v16 = vld [vmem:[%s2639_s0 + $0x18] sm:$0xff] }
  0x19   :  { %1824 = vmatpush3.bf16.msra.mxu1 %v2032_v23  ;;  %1797 = vmatprep.subr.bf16.mxu0 %v2033_v24  ;;  %v25_v15 = vld [vmem:[%s2639_s0 + $0x50] sm:$0xff]  ;;  %v26_v19 = vld [vmem:[%s2639_s0 + $0x58] sm:$0xff]  ;;  %v2087_v33 = vld [vmem:[%s2638_s1 + $0x268] sm:$0xff]  }
  0x1a   :  { %1825 = vmatprep.subr.bf16.mxu1 %v2034_v25  ;;  %v1618_v17 = vcombine.low %v17_v14, %v25_v15  ;;  %v1619_v18 = vcombine.high %v17_v14, %v25_v15  ;;  %v1620_v20 = vcombine.low %v18_v16, %v26_v19  ;;  %v1621_v21 = vcombine.high %v18_v16, %v26_v19  ;;  %v2077_v22 = vld [vmem:[%s2638_s1 + $0x278] sm:$0xff]   ;;  %v2088_v34 = vld [vmem:[%s2638_s1 + $0x2e8] sm:$0xff]   ;;  %v19_v60 = vld [vmem:[%s2639_s0 + $0x20] sm:$0xff] }
  0x1b   :  { %v2078_v23 = vld [vmem:[%s2638_s1 + $0x2f8] sm:$0xff]   ;;  %v2090_v37 = vld [vmem:[%s2638_s1 + $0x228] sm:$0xff]   ;;  %v27_v61 = vld [vmem:[%s2639_s0 + $0x60] sm:$0xff] }
  0x1c   :  { %1798 = vmatpush3.bf16.msra.mxu0 %v2035_v26  ;;  %v2079_v24 = vld [vmem:[%s2638_s1 + $0x238] sm:$0xff]   ;;  %v2081_v26 = vld [vmem:[%s2638_s1 + $0x270] sm:$0xff]   ;;  %v2091_v39 = vld [vmem:[%s2638_s1 + $0x2a8] sm:$0xff]  }
  0x1d   :  { %1826 = vmatpush3.bf16.msra.mxu1 %v2036_v27  ;;  %1799 = vmatprep.subr.bf16.mxu0 %v2037_v28  ;;  %v2080_v25 = vld [vmem:[%s2638_s1 + $0x2b8] sm:$0xff]   ;;  %v2082_v27 = vld [vmem:[%s2638_s1 + $0x2f0] sm:$0xff]   ;;  %v2123_v15 = vld [vmem:[%s2638_s1 + $0x368] sm:$0xff]  }
  0x1e   :  { %1827 = vmatprep.subr.bf16.mxu1 %v2038_v29  ;;  %v2083_v28 = vld [vmem:[%s2638_s1 + $0x230] sm:$0xff]   ;;  %v2124_v16 = vld [vmem:[%s2638_s1 + $0x3e8] sm:$0xff]  }
  0x1f   :  { %v2084_v29 = vld [vmem:[%s2638_s1 + $0x2b0] sm:$0xff]   ;;  %v2126_v19 = vld [vmem:[%s2638_s1 + $0x328] sm:$0xff]  }
  0x20   :  { %1800 = vmatpush3.bf16.msra.mxu0 %v2039_v30  ;;  %v33_v30 = vld [vmem:[%s2639_s0 + $0x90] sm:$0x11] }
  0x21   :  { %1828 = vmatpush3.bf16.msra.mxu1 %v2040_v31  ;;  %1841 = vmatprep.subr.bf16.mxu0 %v2041_v40  ;;  %v1635_v31 = vcombine.high %v33_v30, %v33_v30  ;;  %v1634_v32 = vcombine.low %v33_v30, %v33_v30  ;;  %v2093_v40 = vld [vmem:[%s2638_s1 + $0x260] sm:$0xff]   ;;  %v2137_v30 = vld [vmem:[%s2638_s1 + $0x350] sm:$0xff]  }
  0x22   :  { %1869 = vmatprep.subr.bf16.mxu1 %v2042_v41  ;;  %v2094_v41 = vld [vmem:[%s2638_s1 + $0x2e0] sm:$0xff]  }
  0x23   :  { %1239 = vmatmul.mubr.bf16.vlgmr.msra.gmra.mxu0 %v1614_v35  ;;  %v34_v35 = vld [vmem:[%s2639_s0 + $0x98] sm:$0x11] }
  0x24   :  { %1287 = vmatmul.mubr.bf16.vlgmr.msra.gmra.mxu1 %v1616_v38  ;;  %1842 = vmatpush3.bf16.msra.mxu0 %v2043_v42  ;;  %v1637_v36 = vcombine.high %v34_v35, %v34_v35  ;;  %v1636_v38 = vcombine.low %v34_v35, %v34_v35  ;;  %v2095_v42 = vld [vmem:[%s2638_s1 + $0x220] sm:$0xff]   ;;  %v2142_v35 = vld [vmem:[%s2638_s1 + $0x3c8] sm:$0xff]  }
  0x25   :  { %1870 = vmatpush3.bf16.msra.mxu1 %v2044_v43  ;;  %1843 = vmatprep.subr.bf16.mxu0 %v2045_v44  ;;  %v2096_v43 = vld [vmem:[%s2638_s1 + $0x2a0] sm:$0xff]   ;;  %v2097_v44 = vld [vmem:[%s2638_s1 + $0x258] sm:$0xff]  }
  0x26   :  { %1871 = vmatprep.subr.bf16.mxu1 %v2046_v45  ;;  %1246 = vmatprep.mubr.bf16.mxu0 %v1631_v62  ;;  %v2098_v45 = vld [vmem:[%s2638_s1 + $0x2d8] sm:$0xff]   ;;  %v20_v62 = vld [vmem:[%s2639_s0 + $0x28] sm:$0xff] }
  0x27   :  { %1294 = vmatprep.mubr.bf16.mxu1 %v1633_v0  ;;  %v1623_v0 = vcombine.high %v19_v60, %v27_v61 }
  0x28   :  { %1844 = vmatpush3.bf16.msra.mxu0 %v2047_v46  ;;  %v2099_v46 = vld [vmem:[%s2638_s1 + $0x218] sm:$0xff]  }
  0x29   :  { %1872 = vmatpush3.bf16.msra.mxu1 %v2048_v47  ;;  %1845 = vmatprep.subr.bf16.mxu0 %v2049_v48  ;;  %v2100_v47 = vld [vmem:[%s2638_s1 + $0x298] sm:$0xff]   ;;  %v2101_v48 = vld [vmem:[%s2638_s1 + $0x250] sm:$0xff]  }
  0x2a   :  { %1873 = vmatprep.subr.bf16.mxu1 %v2050_v49  ;;  %v2102_v49 = vld [vmem:[%s2638_s1 + $0x2d0] sm:$0xff]  }
  0x2b   :  { %1247 = vmatmul.mubr.bf16.gmra.mxu0 %v1630_v63  ;;  %v1622_v63 = vcombine.low %v19_v60, %v27_v61 }
  0x2c   :  { %1846 = vmatpush3.bf16.msra.mxu0 %v2051_v50  ;;  %1295 = vmatmul.mubr.bf16.gmra.mxu1 %v1632_v2  ;;  %v2103_v50 = vld [vmem:[%s2638_s1 + $0x210] sm:$0xff]  }
  0x2d   :  { %1874 = vmatpush3.bf16.msra.mxu1 %v2052_v51  ;;  %1847 = vmatprep.subr.bf16.mxu0 %v2053_v52  ;;  %v2104_v51 = vld [vmem:[%s2638_s1 + $0x290] sm:$0xff]   ;;  %v2105_v52 = vld [vmem:[%s2638_s1 + $0x248] sm:$0xff]  }
  0x2e   :  { %1875 = vmatprep.subr.bf16.mxu1 %v2054_v53  ;;  %1334 = vmatprep.mubr.bf16.mxu0 %v1619_v18  ;;  %v2106_v53 = vld [vmem:[%s2638_s1 + $0x2c8] sm:$0xff]  }
  0x2f   :  { %1382 = vmatprep.mubr.bf16.mxu1 %v1621_v21  ;;  %v2127_v21 = vld [vmem:[%s2638_s1 + $0x3a8] sm:$0xff]  }
  0x30   :  { %1848 = vmatpush3.bf16.msra.mxu0 %v2055_v54  ;;  %v2107_v54 = vld [vmem:[%s2638_s1 + $0x208] sm:$0xff]  }
  0x31   :  { %1876 = vmatpush3.bf16.msra.mxu1 %v2056_v55  ;;  %1849 = vmatprep.subr.bf16.mxu0 %v2057_v56  ;;  %v2108_v55 = vld [vmem:[%s2638_s1 + $0x288] sm:$0xff]   ;;  %v2109_v56 = vld [vmem:[%s2638_s1 + $0x240] sm:$0xff]  }
  0x32   :  { %1877 = vmatprep.subr.bf16.mxu1 %v2058_v57  ;;  %v2110_v57 = vld [vmem:[%s2638_s1 + $0x2c0] sm:$0xff]  }
  0x34   :  { %1850 = vmatpush3.bf16.msra.mxu0 %v2059_v58  ;;  %v2111_v58 = vld [vmem:[%s2638_s1 + $0x200] sm:$0xff]  }
  0x35   :  { %1878 = vmatpush3.bf16.msra.mxu1 %v2060_v59  ;;  %1851 = vmatprep.subr.bf16.mxu0 %v2064_v1  ;;  %v2112_v59 = vld [vmem:[%s2638_s1 + $0x280] sm:$0xff]   ;;  %v28_v1 = vld [vmem:[%s2639_s0 + $0x68] sm:$0xff] }
  0x36   :  { %1879 = vmatprep.subr.bf16.mxu1 %v2065_v3  ;;  %v1624_v2 = vcombine.low %v20_v62, %v28_v1  ;;  %v1625_v3 = vcombine.high %v20_v62, %v28_v1 }
  0x38   :  { %1852 = vmatpush3.bf16.msra.mxu0 %v2067_v4  ;;  %v2113_v4 = vld [vmem:[%s2638_s1 + $0x378] sm:$0xff]  }
  0x39   :  { %1880 = vmatpush3.bf16.msra.mxu1 %v2068_v5  ;;  %1853 = vmatprep.subr.bf16.mxu0 %v2069_v6  ;;  %v2114_v5 = vld [vmem:[%s2638_s1 + $0x3f8] sm:$0xff]  }
  0x3a   :  { %1881 = vmatprep.subr.bf16.mxu1 %v2070_v7  ;;  %v2115_v6 = vld [vmem:[%s2638_s1 + $0x338] sm:$0xff]  }
  0x3b   :  { %v2116_v7 = vld [vmem:[%s2638_s1 + $0x3b8] sm:$0xff]  }
  0x3c   :  { %1854 = vmatpush3.bf16.msra.mxu0 %v2071_v8  ;;  %v2117_v8 = vld [vmem:[%s2638_s1 + $0x370] sm:$0xff]  }
  0x3d   :  { %1882 = vmatpush3.bf16.msra.mxu1 %v2072_v9  ;;  %1855 = vmatprep.subr.bf16.mxu0 %v2073_v10  ;;  %v2118_v9 = vld [vmem:[%s2638_s1 + $0x3f0] sm:$0xff]  }
  0x3e   :  { %1883 = vmatprep.subr.bf16.mxu1 %v2074_v11  ;;  %v2119_v10 = vld [vmem:[%s2638_s1 + $0x330] sm:$0xff]  }
  0x3f   :  { %v2120_v11 = vld [vmem:[%s2638_s1 + $0x3b0] sm:$0xff]  }
  0x40   :  { %1856 = vmatpush3.bf16.msra.mxu0 %v2075_v12  ;;  %v35_v12 = vld [vmem:[%s2639_s0 + $0xa0] sm:$0x11] }
  0x41   :  { %1884 = vmatpush3.bf16.msra.mxu1 %v2076_v13  ;;  %1897 = vmatprep.subr.bf16.mxu0 %v2077_v22  ;;  %v1639_v13 = vcombine.high %v35_v12, %v35_v12  ;;  %v1638_v14 = vcombine.low %v35_v12, %v35_v12  ;;  %v2129_v22 = vld [vmem:[%s2638_s1 + $0x360] sm:$0xff]  }
  0x42   :  { %1925 = vmatprep.subr.bf16.mxu1 %v2078_v23  ;;  %v2130_v23 = vld [vmem:[%s2638_s1 + $0x3e0] sm:$0xff]  }
  0x43   :  { %1335 = vmatmul.mubr.bf16.vlgmr.msra.gmra.mxu0 %v1618_v17  ;;  %v36_v17 = vld [vmem:[%s2639_s0 + $0xa8] sm:$0x11] }
  0x44   :  { %1383 = vmatmul.mubr.bf16.vlgmr.msra.gmra.mxu1 %v1620_v20  ;;  %1898 = vmatpush3.bf16.msra.mxu0 %v2079_v24  ;;  %v1641_v18 = vcombine.high %v36_v17, %v36_v17  ;;  %v1640_v20 = vcombine.low %v36_v17, %v36_v17  ;;  %v2131_v24 = vld [vmem:[%s2638_s1 + $0x320] sm:$0xff]  }
  0x45   :  { %1926 = vmatpush3.bf16.msra.mxu1 %v2080_v25  ;;  %1899 = vmatprep.subr.bf16.mxu0 %v2081_v26  ;;  %v2132_v25 = vld [vmem:[%s2638_s1 + $0x3a0] sm:$0xff]   ;;  %v2133_v26 = vld [vmem:[%s2638_s1 + $0x358] sm:$0xff]  }
  0x46   :  { %1927 = vmatprep.subr.bf16.mxu1 %v2082_v27  ;;  %1342 = vmatprep.mubr.bf16.mxu0 %v1635_v31  ;;  %v2134_v27 = vld [vmem:[%s2638_s1 + $0x3d8] sm:$0xff]   ;;  %v2138_v31 = vld [vmem:[%s2638_s1 + $0x3d0] sm:$0xff]  }
  0x47   :  { %1390 = vmatprep.mubr.bf16.mxu1 %v1637_v36  ;;  %v2143_v36 = vld [vmem:[%s2638_s1 + $0x308] sm:$0xff]  }
  0x48   :  { %1900 = vmatpush3.bf16.msra.mxu0 %v2083_v28  ;;  %v2135_v28 = vld [vmem:[%s2638_s1 + $0x318] sm:$0xff]  }
  0x49   :  { %1928 = vmatpush3.bf16.msra.mxu1 %v2084_v29  ;;  %1901 = vmatprep.subr.bf16.mxu0 %v2087_v33  ;;  %v2136_v29 = vld [vmem:[%s2638_s1 + $0x398] sm:$0xff]   ;;  %v2140_v33 = vld [vmem:[%s2638_s1 + $0x390] sm:$0xff]  }
  0x4a   :  { %1929 = vmatprep.subr.bf16.mxu1 %v2088_v34  ;;  %v2141_v34 = vld [vmem:[%s2638_s1 + $0x348] sm:$0xff]  }
  0x4b   :  { %1343 = vmatmul.mubr.bf16.gmra.mxu0 %v1634_v32  ;;  %v2139_v32 = vld [vmem:[%s2638_s1 + $0x310] sm:$0xff]  }
  0x4c   :  { %1902 = vmatpush3.bf16.msra.mxu0 %v2090_v37  ;;  %1391 = vmatmul.mubr.bf16.gmra.mxu1 %v1636_v38  ;;  %v2144_v37 = vld [vmem:[%s2638_s1 + $0x388] sm:$0xff]   ;;  %v2145_v38 = vld [vmem:[%s2638_s1 + $0x340] sm:$0xff]  }
  0x4d   :  { %1930 = vmatpush3.bf16.msra.mxu1 %v2091_v39  ;;  %1903 = vmatprep.subr.bf16.mxu0 %v2093_v40  ;;  %v2146_v39 = vld [vmem:[%s2638_s1 + $0x3c0] sm:$0xff]  }
  0x4e   :  { %1931 = vmatprep.subr.bf16.mxu1 %v2094_v41  ;;  %1430 = vmatprep.mubr.bf16.mxu0 %v1623_v0  ;;  %v2147_v40 = vld [vmem:[%s2638_s1 + $0x300] sm:$0xff]  }
  0x4f   :  { %1478 = vmatprep.mubr.bf16.mxu1 %v1625_v3  ;;  %v2148_v41 = vld [vmem:[%s2638_s1 + $0x380] sm:$0xff]  }
  0x50   :  { %1904 = vmatpush3.bf16.msra.mxu0 %v2095_v42  ;;  %v21_v42 = vld [vmem:[%s2639_s0 + $0x30] sm:$0xff] }
  0x51   :  { %1932 = vmatpush3.bf16.msra.mxu1 %v2096_v43  ;;  %1905 = vmatprep.subr.bf16.mxu0 %v2097_v44  ;;  %v29_v43 = vld [vmem:[%s2639_s0 + $0x70] sm:$0xff]  ;;  %v22_v44 = vld [vmem:[%s2639_s0 + $0x38] sm:$0xff] }
  0x52   :  { %1933 = vmatprep.subr.bf16.mxu1 %v2098_v45  ;;  %v1626_v45 = vcombine.low %v21_v42, %v29_v43 }
  0x54   :  { %1906 = vmatpush3.bf16.msra.mxu0 %v2099_v46  ;;  %v1627_v46 = vcombine.high %v21_v42, %v29_v43 }
  0x55   :  { %1934 = vmatpush3.bf16.msra.mxu1 %v2100_v47  ;;  %1907 = vmatprep.subr.bf16.mxu0 %v2101_v48  ;;  %v30_v47 = vld [vmem:[%s2639_s0 + $0x78] sm:$0xff]  ;;  %v37_v48 = vld [vmem:[%s2639_s0 + $0xb0] sm:$0x11] }
  0x56   :  { %1935 = vmatprep.subr.bf16.mxu1 %v2102_v49  ;;  %v38_v49 = vld [vmem:[%s2639_s0 + $0xb8] sm:$0x11] }
  0x58   :  { %1908 = vmatpush3.bf16.msra.mxu0 %v2103_v50  ;;  %v1628_v50 = vcombine.low %v22_v44, %v30_v47 }
  0x59   :  { %1936 = vmatpush3.bf16.msra.mxu1 %v2104_v51  ;;  %1909 = vmatprep.subr.bf16.mxu0 %v2105_v52  ;;  %v1629_v51 = vcombine.high %v22_v44, %v30_v47  ;;  %v1643_v52 = vcombine.high %v37_v48, %v37_v48 }
  0x5a   :  { %1937 = vmatprep.subr.bf16.mxu1 %v2106_v53  ;;  %v1645_v53 = vcombine.high %v38_v49, %v38_v49 }
  0x5c   :  { %1910 = vmatpush3.bf16.msra.mxu0 %v2107_v54  ;;  %v1642_v54 = vcombine.low %v37_v48, %v37_v48 }
  0x5d   :  { %1938 = vmatpush3.bf16.msra.mxu1 %v2108_v55  ;;  %1911 = vmatprep.subr.bf16.mxu0 %v2109_v56  ;;  %v1644_v55 = vcombine.low %v38_v49, %v38_v49 }
  0x5e   :  { %1939 = vmatprep.subr.bf16.mxu1 %v2110_v57 }
  0x60   :  { %1912 = vmatpush3.bf16.msra.mxu0 %v2111_v58  ;;  %v1613_v58 = vld [vmem:[%s2640_s2] ss:$0 sm:$0xff] }
  0x61   :  { %1940 = vmatpush3.bf16.msra.mxu1 %v2112_v59  ;;  %1953 = vmatprep.subr.bf16.mxu0 %v2113_v4 }
  0x62   :  { %1981 = vmatprep.subr.bf16.mxu1 %v2114_v5 }
  0x63   :  { %1431 = vmatmul.mubr.bf16.vlgmr.msra.gmra.mxu0 %v1622_v63 }
  0x64   :  { %1479 = vmatmul.mubr.bf16.vlgmr.msra.gmra.mxu1 %v1624_v2  ;;  %1954 = vmatpush3.bf16.msra.mxu0 %v2115_v6 }
  0x65   :  { %1982 = vmatpush3.bf16.msra.mxu1 %v2116_v7  ;;  %1955 = vmatprep.subr.bf16.mxu0 %v2117_v8 }
  0x66   :  { %1983 = vmatprep.subr.bf16.mxu1 %v2118_v9  ;;  %1438 = vmatprep.mubr.bf16.mxu0 %v1639_v13 }
  0x67   :  { %1486 = vmatprep.mubr.bf16.mxu1 %v1641_v18 }
  0x68   :  { %1956 = vmatpush3.bf16.msra.mxu0 %v2119_v10 }
  0x69   :  { %1984 = vmatpush3.bf16.msra.mxu1 %v2120_v11  ;;  %1957 = vmatprep.subr.bf16.mxu0 %v2123_v15 }
  0x6a   :  { %1985 = vmatprep.subr.bf16.mxu1 %v2124_v16 }
  0x6b   :  { %1439 = vmatmul.mubr.bf16.gmra.mxu0 %v1638_v14 }
  0x6c   :  { %1958 = vmatpush3.bf16.msra.mxu0 %v2126_v19  ;;  %1487 = vmatmul.mubr.bf16.gmra.mxu1 %v1640_v20 }
  0x6d   :  { %1986 = vmatpush3.bf16.msra.mxu1 %v2127_v21  ;;  %1959 = vmatprep.subr.bf16.mxu0 %v2129_v22 }
  0x6e   :  { %1987 = vmatprep.subr.bf16.mxu1 %v2130_v23  ;;  %1526 = vmatprep.mubr.bf16.mxu0 %v1627_v46 }
  0x6f   :  { %1574 = vmatprep.mubr.bf16.mxu1 %v1629_v51 }
  0x70   :  { %1960 = vmatpush3.bf16.msra.mxu0 %v2131_v24 }
  0x71   :  { %1988 = vmatpush3.bf16.msra.mxu1 %v2132_v25  ;;  %1961 = vmatprep.subr.bf16.mxu0 %v2133_v26 }
  0x72   :  { %1989 = vmatprep.subr.bf16.mxu1 %v2134_v27 }
  0x74   :  { %1962 = vmatpush3.bf16.msra.mxu0 %v2135_v28 }
  0x75   :  { %1990 = vmatpush3.bf16.msra.mxu1 %v2136_v29  ;;  %1963 = vmatprep.subr.bf16.mxu0 %v2137_v30 }
  0x76   :  { %1991 = vmatprep.subr.bf16.mxu1 %v2138_v31 }
  0x78   :  { %1964 = vmatpush3.bf16.msra.mxu0 %v2139_v32 }
  0x79   :  { %1992 = vmatpush3.bf16.msra.mxu1 %v2140_v33  ;;  %1965 = vmatprep.subr.bf16.mxu0 %v2141_v34 }
  0x7a   :  { %1993 = vmatprep.subr.bf16.mxu1 %v2142_v35 }
  0x7c   :  { %1966 = vmatpush3.bf16.msra.mxu0 %v2143_v36 }
  0x7d   :  { %1994 = vmatpush3.bf16.msra.mxu1 %v2144_v37  ;;  %1967 = vmatprep.subr.bf16.mxu0 %v2145_v38 }
  0x7e   :  { %1995 = vmatprep.subr.bf16.mxu1 %v2146_v39 }
  0x80   :  { %1968 = vmatpush3.bf16.msra.mxu0 %v2147_v40 }
  0x81   :  { %1996 = vmatpush3.bf16.msra.mxu1 %v2148_v41 }
  0x83   :  { %1527 = vmatmul.mubr.bf16.vlgmr.msra.gmra.mxu0 %v1626_v45 }
  0x84   :  { %1575 = vmatmul.mubr.bf16.vlgmr.msra.gmra.mxu1 %v1628_v50  ;;  %1534 = vmatprep.mubr.bf16.mxu0 %v1643_v52 }
  0x85   :  { %1582 = vmatprep.mubr.bf16.mxu1 %v1645_v53 }
  0x8b   :  { %1535 = vmatmul.mubr.bf16.gmra.mxu0 %v1642_v54 }
  0x8c   :  { %1583 = vmatmul.mubr.bf16.gmra.mxu1 %v1644_v55 }
  0xe3   :  { %v1801_v56 = vpop.f32.mrf.mxu0 }
  0xe4   :  { %v1829_v57 = vpop.f32.mrf.mxu1 }
  0xe5   :  { %v1802_v59 = vpop.f32.mrf.mxu0 }
  0xe6   :  { %v1803_v60 = vadd.f32 %v1802_v59, %v1801_v56  ;;  %v1830_v61 = vpop.f32.mrf.mxu1 }
  0xe7   :  { %v1831_v62 = vadd.f32 %v1830_v61, %v1829_v57  ;;  %v1804_v63 = vpop.f32.mrf.mxu0 }
  0xe8   :  { %v1241_v0 = vadd.f32 %v1803_v60, %v1613_v58  ;;  %v1832_v1 = vpop.f32.mrf.mxu1 }
  0xe9   :  { %v1805_v2 = vpop.f32.mrf.mxu0 }
  0xea   :  { %v1289_v3 = vadd.f32 %v1831_v62, %v1241_v0  ;;  %v1806_v4 = vadd.f32 %v1805_v2, %v1804_v63  ;;  %v1833_v5 = vpop.f32.mrf.mxu1 }
  0xeb   :  { %v1834_v6 = vadd.f32 %v1833_v5, %v1832_v1  ;;  %v1807_v9 = vpop.f32.mrf.mxu0 }
  0xec   :  { %v1244_v7 = vadd.f32 %v1806_v4, %v1613_v58  ;;  %v1835_v10 = vpop.f32.mrf.mxu1 }
  0xed   :  { %v1808_v11 = vpop.f32.mrf.mxu0 }
  0xee   :  { %v1292_v8 = vadd.f32 %v1834_v6, %v1244_v7  ;;  %v1809_v12 = vadd.f32 %v1808_v11, %v1807_v9  ;;  %v1836_v13 = vpop.f32.mrf.mxu1 }
  0xef   :  { %v1810_v14 = vpop.f32.mrf.mxu0  ;;  %v1837_v15 = vadd.f32 %v1836_v13, %v1835_v10 }
  0xf0   :  { %v1249_v16 = vadd.f32 %v1809_v12, %v1613_v58  ;;  %v1838_v17 = vpop.f32.mrf.mxu1 }
  0xf1   :  { %v1811_v18 = vpop.f32.mrf.mxu0 }
  0xf2   :  { %v1297_v19 = vadd.f32 %v1837_v15, %v1249_v16  ;;  %v1839_v20 = vpop.f32.mrf.mxu1 }
 0x103   :  { %v1857_v21 = vpop.f32.mrf.mxu0 }
 0x104   :  { %v1885_v22 = vpop.f32.mrf.mxu1 }
 0x105   :  { %v1858_v23 = vpop.f32.mrf.mxu0 }
 0x106   :  { %v1859_v24 = vadd.f32 %v1858_v23, %v1857_v21  ;;  %v1886_v25 = vpop.f32.mrf.mxu1 }
 0x107   :  { %v1887_v26 = vadd.f32 %v1886_v25, %v1885_v22  ;;  %v1860_v27 = vpop.f32.mrf.mxu0 }
 0x108   :  { %v1337_v28 = vadd.f32 %v1859_v24, %v1289_v3  ;;  %v1888_v29 = vpop.f32.mrf.mxu1 }
 0x109   :  { %v1861_v30 = vpop.f32.mrf.mxu0 }
 0x10a   :  { %v1385_v31 = vadd.f32 %v1887_v26, %v1337_v28  ;;  %v1889_v33 = vpop.f32.mrf.mxu1  ;;  %v1862_v57 = vadd.f32 %v1861_v30, %v1860_v27 }
 0x10b   :  { %v1863_v32 = vpop.f32.mrf.mxu0  ;;  %v1890_v61 = vadd.f32 %v1889_v33, %v1888_v29 }
 0x10c   :  { %v1891_v35 = vpop.f32.mrf.mxu1  ;;  %v1340_v59 = vadd.f32 %v1862_v57, %v1292_v8 }
 0x10d   :  { %v1864_v34 = vpop.f32.mrf.mxu0 }
 0x10e   :  { %v1892_v37 = vpop.f32.mrf.mxu1  ;;  %v1865_v60 = vadd.f32 %v1864_v34, %v1863_v32  ;;  %v1388_v1 = vadd.f32 %v1890_v61, %v1340_v59 }
 0x10f   :  { %v1866_v36 = vpop.f32.mrf.mxu0  ;;  %v1893_v4 = vadd.f32 %v1892_v37, %v1891_v35 }
 0x110   :  { %v1894_v39 = vpop.f32.mrf.mxu1  ;;  %v1345_v3 = vadd.f32 %v1865_v60, %v1297_v19 }
 0x111   :  { %v1867_v38 = vpop.f32.mrf.mxu0 }
 0x112   :  { %v1895_v40 = vpop.f32.mrf.mxu1  ;;  %v1393_v15 = vadd.f32 %v1893_v4, %v1345_v3 }
 0x123   :  { %v1913_v41 = vpop.f32.mrf.mxu0 }
 0x124   :  { %v1941_v42 = vpop.f32.mrf.mxu1 }
 0x125   :  { %v1914_v43 = vpop.f32.mrf.mxu0 }
 0x126   :  { %v1942_v44 = vpop.f32.mrf.mxu1  ;;  %v1915_v58 = vadd.f32 %v1914_v43, %v1913_v41 }
 0x127   :  { %v1916_v45 = vpop.f32.mrf.mxu0  ;;  %v1943_v0 = vadd.f32 %v1942_v44, %v1941_v42 }
 0x128   :  { %v1944_v46 = vpop.f32.mrf.mxu1  ;;  %v1433_v63 = vadd.f32 %v1915_v58, %v1385_v31 }
 0x129   :  { %v1917_v47 = vpop.f32.mrf.mxu0 }
 0x12a   :  { %v1945_v49 = vpop.f32.mrf.mxu1  ;;  %v1918_v62 = vadd.f32 %v1917_v47, %v1916_v45  ;;  %v1481_v9 = vadd.f32 %v1943_v0, %v1433_v63 }
 0x12b   :  { %v1919_v48 = vpop.f32.mrf.mxu0  ;;  %v1946_v13 = vadd.f32 %v1945_v49, %v1944_v46 }
 0x12c   :  { %v1947_v51 = vpop.f32.mrf.mxu1  ;;  %v1436_v6 = vadd.f32 %v1918_v62, %v1388_v1 }
 0x12d   :  { %v1920_v50 = vpop.f32.mrf.mxu0 }
 0x12e   :  { %v1948_v53 = vpop.f32.mrf.mxu1  ;;  %v1921_v10 = vadd.f32 %v1920_v50, %v1919_v48  ;;  %v1484_v17 = vadd.f32 %v1946_v13, %v1436_v6 }
 0x12f   :  { %v1922_v52 = vpop.f32.mrf.mxu0  ;;  %v1949_v21 = vadd.f32 %v1948_v53, %v1947_v51 }
 0x130   :  { %v1950_v55 = vpop.f32.mrf.mxu1  ;;  %v1441_v20 = vadd.f32 %v1921_v10, %v1393_v15 }
 0x131   :  { %v1923_v54 = vpop.f32.mrf.mxu0 }
 0x132   :  { %v1951_v56 = vpop.f32.mrf.mxu1  ;;  %v1489_v30 = vadd.f32 %v1949_v21, %v1441_v20 }
 0x143   :  { %v1969_v2 = vpop.f32.mrf.mxu0 }
 0x144   :  { %v1997_v5 = vpop.f32.mrf.mxu1 }
 0x145   :  { %v1970_v7 = vpop.f32.mrf.mxu0 }
 0x146   :  { %v1971_v11 = vadd.f32 %v1970_v7, %v1969_v2  ;;  %v1998_v12 = vpop.f32.mrf.mxu1 }
 0x147   :  { %v1972_v14 = vpop.f32.mrf.mxu0  ;;  %v1999_v22 = vadd.f32 %v1998_v12, %v1997_v5 }
 0x148   :  { %v1529_v8 = vadd.f32 %v1971_v11, %v1481_v9  ;;  %v2000_v16 = vpop.f32.mrf.mxu1 }
 0x149   :  { %v1973_v18 = vpop.f32.mrf.mxu0 }
 0x14a   :  { %v1974_v23 = vadd.f32 %v1973_v18, %v1972_v14  ;;  %v2001_v19 = vpop.f32.mrf.mxu1  ;;  %v1577_v25 = vadd.f32 %v1999_v22, %v1529_v8 }
 0x14b   :  { %v1975_v24 = vpop.f32.mrf.mxu0  ;;  %v2002_v27 = vadd.f32 %v2001_v19, %v2000_v16 }
 0x14c   :  { %v1532_v26 = vadd.f32 %v1974_v23, %v1484_v17  ;;  %v2003_v28 = vpop.f32.mrf.mxu1  ;;  %v1590_v35 = vmax.f32 %v1577_v25, 0.0 }
 0x14d   :  { %v1976_v29 = vpop.f32.mrf.mxu0 }
 0x14e   :  { %v1580_v31 = vadd.f32 %v2002_v27, %v1532_v26  ;;  %v1977_v32 = vadd.f32 %v1976_v29, %v1975_v24  ;;  %v2004_v33 = vpop.f32.mrf.mxu1 }
 0x14f   :  { %v1978_v34 = vpop.f32.mrf.mxu0  ;;  %v2005_v38 = vadd.f32 %v2004_v33, %v2003_v28 }
 0x150   :  { %v1591_v36 = vmax.f32 %v1580_v31, 0.0  ;;  %v1537_v37 = vadd.f32 %v1977_v32, %v1489_v30  ;;  %v2006_v39 = vpop.f32.mrf.mxu1 }
 0x151   :  { %v1979_v40 = vpop.f32.mrf.mxu0 }
 0x152   :  { %v1783_v41 = vpack.c.bf16 %v1591_v36, %v1590_v35  ;;  %v1585_v42 = vadd.f32 %v2005_v38, %v1537_v37  ;;  %v2007_v43 = vpop.f32.mrf.mxu1 }
 0x154   :  { %v1592_v44 = vmax.f32 %v1585_v42, 0.0  ;;  %1784 = vst [vmem:[%s2641_s3] sm:$0xff] %v1783_v41  }
 0x156   :  { %v1779_v45 = vpack.c.bf16 %v1592_v44, %v1592_v44 }
 0x158   :  { %1608 = vst [vmem:[%s2641_s3 + $0x8] sm:$0x1] %v1779_v45 }

// kernel: rainbow_forward.7
= control target key start
LH: loop header
LB: loop body
LE: loop exit
PB: predicated region body
PF: predicated region fallthrough
CT: control target
= control target key end

     0   :  { %v3646_v3 = vmov 0   ;;  %vm2758_vm0 = vcmask 1041408   ;;  %s4799_s1 = inlined_call_operand.vmem [shape: bf16[128,1024], index: 1, kind: input, shape index: {}]   ;;  %s4800_s3 = inlined_call_operand.vmem [shape: bf16[512,768], index: 3, kind: input, shape index: {}]   ;;  %s4801_s0 = inlined_call_operand.vmem [shape: bf16[2,128], index: 0, kind: input, shape index: {}]   ;;  %s4802_s2 = inlined_call_operand.vmem [shape: f32[1,1024], index: 2, kind: input, shape index: {}]   ;;  %s4803_s5 = inlined_call_operand.vmem [shape: bf16[512,128], index: 5, kind: input, shape index: {}]   ;;  %s4804_s7 = inlined_call_operand.vmem [shape: bf16[512,128], index: 7, kind: input, shape index: {}]   ;;  %s4805_s4 = inlined_call_operand.vmem [shape: f32[1,768], index: 4, kind: input, shape index: {}]   ;;  %s4806_s6 = inlined_call_operand.vmem [shape: f32[1,128], index: 6, kind: input, shape index: {}]   ;;  %s4807_s8 = inlined_call_operand.vmem [shape: f32[1,128], index: 8, kind: input, shape index: {}]   ;;  %s4808_s9 = inlined_call_operand.vmem [shape: f32[2,768], index: 9, kind: output, shape index: {}]  }
   0x1   :  { %v90_v0 = vld [vmem:[%s4799_s1 + $0x1c0] sm:$0xff]  ;;  %v91_v2 = vld [vmem:[%s4799_s1 + $0x1c8] sm:$0xff]  ;;  %492 = vmatprep.mubr.bf16.mxu0 %v3646_v3  ;;  %533 = vmatprep.mubr.bf16.mxu1 %v3646_v3  ;;  %v92_v62 = vld [vmem:[%s4799_s1 + $0x1d0] sm:$0xff] }
   0x2   :  { %v94_v1 = vld [vmem:[%s4799_s1 + $0x1e0] sm:$0xff]  ;;  %v95_v5 = vld [vmem:[%s4799_s1 + $0x1e8] sm:$0xff] }
   0x3   :  { %v2915_v4 = vcombine.high %v90_v0, %v94_v1  ;;  %v2914_v6 = vcombine.low %v90_v0, %v94_v1  ;;  %v82_v7 = vld [vmem:[%s4799_s1 + $0x180] sm:$0xff]  ;;  %v2917_v9 = vcombine.high %v91_v2, %v95_v5  ;;  %v2916_v10 = vcombine.low %v91_v2, %v95_v5  ;;  %v83_v12 = vld [vmem:[%s4799_s1 + $0x188] sm:$0xff]  ;;  %v96_v0 = vld [vmem:[%s4799_s1 + $0x1f0] sm:$0xff] }
   0x4   :  { %v86_v8 = vld [vmem:[%s4799_s1 + $0x1a0] sm:$0xff]  ;;  %v87_v13 = vld [vmem:[%s4799_s1 + $0x1a8] sm:$0xff]  ;;  %v93_v1 = vld [vmem:[%s4799_s1 + $0x1d8] sm:$0xff] }
   0x5   :  { %v2907_v11 = vcombine.high %v82_v7, %v86_v8  ;;  %v74_v14 = vld [vmem:[%s4799_s1 + $0x140] sm:$0xff]  ;;  %460 = vmatprep.subr.bf16.mxu0 %v2915_v4  ;;  %v2909_v15 = vcombine.high %v83_v12, %v87_v13  ;;  %v75_v17 = vld [vmem:[%s4799_s1 + $0x148] sm:$0xff]  ;;  %501 = vmatprep.subr.bf16.mxu1 %v2917_v9  ;;  %v2906_v19 = vcombine.low %v82_v7, %v86_v8  ;;  %v97_v2 = vld [vmem:[%s4799_s1 + $0x1f8] sm:$0xff] }
   0x6   :  { %v78_v16 = vld [vmem:[%s4799_s1 + $0x160] sm:$0xff]  ;;  %v79_v18 = vld [vmem:[%s4799_s1 + $0x168] sm:$0xff]  ;;  %461 = vmatpush1.bf16.msra.mxu0 %v2914_v6  ;;  %502 = vmatpush1.bf16.msra.mxu1 %v2916_v10  ;;  %v2908_v20 = vcombine.low %v83_v12, %v87_v13  ;;  %v2919_v6 = vcombine.high %v92_v62, %v96_v0  ;;  %v84_v7 = vld [vmem:[%s4799_s1 + $0x190] sm:$0xff]  ;;  %v2921_v8 = vcombine.high %v93_v1, %v97_v2 }
   0x7   :  { %462 = vmatprep.subr.bf16.mxu0 %v2907_v11  ;;  %v2899_v21 = vcombine.high %v74_v14, %v78_v16  ;;  %503 = vmatprep.subr.bf16.mxu1 %v2909_v15  ;;  %v2901_v22 = vcombine.high %v75_v17, %v79_v18  ;;  %v66_v23 = vld [vmem:[%s4799_s1 + $0x100] sm:$0xff]  ;;  %v67_v25 = vld [vmem:[%s4799_s1 + $0x108] sm:$0xff]  ;;  %v2898_v27 = vcombine.low %v74_v14, %v78_v16  ;;  %v88_v9 = vld [vmem:[%s4799_s1 + $0x1b0] sm:$0xff] }
   0x8   :  { %v70_v24 = vld [vmem:[%s4799_s1 + $0x120] sm:$0xff]  ;;  %v71_v26 = vld [vmem:[%s4799_s1 + $0x128] sm:$0xff]  ;;  %v2900_v28 = vcombine.low %v75_v17, %v79_v18  ;;  %v85_v10 = vld [vmem:[%s4799_s1 + $0x198] sm:$0xff]  ;;  %v2918_v13 = vcombine.low %v92_v62, %v96_v0  ;;  %v2920_v14 = vcombine.low %v93_v1, %v97_v2  ;;  %v2911_v15 = vcombine.high %v84_v7, %v88_v9 }
   0x9   :  { %v2891_v29 = vcombine.high %v66_v23, %v70_v24  ;;  %v2893_v30 = vcombine.high %v67_v25, %v71_v26  ;;  %v58_v31 = vld [vmem:[%s4799_s1 + $0xc0] sm:$0xff]  ;;  %v59_v33 = vld [vmem:[%s4799_s1 + $0xc8] sm:$0xff]  ;;  %v2890_v35 = vcombine.low %v66_v23, %v70_v24  ;;  %v2892_v36 = vcombine.low %v67_v25, %v71_v26  ;;  %v89_v11 = vld [vmem:[%s4799_s1 + $0x1b8] sm:$0xff] }
   0xa   :  { %463 = vmatpush1.bf16.msra.mxu0 %v2906_v19  ;;  %504 = vmatpush1.bf16.msra.mxu1 %v2908_v20  ;;  %v62_v32 = vld [vmem:[%s4799_s1 + $0xe0] sm:$0xff]  ;;  %v63_v34 = vld [vmem:[%s4799_s1 + $0xe8] sm:$0xff]  ;;  %v76_v16 = vld [vmem:[%s4799_s1 + $0x150] sm:$0xff]  ;;  %v2913_v17 = vcombine.high %v85_v10, %v89_v11 }
   0xb   :  { %464 = vmatprep.subr.bf16.mxu0 %v2899_v21  ;;  %505 = vmatprep.subr.bf16.mxu1 %v2901_v22  ;;  %v2883_v37 = vcombine.high %v58_v31, %v62_v32  ;;  %v2885_v38 = vcombine.high %v59_v33, %v63_v34  ;;  %v50_v39 = vld [vmem:[%s4799_s1 + $0x80] sm:$0xff]  ;;  %v51_v41 = vld [vmem:[%s4799_s1 + $0x88] sm:$0xff]  ;;  %v2882_v43 = vcombine.low %v58_v31, %v62_v32  ;;  %v80_v18 = vld [vmem:[%s4799_s1 + $0x170] sm:$0xff] }
   0xc   :  { %v54_v40 = vld [vmem:[%s4799_s1 + $0xa0] sm:$0xff]  ;;  %v55_v42 = vld [vmem:[%s4799_s1 + $0xa8] sm:$0xff]  ;;  %v2884_v44 = vcombine.low %v59_v33, %v63_v34  ;;  %v77_v19 = vld [vmem:[%s4799_s1 + $0x158] sm:$0xff]  ;;  %v2910_v21 = vcombine.low %v84_v7, %v88_v9  ;;  %v2912_v22 = vcombine.low %v85_v10, %v89_v11  ;;  %v2903_v23 = vcombine.high %v76_v16, %v80_v18 }
   0xd   :  { %v2875_v45 = vcombine.high %v50_v39, %v54_v40  ;;  %v2877_v46 = vcombine.high %v51_v41, %v55_v42  ;;  %v42_v47 = vld [vmem:[%s4799_s1 + $0x40] sm:$0xff]  ;;  %v43_v49 = vld [vmem:[%s4799_s1 + $0x48] sm:$0xff]  ;;  %v2874_v51 = vcombine.low %v50_v39, %v54_v40  ;;  %v2876_v52 = vcombine.low %v51_v41, %v55_v42  ;;  %v81_v20 = vld [vmem:[%s4799_s1 + $0x178] sm:$0xff] }
   0xe   :  { %465 = vmatpush1.bf16.msra.mxu0 %v2898_v27  ;;  %506 = vmatpush1.bf16.msra.mxu1 %v2900_v28  ;;  %v46_v48 = vld [vmem:[%s4799_s1 + $0x60] sm:$0xff]  ;;  %v47_v50 = vld [vmem:[%s4799_s1 + $0x68] sm:$0xff]  ;;  %v68_v24 = vld [vmem:[%s4799_s1 + $0x110] sm:$0xff]  ;;  %v2905_v25 = vcombine.high %v77_v19, %v81_v20 }
   0xf   :  { %466 = vmatprep.subr.bf16.mxu0 %v2891_v29  ;;  %507 = vmatprep.subr.bf16.mxu1 %v2893_v30  ;;  %v2867_v53 = vcombine.high %v42_v47, %v46_v48  ;;  %v34_v54 = vld [vmem:[%s4799_s1] sm:$0xff]  ;;  %v2869_v55 = vcombine.high %v43_v49, %v47_v50  ;;  %v35_v57 = vld [vmem:[%s4799_s1 + $0x8] sm:$0xff]  ;;  %v2866_v59 = vcombine.low %v42_v47, %v46_v48  ;;  %v72_v26 = vld [vmem:[%s4799_s1 + $0x130] sm:$0xff] }
  0x10   :  { %v38_v56 = vld [vmem:[%s4799_s1 + $0x20] sm:$0xff]  ;;  %v39_v58 = vld [vmem:[%s4799_s1 + $0x28] sm:$0xff]  ;;  %v2868_v60 = vcombine.low %v43_v49, %v47_v50  ;;  %v69_v27 = vld [vmem:[%s4799_s1 + $0x118] sm:$0xff]  ;;  %v2902_v29 = vcombine.low %v76_v16, %v80_v18  ;;  %v2904_v30 = vcombine.low %v77_v19, %v81_v20  ;;  %v2895_v31 = vcombine.high %v68_v24, %v72_v26 }
  0x11   :  { %v2859_v61 = vcombine.high %v34_v54, %v38_v56  ;;  %v2861_v63 = vcombine.high %v35_v57, %v39_v58  ;;  %v2858_v4 = vcombine.low %v34_v54, %v38_v56  ;;  %v2860_v5 = vcombine.low %v35_v57, %v39_v58  ;;  %v3822_v12 = vld [vmem:[%s4801_s0] sm:$0x1]  ;;  %v73_v28 = vld [vmem:[%s4799_s1 + $0x138] sm:$0xff]  ;;  %v60_v32 = vld [vmem:[%s4799_s1 + $0xd0] sm:$0xff] }
  0x12   :  { %467 = vmatpush1.bf16.msra.mxu0 %v2890_v35  ;;  %508 = vmatpush1.bf16.msra.mxu1 %v2892_v36  ;;  %v2897_v33 = vcombine.high %v69_v27, %v73_v28  ;;  %v64_v34 = vld [vmem:[%s4799_s1 + $0xf0] sm:$0xff]  ;;  %v65_v35 = vld [vmem:[%s4799_s1 + $0xf8] sm:$0xff]  ;;  %v2894_v36 = vcombine.low %v68_v24, %v72_v26 }
  0x13   :  { %468 = vmatprep.subr.bf16.mxu0 %v2883_v37  ;;  %509 = vmatprep.subr.bf16.mxu1 %v2885_v38  ;;  %v2896_v37 = vcombine.low %v69_v27, %v73_v28  ;;  %v2887_v38 = vcombine.high %v60_v32, %v64_v34  ;;  %v52_v39 = vld [vmem:[%s4799_s1 + $0x90] sm:$0xff]  ;;  %v53_v42 = vld [vmem:[%s4799_s1 + $0x98] sm:$0xff] }
  0x14   :  { %v56_v41 = vld [vmem:[%s4799_s1 + $0xb0] sm:$0xff]  ;;  %v45_v50 = vld [vmem:[%s4799_s1 + $0x58] sm:$0xff] }
  0x15   :  { %v44_v47 = vld [vmem:[%s4799_s1 + $0x50] sm:$0xff]  ;;  %v37_v58 = vld [vmem:[%s4799_s1 + $0x18] sm:$0xff] }
  0x16   :  { %469 = vmatpush1.bf16.msra.mxu0 %v2882_v43  ;;  %510 = vmatpush1.bf16.msra.mxu1 %v2884_v44  ;;  %v57_v43 = vld [vmem:[%s4799_s1 + $0xb8] sm:$0xff]  ;;  %v2886_v44 = vcombine.low %v60_v32, %v64_v34  ;;  %v48_v49 = vld [vmem:[%s4799_s1 + $0x70] sm:$0xff] }
  0x17   :  { %470 = vmatprep.subr.bf16.mxu0 %v2875_v45  ;;  %511 = vmatprep.subr.bf16.mxu1 %v2877_v46  ;;  %v2879_v46 = vcombine.high %v52_v39, %v56_v41  ;;  %v2881_v48 = vcombine.high %v53_v42, %v57_v43  ;;  %v2871_v54 = vcombine.high %v44_v47, %v48_v49  ;;  %v40_v57 = vld [vmem:[%s4799_s1 + $0x30] sm:$0xff]  ;;  %v3277_v7 = vld [vmem:[%s4800_s3 + $0x124] ss:$24 sps:$4 sm:$0xff]   ;;  %v3275_v9 = vld [vmem:[%s4800_s3 + $0x120] ss:$24 sps:$4 sm:$0xff]  }
  0x18   :  { %v3271_v0 = vld [vmem:[%s4800_s3 + $0x154] ss:$24 sps:$4 sm:$0xff]   ;;  %v3278_v10 = vld [vmem:[%s4800_s3 + $0x420] ss:$24 sps:$4 sm:$0xff]   ;;  %v3292_v16 = vld [vmem:[%s4800_s3 + $0x3c4] ss:$24 sps:$4 sm:$0xff]  }
  0x19   :  { %v3274_v2 = vld [vmem:[%s4800_s3 + $0x454] ss:$24 sps:$4 sm:$0xff]   ;;  %v3290_v18 = vld [vmem:[%s4800_s3 + $0x3c0] ss:$24 sps:$4 sm:$0xff]   ;;  %v3304_v24 = vld [vmem:[%s4800_s3 + $0x364] ss:$24 sps:$4 sm:$0xff]  }
  0x1a   :  { %471 = vmatpush1.bf16.msra.mxu0 %v2874_v51  ;;  %512 = vmatpush1.bf16.msra.mxu1 %v2876_v52  ;;  %v49_v51 = vld [vmem:[%s4799_s1 + $0x78] sm:$0xff]  ;;  %v2878_v52 = vcombine.low %v52_v39, %v56_v41  ;;  %v3283_v11 = vld [vmem:[%s4800_s3 + $0xf4] ss:$24 sps:$4 sm:$0xff]  }
  0x1b   :  { %472 = vmatprep.subr.bf16.mxu0 %v2867_v53  ;;  %513 = vmatprep.subr.bf16.mxu1 %v2869_v55  ;;  %v2880_v53 = vcombine.low %v53_v42, %v57_v43  ;;  %v36_v55 = vld [vmem:[%s4799_s1 + $0x10] sm:$0xff]  ;;  %v2873_v56 = vcombine.high %v45_v50, %v49_v51  ;;  %v3302_v26 = vld [vmem:[%s4800_s3 + $0x360] ss:$24 sps:$4 sm:$0xff]   ;;  %v3316_v32 = vld [vmem:[%s4800_s3 + $0x304] ss:$24 sps:$4 sm:$0xff]  }
  0x1c   :  { %v2863_v62 = vcombine.high %v36_v55, %v40_v57  ;;  %v2862_v1 = vcombine.low %v36_v55, %v40_v57  ;;  %v3295_v19 = vld [vmem:[%s4800_s3 + $0x94] ss:$24 sps:$4 sm:$0xff]   ;;  %v3314_v34 = vld [vmem:[%s4800_s3 + $0x300] ss:$24 sps:$4 sm:$0xff]   ;;  %v3328_v39 = vld [vmem:[%s4800_s3 + $0x5a4] ss:$24 sps:$4 sm:$0xff]  }
  0x1d   :  { %v3298_v20 = vld [vmem:[%s4800_s3 + $0x394] ss:$24 sps:$4 sm:$0xff]   ;;  %v3326_v41 = vld [vmem:[%s4800_s3 + $0x5a0] ss:$24 sps:$4 sm:$0xff]   ;;  %v3352_v55 = vld [vmem:[%s4800_s3 + $0x4e4] ss:$24 sps:$4 sm:$0xff]  }
  0x1e   :  { %473 = vmatpush1.bf16.msra.mxu0 %v2866_v59  ;;  %514 = vmatpush1.bf16.msra.mxu1 %v2868_v60  ;;  %v41_v59 = vld [vmem:[%s4799_s1 + $0x38] sm:$0xff]  ;;  %v2870_v60 = vcombine.low %v44_v47, %v48_v49  ;;  %v3307_v27 = vld [vmem:[%s4800_s3 + $0x34] ss:$24 sps:$4 sm:$0xff]  }
  0x1f   :  { %474 = vmatprep.subr.bf16.mxu0 %v2859_v61  ;;  %515 = vmatprep.subr.bf16.mxu1 %v2861_v63  ;;  %v2872_v61 = vcombine.low %v45_v50, %v49_v51  ;;  %v2865_v63 = vcombine.high %v37_v58, %v41_v59  ;;  %v3310_v28 = vld [vmem:[%s4800_s3 + $0x334] ss:$24 sps:$4 sm:$0xff]   ;;  %v3340_v47 = vld [vmem:[%s4800_s3 + $0x544] ss:$24 sps:$4 sm:$0xff]   ;;  %v3338_v49 = vld [vmem:[%s4800_s3 + $0x540] ss:$24 sps:$4 sm:$0xff]  }
  0x20   :  { %v3331_v42 = vld [vmem:[%s4800_s3 + $0x274] ss:$24 sps:$4 sm:$0xff]   ;;  %v3350_v57 = vld [vmem:[%s4800_s3 + $0x4e0] ss:$24 sps:$4 sm:$0xff]  }
  0x21   :  { %v3334_v43 = vld [vmem:[%s4800_s3 + $0x574] ss:$24 sps:$4 sm:$0xff]  }
  0x22   :  { %475 = vmatpush1.bf16.msra.mxu0 %v2858_v4  ;;  %516 = vmatpush1.bf16.msra.mxu1 %v2860_v5  ;;  %v2864_v4 = vcombine.low %v37_v58, %v41_v59  ;;  %v3269_v5 = vld [vmem:[%s4800_s3 + $0x150] ss:$24 sps:$4 sm:$0xff]   ;;  %v3343_v50 = vld [vmem:[%s4800_s3 + $0x214] ss:$24 sps:$4 sm:$0xff]  }
  0x23   :  { %542 = vmatprep.subr.bf16.mxu0 %v2919_v6  ;;  %583 = vmatprep.subr.bf16.mxu1 %v2921_v8  ;;  %v3272_v6 = vld [vmem:[%s4800_s3 + $0x450] ss:$24 sps:$4 sm:$0xff]   ;;  %v3280_v8 = vld [vmem:[%s4800_s3 + $0x424] ss:$24 sps:$4 sm:$0xff]   ;;  %v3346_v51 = vld [vmem:[%s4800_s3 + $0x514] ss:$24 sps:$4 sm:$0xff]  }
  0x24   :  { %v3355_v58 = vld [vmem:[%s4800_s3 + $0x1b4] ss:$24 sps:$4 sm:$0xff]  }
  0x25   :  { %493 = vmatmul.mubr.bf16.vlgmr.msra.gmra.mxu0 %v3822_v12  ;;  %534 = vmatmul.mubr.bf16.vlgmr.msra.gmra.mxu1 %v3822_v12  ;;  %v3358_v59 = vld [vmem:[%s4800_s3 + $0x4b4] ss:$24 sps:$4 sm:$0xff]  }
  0x26   :  { %543 = vmatpush1.bf16.msra.mxu0 %v2918_v13  ;;  %584 = vmatpush1.bf16.msra.mxu1 %v2920_v14  ;;  %v3286_v13 = vld [vmem:[%s4800_s3 + $0x3f4] ss:$24 sps:$4 sm:$0xff]   ;;  %v3281_v14 = vld [vmem:[%s4800_s3 + $0xf0] ss:$24 sps:$4 sm:$0xff]  }
  0x27   :  { %544 = vmatprep.subr.bf16.mxu0 %v2911_v15  ;;  %585 = vmatprep.subr.bf16.mxu1 %v2913_v17  ;;  %v3284_v15 = vld [vmem:[%s4800_s3 + $0x3f0] ss:$24 sps:$4 sm:$0xff]   ;;  %v3287_v17 = vld [vmem:[%s4800_s3 + $0xc0] ss:$24 sps:$4 sm:$0xff]  }
  0x28   :  { %574 = vmatprep.mubr.bf16.mxu0 %v3646_v3  ;;  %615 = vmatprep.mubr.bf16.mxu1 %v3646_v3  ;;  %v61_v3 = vld [vmem:[%s4799_s1 + $0xd8] sm:$0xff] }
  0x29   :  { %v2889_v40 = vcombine.high %v61_v3, %v65_v35  ;;  %v2888_v45 = vcombine.low %v61_v3, %v65_v35  ;;  %v3319_v3 = vld [vmem:[%s4800_s3 + $0x2d4] ss:$24 sps:$4 sm:$0xff]  }
  0x2a   :  { %545 = vmatpush1.bf16.msra.mxu0 %v2910_v21  ;;  %586 = vmatpush1.bf16.msra.mxu1 %v2912_v22  ;;  %v3293_v21 = vld [vmem:[%s4800_s3 + $0x90] ss:$24 sps:$4 sm:$0xff]   ;;  %v3322_v35 = vld [vmem:[%s4800_s3 + $0x5d4] ss:$24 sps:$4 sm:$0xff]  }
  0x2b   :  { %546 = vmatprep.subr.bf16.mxu0 %v2903_v23  ;;  %587 = vmatprep.subr.bf16.mxu1 %v2905_v25  ;;  %v3296_v22 = vld [vmem:[%s4800_s3 + $0x390] ss:$24 sps:$4 sm:$0xff]   ;;  %v3301_v23 = vld [vmem:[%s4800_s3 + $0x64] ss:$24 sps:$4 sm:$0xff]   ;;  %v3299_v25 = vld [vmem:[%s4800_s3 + $0x60] ss:$24 sps:$4 sm:$0xff]  }
  0x2e   :  { %547 = vmatpush1.bf16.msra.mxu0 %v2902_v29  ;;  %588 = vmatpush1.bf16.msra.mxu1 %v2904_v30  ;;  %v3305_v29 = vld [vmem:[%s4800_s3 + $0x30] ss:$24 sps:$4 sm:$0xff]  }
  0x2f   :  { %548 = vmatprep.subr.bf16.mxu0 %v2895_v31  ;;  %589 = vmatprep.subr.bf16.mxu1 %v2897_v33  ;;  %v3308_v30 = vld [vmem:[%s4800_s3 + $0x330] ss:$24 sps:$4 sm:$0xff]   ;;  %v3313_v31 = vld [vmem:[%s4800_s3 + $0x4] ss:$24 sps:$4 sm:$0xff]   ;;  %v3311_v33 = vld [vmem:[%s4800_s3] ss:$24 sps:$4 sm:$0xff]  }
  0x32   :  { %549 = vmatpush1.bf16.msra.mxu0 %v2894_v36  ;;  %590 = vmatpush1.bf16.msra.mxu1 %v2896_v37  ;;  %v3317_v36 = vld [vmem:[%s4800_s3 + $0x2d0] ss:$24 sps:$4 sm:$0xff]  }
  0x33   :  { %550 = vmatprep.subr.bf16.mxu0 %v2887_v38  ;;  %591 = vmatprep.subr.bf16.mxu1 %v2889_v40  ;;  %v3320_v37 = vld [vmem:[%s4800_s3 + $0x5d0] ss:$24 sps:$4 sm:$0xff]   ;;  %v3325_v38 = vld [vmem:[%s4800_s3 + $0x2a4] ss:$24 sps:$4 sm:$0xff]   ;;  %v3323_v40 = vld [vmem:[%s4800_s3 + $0x2a0] ss:$24 sps:$4 sm:$0xff]  }
  0x36   :  { %551 = vmatpush1.bf16.msra.mxu0 %v2886_v44  ;;  %592 = vmatpush1.bf16.msra.mxu1 %v2888_v45  ;;  %v3329_v44 = vld [vmem:[%s4800_s3 + $0x270] ss:$24 sps:$4 sm:$0xff]  }
  0x37   :  { %552 = vmatprep.subr.bf16.mxu0 %v2879_v46  ;;  %593 = vmatprep.subr.bf16.mxu1 %v2881_v48  ;;  %v3332_v45 = vld [vmem:[%s4800_s3 + $0x570] ss:$24 sps:$4 sm:$0xff]   ;;  %v3337_v46 = vld [vmem:[%s4800_s3 + $0x244] ss:$24 sps:$4 sm:$0xff]   ;;  %v3335_v48 = vld [vmem:[%s4800_s3 + $0x240] ss:$24 sps:$4 sm:$0xff]  }
  0x3a   :  { %553 = vmatpush1.bf16.msra.mxu0 %v2878_v52  ;;  %594 = vmatpush1.bf16.msra.mxu1 %v2880_v53  ;;  %v3341_v52 = vld [vmem:[%s4800_s3 + $0x210] ss:$24 sps:$4 sm:$0xff]  }
  0x3b   :  { %554 = vmatprep.subr.bf16.mxu0 %v2871_v54  ;;  %595 = vmatprep.subr.bf16.mxu1 %v2873_v56  ;;  %v3344_v53 = vld [vmem:[%s4800_s3 + $0x510] ss:$24 sps:$4 sm:$0xff]   ;;  %v3349_v54 = vld [vmem:[%s4800_s3 + $0x1e4] ss:$24 sps:$4 sm:$0xff]   ;;  %v3347_v56 = vld [vmem:[%s4800_s3 + $0x1e0] ss:$24 sps:$4 sm:$0xff]  }
  0x3e   :  { %555 = vmatpush1.bf16.msra.mxu0 %v2870_v60  ;;  %596 = vmatpush1.bf16.msra.mxu1 %v2872_v61  ;;  %v3353_v60 = vld [vmem:[%s4800_s3 + $0x1b0] ss:$24 sps:$4 sm:$0xff]  }
  0x3f   :  { %556 = vmatprep.subr.bf16.mxu0 %v2863_v62  ;;  %597 = vmatprep.subr.bf16.mxu1 %v2865_v63  ;;  %v3356_v61 = vld [vmem:[%s4800_s3 + $0x4b0] ss:$24 sps:$4 sm:$0xff]   ;;  %v3361_v62 = vld [vmem:[%s4800_s3 + $0x184] ss:$24 sps:$4 sm:$0xff]  }
  0x40   :  { %v3364_v63 = vld [vmem:[%s4800_s3 + $0x484] ss:$24 sps:$4 sm:$0xff]  }
  0x42   :  { %557 = vmatpush1.bf16.msra.mxu0 %v2862_v1  ;;  %598 = vmatpush1.bf16.msra.mxu1 %v2864_v4  ;;  %v3362_v1 = vld [vmem:[%s4800_s3 + $0x480] ss:$24 sps:$4 sm:$0xff]   ;;  %v3370_v4 = vld [vmem:[%s4800_s3 + $0x45c] ss:$24 sps:$4 sm:$0xff]  }
  0x43   :  { %1824 = vmatprep.subr.bf16.mxu0 %v3271_v0  ;;  %1865 = vmatprep.subr.bf16.mxu1 %v3274_v2  ;;  %v3359_v0 = vld [vmem:[%s4800_s3 + $0x180] ss:$24 sps:$4 sm:$0xff]   ;;  %v3367_v2 = vld [vmem:[%s4800_s3 + $0x15c] ss:$24 sps:$4 sm:$0xff]  }
  0x45   :  { %575 = vmatmul.mubr.bf16.vlgmr.msra.gmra.mxu0 %v3822_v12  ;;  %616 = vmatmul.mubr.bf16.vlgmr.msra.gmra.mxu1 %v3822_v12  ;;  %v3289_v12 = vld [vmem:[%s4800_s3 + $0xc4] ss:$24 sps:$4 sm:$0xff]  }
  0x46   :  { %1825 = vmatpush1.bf16.msra.mxu0 %v3269_v5  ;;  %1866 = vmatpush1.bf16.msra.mxu1 %v3272_v6  ;;  %v100_v5 = vlaneseq }
  0x47   :  { %1826 = vmatprep.subr.bf16.mxu0 %v3277_v7  ;;  %1867 = vmatprep.subr.bf16.mxu1 %v3280_v8  ;;  %v4106_v8 = vld [vmem:[%s4802_s2] sm:$0xff] }
  0x48   :  { %v4100_v6 = vshrl.u32 %v100_v5, 7 }
  0x4a   :  { %1827 = vmatpush1.bf16.msra.mxu0 %v3275_v9  ;;  %1868 = vmatpush1.bf16.msra.mxu1 %v3278_v10  ;;  %v102_v7 = vsub.s32 0, %v4100_v6  ;;  %v110_v9 = vsub.s32 2, %v4100_v6  ;;  %v106_v10 = vsub.s32 1, %v4100_v6 }
  0x4b   :  { %1828 = vmatprep.subr.bf16.mxu0 %v3283_v11  ;;  %1869 = vmatprep.subr.bf16.mxu1 %v3286_v13  ;;  %v114_v11 = vsub.s32 3, %v4100_v6 }
  0x4c   :  { %v103_v13 = vrot.slane %v4106_v8, %v102_v7 }
  0x4e   :  { %1829 = vmatpush1.bf16.msra.mxu0 %v3281_v14  ;;  %1870 = vmatpush1.bf16.msra.mxu1 %v3284_v15  ;;  %v111_v14 = vrot.slane %v4106_v8, %v110_v9  ;;  %v107_v15 = vrot.slane %v4106_v8, %v106_v10 }
  0x4f   :  { %1830 = vmatprep.subr.bf16.mxu0 %v3289_v12  ;;  %1871 = vmatprep.subr.bf16.mxu1 %v3292_v16  ;;  %v115_v16 = vrot.slane %v4106_v8, %v114_v11 }
  0x52   :  { %1831 = vmatpush1.bf16.msra.mxu0 %v3287_v17  ;;  %1872 = vmatpush1.bf16.msra.mxu1 %v3290_v18 }
  0x53   :  { %1832 = vmatprep.subr.bf16.mxu0 %v3295_v19  ;;  %1873 = vmatprep.subr.bf16.mxu1 %v3298_v20 }
  0x56   :  { %1833 = vmatpush1.bf16.msra.mxu0 %v3293_v21  ;;  %1874 = vmatpush1.bf16.msra.mxu1 %v3296_v22 }
  0x57   :  { %1834 = vmatprep.subr.bf16.mxu0 %v3301_v23  ;;  %1875 = vmatprep.subr.bf16.mxu1 %v3304_v24 }
  0x5a   :  { %1835 = vmatpush1.bf16.msra.mxu0 %v3299_v25  ;;  %1876 = vmatpush1.bf16.msra.mxu1 %v3302_v26 }
  0x5b   :  { %1836 = vmatprep.subr.bf16.mxu0 %v3307_v27  ;;  %1877 = vmatprep.subr.bf16.mxu1 %v3310_v28 }
  0x5e   :  { %1837 = vmatpush1.bf16.msra.mxu0 %v3305_v29  ;;  %1878 = vmatpush1.bf16.msra.mxu1 %v3308_v30 }
  0x5f   :  { %1838 = vmatprep.subr.bf16.mxu0 %v3313_v31  ;;  %1879 = vmatprep.subr.bf16.mxu1 %v3316_v32 }
  0x62   :  { %1839 = vmatpush1.bf16.msra.mxu0 %v3311_v33  ;;  %1880 = vmatpush1.bf16.msra.mxu1 %v3314_v34  ;;  %v3365_v34 = vld [vmem:[%s4800_s3 + $0x158] ss:$24 sps:$4 sm:$0xff]  }
  0x63   :  { %1840 = vmatprep.subr.bf16.mxu0 %v3319_v3  ;;  %1881 = vmatprep.subr.bf16.mxu1 %v3322_v35 }
  0x66   :  { %1841 = vmatpush2.bf16.msra.mxu0 %v3317_v36  ;;  %1882 = vmatpush2.bf16.msra.mxu1 %v3320_v37  ;;  %v3368_v36 = vld [vmem:[%s4800_s3 + $0x458] ss:$24 sps:$4 sm:$0xff]   ;;  %v3371_v37 = vld [vmem:[%s4800_s3 + $0x128] ss:$24 sps:$4 sm:$0xff]  }
  0x67   :  { %1842 = vmatprep.subr.bf16.mxu0 %v3325_v38  ;;  %1883 = vmatprep.subr.bf16.mxu1 %v3328_v39  ;;  %v3373_v38 = vld [vmem:[%s4800_s3 + $0x12c] ss:$24 sps:$4 sm:$0xff]  }
  0x68   :  { %v3376_v39 = vld [vmem:[%s4800_s3 + $0x42c] ss:$24 sps:$4 sm:$0xff]  }
  0x6a   :  { %1843 = vmatpush2.bf16.msra.mxu0 %v3323_v40  ;;  %1884 = vmatpush2.bf16.msra.mxu1 %v3326_v41  ;;  %v3374_v40 = vld [vmem:[%s4800_s3 + $0x428] ss:$24 sps:$4 sm:$0xff]   ;;  %v3379_v41 = vld [vmem:[%s4800_s3 + $0xfc] ss:$24 sps:$4 sm:$0xff]  }
  0x6b   :  { %1844 = vmatprep.subr.bf16.mxu0 %v3331_v42  ;;  %1885 = vmatprep.subr.bf16.mxu1 %v3334_v43  ;;  %v3382_v42 = vld [vmem:[%s4800_s3 + $0x3fc] ss:$24 sps:$4 sm:$0xff]   ;;  %v3377_v43 = vld [vmem:[%s4800_s3 + $0xf8] ss:$24 sps:$4 sm:$0xff]  }
  0x6e   :  { %1845 = vmatpush2.bf16.msra.mxu0 %v3329_v44  ;;  %1886 = vmatpush2.bf16.msra.mxu1 %v3332_v45  ;;  %v3380_v44 = vld [vmem:[%s4800_s3 + $0x3f8] ss:$24 sps:$4 sm:$0xff]   ;;  %v3385_v45 = vld [vmem:[%s4800_s3 + $0xcc] ss:$24 sps:$4 sm:$0xff]  }
  0x6f   :  { %1846 = vmatprep.subr.bf16.mxu0 %v3337_v46  ;;  %1887 = vmatprep.subr.bf16.mxu1 %v3340_v47  ;;  %v3388_v46 = vld [vmem:[%s4800_s3 + $0x3cc] ss:$24 sps:$4 sm:$0xff]   ;;  %v3383_v47 = vld [vmem:[%s4800_s3 + $0xc8] ss:$24 sps:$4 sm:$0xff]  }
  0x72   :  { %1847 = vmatpush2.bf16.msra.mxu0 %v3335_v48  ;;  %1888 = vmatpush2.bf16.msra.mxu1 %v3338_v49  ;;  %v3386_v48 = vld [vmem:[%s4800_s3 + $0x3c8] ss:$24 sps:$4 sm:$0xff]   ;;  %v3391_v49 = vld [vmem:[%s4800_s3 + $0x9c] ss:$24 sps:$4 sm:$0xff]  }
  0x73   :  { %1848 = vmatprep.subr.bf16.mxu0 %v3343_v50  ;;  %1889 = vmatprep.subr.bf16.mxu1 %v3346_v51  ;;  %v3394_v50 = vld [vmem:[%s4800_s3 + $0x39c] ss:$24 sps:$4 sm:$0xff]   ;;  %v3389_v51 = vld [vmem:[%s4800_s3 + $0x98] ss:$24 sps:$4 sm:$0xff]  }
  0x76   :  { %1849 = vmatpush2.bf16.msra.mxu0 %v3341_v52  ;;  %1890 = vmatpush2.bf16.msra.mxu1 %v3344_v53  ;;  %v3392_v52 = vld [vmem:[%s4800_s3 + $0x398] ss:$24 sps:$4 sm:$0xff]   ;;  %v3397_v53 = vld [vmem:[%s4800_s3 + $0x6c] ss:$24 sps:$4 sm:$0xff]  }
  0x77   :  { %1850 = vmatprep.subr.bf16.mxu0 %v3349_v54  ;;  %1891 = vmatprep.subr.bf16.mxu1 %v3352_v55  ;;  %v3400_v54 = vld [vmem:[%s4800_s3 + $0x36c] ss:$24 sps:$4 sm:$0xff]   ;;  %v3395_v55 = vld [vmem:[%s4800_s3 + $0x68] ss:$24 sps:$4 sm:$0xff]  }
  0x7a   :  { %1851 = vmatpush2.bf16.msra.mxu0 %v3347_v56  ;;  %1892 = vmatpush2.bf16.msra.mxu1 %v3350_v57  ;;  %v3398_v56 = vld [vmem:[%s4800_s3 + $0x368] ss:$24 sps:$4 sm:$0xff]   ;;  %v3403_v57 = vld [vmem:[%s4800_s3 + $0x3c] ss:$24 sps:$4 sm:$0xff]  }
  0x7b   :  { %1852 = vmatprep.subr.bf16.mxu0 %v3355_v58  ;;  %1893 = vmatprep.subr.bf16.mxu1 %v3358_v59  ;;  %v3406_v58 = vld [vmem:[%s4800_s3 + $0x33c] ss:$24 sps:$4 sm:$0xff]   ;;  %v3401_v59 = vld [vmem:[%s4800_s3 + $0x38] ss:$24 sps:$4 sm:$0xff]  }
  0x7e   :  { %1853 = vmatpush2.bf16.msra.mxu0 %v3353_v60  ;;  %1894 = vmatpush2.bf16.msra.mxu1 %v3356_v61  ;;  %v3404_v60 = vld [vmem:[%s4800_s3 + $0x338] ss:$24 sps:$4 sm:$0xff]   ;;  %v3409_v61 = vld [vmem:[%s4800_s3 + $0xc] ss:$24 sps:$4 sm:$0xff]  }
  0x7f   :  { %1854 = vmatprep.subr.bf16.mxu0 %v3361_v62  ;;  %1895 = vmatprep.subr.bf16.mxu1 %v3364_v63  ;;  %v3412_v63 = vld [vmem:[%s4800_s3 + $0x30c] ss:$24 sps:$4 sm:$0xff]  }
  0x82   :  { %1855 = vmatpush2.bf16.msra.mxu0 %v3359_v0  ;;  %1896 = vmatpush2.bf16.msra.mxu1 %v3362_v1  ;;  %v3407_v1 = vld [vmem:[%s4800_s3 + $0x8] ss:$24 sps:$4 sm:$0xff]  }
  0x83   :  { %1906 = vmatprep.subr.bf16.mxu0 %v3367_v2  ;;  %1947 = vmatprep.subr.bf16.mxu1 %v3370_v4  ;;  %v3410_v4 = vld [vmem:[%s4800_s3 + $0x308] ss:$24 sps:$4 sm:$0xff]  }
  0xe5   :  { %v494_v12 = vpop.f32.mrf.mxu0  ;;  %v535_v18 = vpop.f32.mrf.mxu1 }
  0xe6   :  { %v495_v17 = vadd.f32 %v494_v12, %v103_v13  ;;  %v536_v19 = vadd.f32 %v535_v18, %v111_v14  ;;  %v3415_v13 = vld [vmem:[%s4800_s3 + $0x2dc] ss:$24 sps:$4 sm:$0xff]   ;;  %v3416_v18 = vld [vmem:[%s4800_s3 + $0x5d8] ss:$24 sps:$4 sm:$0xff]  }
  0xe7   :  { %v496_v20 = vpop.f32.mrf.mxu0  ;;  %v537_v22 = vpop.f32.mrf.mxu1 }
  0xe8   :  { %v497_v21 = vadd.f32 %v496_v20, %v107_v15  ;;  %v624_v23 = vmax.f32 %v495_v17, 0.0  ;;  %v626_v24 = vmax.f32 %v536_v19, 0.0  ;;  %v538_v25 = vadd.f32 %v537_v22, %v115_v16  ;;  %v3418_v15 = vld [vmem:[%s4800_s3 + $0x5dc] ss:$24 sps:$4 sm:$0xff]   ;;  %v3413_v16 = vld [vmem:[%s4800_s3 + $0x2d8] ss:$24 sps:$4 sm:$0xff]  }
  0xe9   :  { %v498_v26 = vpop.f32.mrf.mxu0  ;;  %v539_v28 = vpop.f32.mrf.mxu1  ;;  %v3421_v20 = vld [vmem:[%s4800_s3 + $0x2ac] ss:$24 sps:$4 sm:$0xff]   ;;  %v3419_v22 = vld [vmem:[%s4800_s3 + $0x2a8] ss:$24 sps:$4 sm:$0xff]  }
  0xea   :  { %v625_v27 = vmax.f32 %v497_v21, 0.0  ;;  %v627_v29 = vmax.f32 %v538_v25, 0.0  ;;  %v4123_v31 = vpack.c.bf16 %v626_v24, %v626_v24  ;;  %v4130_v3 = vpack.c.bf16 %v624_v23, %v624_v23  ;;  %v3424_v21 = vld [vmem:[%s4800_s3 + $0x5ac] ss:$24 sps:$4 sm:$0xff]   ;;  %v3422_v23 = vld [vmem:[%s4800_s3 + $0x5a8] ss:$24 sps:$4 sm:$0xff]  }
  0xeb   :  { %v499_v30 = vpop.f32.mrf.mxu0  ;;  %v540_v33 = vpop.f32.mrf.mxu1  ;;  %v3427_v24 = vld [vmem:[%s4800_s3 + $0x27c] ss:$24 sps:$4 sm:$0xff]   ;;  %v3425_v26 = vld [vmem:[%s4800_s3 + $0x278] ss:$24 sps:$4 sm:$0xff]   ;;  %v3433_v28 = vld [vmem:[%s4800_s3 + $0x24c] ss:$24 sps:$4 sm:$0xff]  }
  0xec   :  { %v4125_v32 = vpack.c.bf16 %v625_v27, %v625_v27  ;;  %v4132_v35 = vpack.c.bf16 %v627_v29, %v627_v29  ;;  %v3430_v25 = vld [vmem:[%s4800_s3 + $0x57c] ss:$24 sps:$4 sm:$0xff]   ;;  %v3428_v27 = vld [vmem:[%s4800_s3 + $0x578] ss:$24 sps:$4 sm:$0xff]   ;;  %v3436_v29 = vld [vmem:[%s4800_s3 + $0x54c] ss:$24 sps:$4 sm:$0xff]  }
  0xed   :  { %v3431_v30 = vld [vmem:[%s4800_s3 + $0x248] ss:$24 sps:$4 sm:$0xff]  }
  0xee   :  { %1856 = vmatprep.mubr.bf16.mxu0 %v4125_v32  ;;  %1897 = vmatprep.mubr.bf16.mxu1 %v4132_v35  ;;  %v3434_v33 = vld [vmem:[%s4800_s3 + $0x548] ss:$24 sps:$4 sm:$0xff]  }
  0xef   :  { %1857 = vmatmul.mubr.bf16.vlgmr.msra.gmra.mxu0 %v4130_v3  ;;  %1898 = vmatmul.mubr.bf16.vlgmr.msra.gmra.mxu1 %v4123_v31 }
  0xf0   :  { %1907 = vmatpush1.bf16.msra.mxu0 %v3365_v34  ;;  %1948 = vmatpush1.bf16.msra.mxu1 %v3368_v36  ;;  %v3439_v34 = vld [vmem:[%s4800_s3 + $0x21c] ss:$24 sps:$4 sm:$0xff]  }
  0xf1   :  { %1938 = vmatprep.mubr.bf16.mxu0 %v4125_v32  ;;  %1979 = vmatprep.mubr.bf16.mxu1 %v4132_v35  ;;  %v3442_v36 = vld [vmem:[%s4800_s3 + $0x51c] ss:$24 sps:$4 sm:$0xff]  }
  0xf2   :  { %1908 = vmatprep.subr.bf16.mxu0 %v3373_v38  ;;  %1949 = vmatprep.subr.bf16.mxu1 %v3376_v39  ;;  %v3440_v38 = vld [vmem:[%s4800_s3 + $0x518] ss:$24 sps:$4 sm:$0xff]   ;;  %v3445_v39 = vld [vmem:[%s4800_s3 + $0x1ec] ss:$24 sps:$4 sm:$0xff]  }
  0xf4   :  { %1909 = vmatpush1.bf16.msra.mxu0 %v3371_v37  ;;  %1950 = vmatpush1.bf16.msra.mxu1 %v3374_v40  ;;  %v3437_v37 = vld [vmem:[%s4800_s3 + $0x218] ss:$24 sps:$4 sm:$0xff]   ;;  %v3448_v40 = vld [vmem:[%s4800_s3 + $0x4ec] ss:$24 sps:$4 sm:$0xff]  }
  0xf5   :  { %1910 = vmatprep.subr.bf16.mxu0 %v3379_v41  ;;  %1951 = vmatprep.subr.bf16.mxu1 %v3382_v42  ;;  %v3443_v41 = vld [vmem:[%s4800_s3 + $0x1e8] ss:$24 sps:$4 sm:$0xff]  }
  0xf6   :  { %v3446_v42 = vld [vmem:[%s4800_s3 + $0x4e8] ss:$24 sps:$4 sm:$0xff]  }
  0xf8   :  { %1911 = vmatpush1.bf16.msra.mxu0 %v3377_v43  ;;  %1952 = vmatpush1.bf16.msra.mxu1 %v3380_v44  ;;  %v3451_v43 = vld [vmem:[%s4800_s3 + $0x1bc] ss:$24 sps:$4 sm:$0xff]  }
  0xf9   :  { %1912 = vmatprep.subr.bf16.mxu0 %v3385_v45  ;;  %1953 = vmatprep.subr.bf16.mxu1 %v3388_v46  ;;  %v3454_v44 = vld [vmem:[%s4800_s3 + $0x4bc] ss:$24 sps:$4 sm:$0xff]   ;;  %v3449_v45 = vld [vmem:[%s4800_s3 + $0x1b8] ss:$24 sps:$4 sm:$0xff]  }
  0xfa   :  { %v3452_v46 = vld [vmem:[%s4800_s3 + $0x4b8] ss:$24 sps:$4 sm:$0xff]  }
  0xfc   :  { %1913 = vmatpush1.bf16.msra.mxu0 %v3383_v47  ;;  %1954 = vmatpush1.bf16.msra.mxu1 %v3386_v48  ;;  %v3457_v47 = vld [vmem:[%s4800_s3 + $0x18c] ss:$24 sps:$4 sm:$0xff]  }
  0xfd   :  { %1914 = vmatprep.subr.bf16.mxu0 %v3391_v49  ;;  %1955 = vmatprep.subr.bf16.mxu1 %v3394_v50  ;;  %v3460_v48 = vld [vmem:[%s4800_s3 + $0x48c] ss:$24 sps:$4 sm:$0xff]   ;;  %v3455_v49 = vld [vmem:[%s4800_s3 + $0x188] ss:$24 sps:$4 sm:$0xff]  }
  0xfe   :  { %v3458_v50 = vld [vmem:[%s4800_s3 + $0x488] ss:$24 sps:$4 sm:$0xff]  }
 0x100   :  { %1915 = vmatpush1.bf16.msra.mxu0 %v3389_v51  ;;  %1956 = vmatpush1.bf16.msra.mxu1 %v3392_v52  ;;  %v3463_v51 = vld [vmem:[%s4800_s3 + $0x164] ss:$24 sps:$4 sm:$0xff]  }
 0x101   :  { %1916 = vmatprep.subr.bf16.mxu0 %v3397_v53  ;;  %1957 = vmatprep.subr.bf16.mxu1 %v3400_v54  ;;  %v3466_v52 = vld [vmem:[%s4800_s3 + $0x464] ss:$24 sps:$4 sm:$0xff]   ;;  %v3461_v53 = vld [vmem:[%s4800_s3 + $0x160] ss:$24 sps:$4 sm:$0xff]  }
 0x102   :  { %v3464_v54 = vld [vmem:[%s4800_s3 + $0x460] ss:$24 sps:$4 sm:$0xff]  }
 0x104   :  { %1917 = vmatpush1.bf16.msra.mxu0 %v3395_v55  ;;  %1958 = vmatpush1.bf16.msra.mxu1 %v3398_v56  ;;  %v3469_v55 = vld [vmem:[%s4800_s3 + $0x134] ss:$24 sps:$4 sm:$0xff]  }
 0x105   :  { %1918 = vmatprep.subr.bf16.mxu0 %v3403_v57  ;;  %v4218_v62 = vpop.f32.mrf.mxu0  ;;  %1959 = vmatprep.subr.bf16.mxu1 %v3406_v58  ;;  %v4223_v0 = vpop.f32.mrf.mxu1  ;;  %v3472_v56 = vld [vmem:[%s4800_s3 + $0x434] ss:$24 sps:$4 sm:$0xff]   ;;  %v3467_v57 = vld [vmem:[%s4800_s3 + $0x130] ss:$24 sps:$4 sm:$0xff]  }
 0x106   :  { %v3470_v58 = vld [vmem:[%s4800_s3 + $0x430] ss:$24 sps:$4 sm:$0xff]  }
 0x107   :  { %v4228_v2 = vpop.f32.mrf.mxu0  ;;  %v4233_v5 = vpop.f32.mrf.mxu1 }
 0x108   :  { %1919 = vmatpush1.bf16.msra.mxu0 %v3401_v59  ;;  %1960 = vmatpush1.bf16.msra.mxu1 %v3404_v60  ;;  %v3475_v59 = vld [vmem:[%s4800_s3 + $0x104] ss:$24 sps:$4 sm:$0xff]  }
 0x109   :  { %1920 = vmatprep.subr.bf16.mxu0 %v3409_v61  ;;  %v580_v14 = vpop.f32.mrf.mxu0  ;;  %1961 = vmatprep.subr.bf16.mxu1 %v3412_v63  ;;  %v621_v12 = vpop.f32.mrf.mxu1  ;;  %v3478_v60 = vld [vmem:[%s4800_s3 + $0x404] ss:$24 sps:$4 sm:$0xff]   ;;  %v3473_v61 = vld [vmem:[%s4800_s3 + $0x100] ss:$24 sps:$4 sm:$0xff]  }
 0x10a   :  { %v3476_v63 = vld [vmem:[%s4800_s3 + $0x400] ss:$24 sps:$4 sm:$0xff]   ;;  %v3482_v14 = vld [vmem:[%s4800_s3 + $0x3d0] ss:$24 sps:$4 sm:$0xff]   ;;  %v3490_v12 = vld [vmem:[%s4800_s3 + $0x3a4] ss:$24 sps:$4 sm:$0xff]  }
 0x10b   :  { %v581_v17 = vpop.f32.mrf.mxu0  ;;  %v622_v19 = vpop.f32.mrf.mxu1 }
 0x10c   :  { %1921 = vmatpush1.bf16.msra.mxu0 %v3407_v1  ;;  %1962 = vmatpush1.bf16.msra.mxu1 %v3410_v4  ;;  %v3481_v1 = vld [vmem:[%s4800_s3 + $0xd4] ss:$24 sps:$4 sm:$0xff]   ;;  %v3488_v17 = vld [vmem:[%s4800_s3 + $0x3a0] ss:$24 sps:$4 sm:$0xff]  }
 0x10d   :  { %1922 = vmatprep.subr.bf16.mxu0 %v3415_v13  ;;  %1963 = vmatprep.subr.bf16.mxu1 %v3418_v15  ;;  %v3484_v4 = vld [vmem:[%s4800_s3 + $0x3d4] ss:$24 sps:$4 sm:$0xff]   ;;  %v3479_v13 = vld [vmem:[%s4800_s3 + $0xd0] ss:$24 sps:$4 sm:$0xff]   ;;  %v3487_v15 = vld [vmem:[%s4800_s3 + $0xa4] ss:$24 sps:$4 sm:$0xff]  }
 0x10e   :  { %v3496_v19 = vld [vmem:[%s4800_s3 + $0x374] ss:$24 sps:$4 sm:$0xff]  }
 0x110   :  { %1923 = vmatpush2.bf16.msra.mxu0 %v3413_v16  ;;  %1964 = vmatpush2.bf16.msra.mxu1 %v3416_v18  ;;  %v3485_v16 = vld [vmem:[%s4800_s3 + $0xa0] ss:$24 sps:$4 sm:$0xff]   ;;  %v3493_v18 = vld [vmem:[%s4800_s3 + $0x74] ss:$24 sps:$4 sm:$0xff]  }
 0x111   :  { %1924 = vmatprep.subr.bf16.mxu0 %v3421_v20  ;;  %1965 = vmatprep.subr.bf16.mxu1 %v3424_v21  ;;  %v3491_v20 = vld [vmem:[%s4800_s3 + $0x70] ss:$24 sps:$4 sm:$0xff]  }
 0x112   :  { %v3494_v21 = vld [vmem:[%s4800_s3 + $0x370] ss:$24 sps:$4 sm:$0xff]  }
 0x114   :  { %1925 = vmatpush2.bf16.msra.mxu0 %v3419_v22  ;;  %1966 = vmatpush2.bf16.msra.mxu1 %v3422_v23  ;;  %v3499_v22 = vld [vmem:[%s4800_s3 + $0x44] ss:$24 sps:$4 sm:$0xff]  }
 0x115   :  { %1926 = vmatprep.subr.bf16.mxu0 %v3427_v24  ;;  %1967 = vmatprep.subr.bf16.mxu1 %v3430_v25  ;;  %v3502_v23 = vld [vmem:[%s4800_s3 + $0x344] ss:$24 sps:$4 sm:$0xff]   ;;  %v3497_v24 = vld [vmem:[%s4800_s3 + $0x40] ss:$24 sps:$4 sm:$0xff]  }
 0x116   :  { %v3500_v25 = vld [vmem:[%s4800_s3 + $0x340] ss:$24 sps:$4 sm:$0xff]  }
 0x118   :  { %1927 = vmatpush2.bf16.msra.mxu0 %v3425_v26  ;;  %1968 = vmatpush2.bf16.msra.mxu1 %v3428_v27  ;;  %v3505_v26 = vld [vmem:[%s4800_s3 + $0x14] ss:$24 sps:$4 sm:$0xff]  }
 0x119   :  { %1928 = vmatprep.subr.bf16.mxu0 %v3433_v28  ;;  %1969 = vmatprep.subr.bf16.mxu1 %v3436_v29  ;;  %v3508_v27 = vld [vmem:[%s4800_s3 + $0x314] ss:$24 sps:$4 sm:$0xff]   ;;  %v3503_v28 = vld [vmem:[%s4800_s3 + $0x10] ss:$24 sps:$4 sm:$0xff]  }
 0x11a   :  { %v3506_v29 = vld [vmem:[%s4800_s3 + $0x310] ss:$24 sps:$4 sm:$0xff]  }
 0x11c   :  { %1929 = vmatpush2.bf16.msra.mxu0 %v3431_v30  ;;  %1970 = vmatpush2.bf16.msra.mxu1 %v3434_v33  ;;  %v3511_v30 = vld [vmem:[%s4800_s3 + $0x2e4] ss:$24 sps:$4 sm:$0xff]  }
 0x11d   :  { %1930 = vmatprep.subr.bf16.mxu0 %v3439_v34  ;;  %1971 = vmatprep.subr.bf16.mxu1 %v3442_v36  ;;  %v3514_v33 = vld [vmem:[%s4800_s3 + $0x5e4] ss:$24 sps:$4 sm:$0xff]   ;;  %v3509_v34 = vld [vmem:[%s4800_s3 + $0x2e0] ss:$24 sps:$4 sm:$0xff]  }
 0x11e   :  { %v3512_v36 = vld [vmem:[%s4800_s3 + $0x5e0] ss:$24 sps:$4 sm:$0xff]  }
 0x120   :  { %1931 = vmatpush2.bf16.msra.mxu0 %v3437_v37  ;;  %1972 = vmatpush2.bf16.msra.mxu1 %v3440_v38  ;;  %v3517_v37 = vld [vmem:[%s4800_s3 + $0x2b4] ss:$24 sps:$4 sm:$0xff]  }
 0x121   :  { %1932 = vmatprep.subr.bf16.mxu0 %v3445_v39  ;;  %1973 = vmatprep.subr.bf16.mxu1 %v3448_v40  ;;  %v3520_v38 = vld [vmem:[%s4800_s3 + $0x5b4] ss:$24 sps:$4 sm:$0xff]   ;;  %v3515_v39 = vld [vmem:[%s4800_s3 + $0x2b0] ss:$24 sps:$4 sm:$0xff]  }
 0x122   :  { %v3518_v40 = vld [vmem:[%s4800_s3 + $0x5b0] ss:$24 sps:$4 sm:$0xff]  }
 0x124   :  { %1933 = vmatpush2.bf16.msra.mxu0 %v3443_v41  ;;  %1974 = vmatpush2.bf16.msra.mxu1 %v3446_v42  ;;  %v3523_v41 = vld [vmem:[%s4800_s3 + $0x284] ss:$24 sps:$4 sm:$0xff]  }
 0x125   :  { %1934 = vmatprep.subr.bf16.mxu0 %v3451_v43  ;;  %1975 = vmatprep.subr.bf16.mxu1 %v3454_v44  ;;  %v3526_v42 = vld [vmem:[%s4800_s3 + $0x584] ss:$24 sps:$4 sm:$0xff]   ;;  %v3521_v43 = vld [vmem:[%s4800_s3 + $0x280] ss:$24 sps:$4 sm:$0xff]  }
 0x126   :  { %v3524_v44 = vld [vmem:[%s4800_s3 + $0x580] ss:$24 sps:$4 sm:$0xff]  }
 0x128   :  { %1935 = vmatpush2.bf16.msra.mxu0 %v3449_v45  ;;  %1976 = vmatpush2.bf16.msra.mxu1 %v3452_v46  ;;  %v3529_v45 = vld [vmem:[%s4800_s3 + $0x254] ss:$24 sps:$4 sm:$0xff]  }
 0x129   :  { %1936 = vmatprep.subr.bf16.mxu0 %v3457_v47  ;;  %1977 = vmatprep.subr.bf16.mxu1 %v3460_v48  ;;  %v3532_v46 = vld [vmem:[%s4800_s3 + $0x554] ss:$24 sps:$4 sm:$0xff]   ;;  %v3527_v47 = vld [vmem:[%s4800_s3 + $0x250] ss:$24 sps:$4 sm:$0xff]  }
 0x12a   :  { %v3530_v48 = vld [vmem:[%s4800_s3 + $0x550] ss:$24 sps:$4 sm:$0xff]  }
 0x12c   :  { %1937 = vmatpush2.bf16.msra.mxu0 %v3455_v49  ;;  %1978 = vmatpush2.bf16.msra.mxu1 %v3458_v50  ;;  %v3535_v49 = vld [vmem:[%s4800_s3 + $0x224] ss:$24 sps:$4 sm:$0xff]  }
 0x12d   :  { %1988 = vmatprep.subr.bf16.mxu0 %v3463_v51  ;;  %2029 = vmatprep.subr.bf16.mxu1 %v3466_v52  ;;  %v3538_v50 = vld [vmem:[%s4800_s3 + $0x524] ss:$24 sps:$4 sm:$0xff]   ;;  %v3533_v51 = vld [vmem:[%s4800_s3 + $0x220] ss:$24 sps:$4 sm:$0xff]  }
 0x12e   :  { %v3536_v52 = vld [vmem:[%s4800_s3 + $0x520] ss:$24 sps:$4 sm:$0xff]  }
 0x12f   :  { %1939 = vmatmul.mubr.bf16.vlgmr.msra.gmra.mxu0 %v4130_v3  ;;  %1980 = vmatmul.mubr.bf16.vlgmr.msra.gmra.mxu1 %v4123_v31 }
 0x130   :  { %1989 = vmatpush1.bf16.msra.mxu0 %v3461_v53  ;;  %2020 = vmatprep.mubr.bf16.mxu0 %v4125_v32  ;;  %v3541_v53 = vld [vmem:[%s4800_s3 + $0x1f4] ss:$24 sps:$4 sm:$0xff]  }
 0x131   :  { %2030 = vmatpush1.bf16.msra.mxu1 %v3464_v54  ;;  %2061 = vmatprep.mubr.bf16.mxu1 %v4132_v35  ;;  %v3544_v54 = vld [vmem:[%s4800_s3 + $0x4f4] ss:$24 sps:$4 sm:$0xff]  }
 0x132   :  { %1990 = vmatprep.subr.bf16.mxu0 %v3469_v55  ;;  %2031 = vmatprep.subr.bf16.mxu1 %v3472_v56  ;;  %v3539_v55 = vld [vmem:[%s4800_s3 + $0x1f0] ss:$24 sps:$4 sm:$0xff]  }
 0x133   :  { %v3542_v56 = vld [vmem:[%s4800_s3 + $0x4f0] ss:$24 sps:$4 sm:$0xff]  }
 0x134   :  { %1991 = vmatpush1.bf16.msra.mxu0 %v3467_v57  ;;  %v3547_v57 = vld [vmem:[%s4800_s3 + $0x1c4] ss:$24 sps:$4 sm:$0xff]  }
 0x135   :  { %2032 = vmatpush1.bf16.msra.mxu1 %v3470_v58  ;;  %1992 = vmatprep.subr.bf16.mxu0 %v3475_v59  ;;  %v3550_v58 = vld [vmem:[%s4800_s3 + $0x4c4] ss:$24 sps:$4 sm:$0xff]   ;;  %v3545_v59 = vld [vmem:[%s4800_s3 + $0x1c0] ss:$24 sps:$4 sm:$0xff]  }
 0x136   :  { %2033 = vmatprep.subr.bf16.mxu1 %v3478_v60  ;;  %v3548_v60 = vld [vmem:[%s4800_s3 + $0x4c0] ss:$24 sps:$4 sm:$0xff]  }
 0x138   :  { %1993 = vmatpush1.bf16.msra.mxu0 %v3473_v61  ;;  %v3553_v61 = vld [vmem:[%s4800_s3 + $0x194] ss:$24 sps:$4 sm:$0xff]  }
 0x139   :  { %2034 = vmatpush1.bf16.msra.mxu1 %v3476_v63  ;;  %1994 = vmatprep.subr.bf16.mxu0 %v3481_v1  ;;  %v3556_v63 = vld [vmem:[%s4800_s3 + $0x494] ss:$24 sps:$4 sm:$0xff]   ;;  %v3551_v1 = vld [vmem:[%s4800_s3 + $0x190] ss:$24 sps:$4 sm:$0xff]  }
 0x13a   :  { %2035 = vmatprep.subr.bf16.mxu1 %v3484_v4  ;;  %v3554_v4 = vld [vmem:[%s4800_s3 + $0x490] ss:$24 sps:$4 sm:$0xff]  }
 0x13c   :  { %1995 = vmatpush1.bf16.msra.mxu0 %v3479_v13  ;;  %v3557_v13 = vld [vmem:[%s4803_s5 + $0x78] sm:$0xff]  }
 0x13d   :  { %2036 = vmatpush1.bf16.msra.mxu1 %v3482_v14  ;;  %1996 = vmatprep.subr.bf16.mxu0 %v3487_v15  ;;  %v3558_v14 = vld [vmem:[%s4803_s5 + $0xf8] sm:$0xff]  }
 0x13e   :  { %2037 = vmatprep.subr.bf16.mxu1 %v3490_v12  ;;  %v3559_v15 = vld [vmem:[%s4803_s5 + $0x38] sm:$0xff]  }
 0x13f   :  { %v3560_v12 = vld [vmem:[%s4803_s5 + $0xb8] sm:$0xff]  }
 0x140   :  { %1997 = vmatpush1.bf16.msra.mxu0 %v3485_v16  ;;  %v3561_v16 = vld [vmem:[%s4803_s5 + $0x70] sm:$0xff]  }
 0x141   :  { %2038 = vmatpush1.bf16.msra.mxu1 %v3488_v17  ;;  %1998 = vmatprep.subr.bf16.mxu0 %v3493_v18  ;;  %v3562_v17 = vld [vmem:[%s4803_s5 + $0xf0] sm:$0xff]  }
 0x142   :  { %2039 = vmatprep.subr.bf16.mxu1 %v3496_v19  ;;  %v3563_v18 = vld [vmem:[%s4803_s5 + $0x30] sm:$0xff]  }
 0x143   :  { %v3564_v19 = vld [vmem:[%s4803_s5 + $0xb0] sm:$0xff]  }
 0x144   :  { %1999 = vmatpush1.bf16.msra.mxu0 %v3491_v20  ;;  %v3565_v20 = vld [vmem:[%s4803_s5 + $0x68] sm:$0xff]  }
 0x145   :  { %2040 = vmatpush1.bf16.msra.mxu1 %v3494_v21  ;;  %2000 = vmatprep.subr.bf16.mxu0 %v3499_v22  ;;  %v3566_v21 = vld [vmem:[%s4803_s5 + $0xe8] sm:$0xff]  }
 0x146   :  { %2041 = vmatprep.subr.bf16.mxu1 %v3502_v23  ;;  %v3568_v22 = vld [vmem:[%s4803_s5 + $0xa8] sm:$0xff]   ;;  %v3570_v23 = vld [vmem:[%s4803_s5 + $0xe0] sm:$0xff]  }
 0x148   :  { %2001 = vmatpush1.bf16.msra.mxu0 %v3497_v24  ;;  %v3571_v24 = vld [vmem:[%s4803_s5 + $0x20] sm:$0xff]  }
 0x149   :  { %2042 = vmatpush1.bf16.msra.mxu1 %v3500_v25  ;;  %2002 = vmatprep.subr.bf16.mxu0 %v3505_v26  ;;  %v3572_v25 = vld [vmem:[%s4803_s5 + $0xa0] sm:$0xff]   ;;  %v3573_v26 = vld [vmem:[%s4803_s5 + $0x58] sm:$0xff]  }
 0x14a   :  { %2043 = vmatprep.subr.bf16.mxu1 %v3508_v27  ;;  %v3574_v27 = vld [vmem:[%s4803_s5 + $0xd8] sm:$0xff]  }
 0x14c   :  { %2003 = vmatpush1.bf16.msra.mxu0 %v3503_v28  ;;  %v3575_v28 = vld [vmem:[%s4803_s5 + $0x18] sm:$0xff]  }
 0x14d   :  { %2044 = vmatpush1.bf16.msra.mxu1 %v3506_v29  ;;  %2004 = vmatprep.subr.bf16.mxu0 %v3511_v30  ;;  %v3576_v29 = vld [vmem:[%s4803_s5 + $0x98] sm:$0xff]   ;;  %v3577_v30 = vld [vmem:[%s4803_s5 + $0x50] sm:$0xff]  }
 0x14e   :  { %2045 = vmatprep.subr.bf16.mxu1 %v3514_v33  ;;  %v3578_v33 = vld [vmem:[%s4803_s5 + $0xd0] sm:$0xff]  }
 0x150   :  { %2005 = vmatpush2.bf16.msra.mxu0 %v3509_v34  ;;  %v122_v34 = vsub.s32 5, %v4100_v6 }
 0x151   :  { %2046 = vmatpush2.bf16.msra.mxu1 %v3512_v36  ;;  %2006 = vmatprep.subr.bf16.mxu0 %v3517_v37  ;;  %v130_v36 = vsub.s32 7, %v4100_v6  ;;  %v3579_v37 = vld [vmem:[%s4803_s5 + $0x10] sm:$0xff]  }
 0x152   :  { %2047 = vmatprep.subr.bf16.mxu1 %v3520_v38  ;;  %v3580_v38 = vld [vmem:[%s4803_s5 + $0x90] sm:$0xff]  }
 0x154   :  { %2007 = vmatpush2.bf16.msra.mxu0 %v3515_v39  ;;  %v3581_v39 = vld [vmem:[%s4803_s5 + $0x48] sm:$0xff]  }
 0x155   :  { %2048 = vmatpush2.bf16.msra.mxu1 %v3518_v40  ;;  %2008 = vmatprep.subr.bf16.mxu0 %v3523_v41  ;;  %v3582_v40 = vld [vmem:[%s4803_s5 + $0xc8] sm:$0xff]   ;;  %v123_v41 = vrot.slane %v4106_v8, %v122_v34 }
 0x156   :  { %2049 = vmatprep.subr.bf16.mxu1 %v3526_v42  ;;  %v131_v42 = vrot.slane %v4106_v8, %v130_v36  ;;  %v3586_v8 = vld [vmem:[%s4803_s5 + $0xc0] sm:$0xff]  }
 0x158   :  { %2009 = vmatpush2.bf16.msra.mxu0 %v3521_v43  ;;  %v3583_v43 = vld [vmem:[%s4803_s5 + $0x8] sm:$0xff]  }
 0x159   :  { %2050 = vmatpush2.bf16.msra.mxu1 %v3524_v44  ;;  %2010 = vmatprep.subr.bf16.mxu0 %v3529_v45  ;;  %v3584_v44 = vld [vmem:[%s4803_s5 + $0x88] sm:$0xff]   ;;  %v3585_v45 = vld [vmem:[%s4803_s5 + $0x40] sm:$0xff]  }
 0x15a   :  { %2051 = vmatprep.subr.bf16.mxu1 %v3532_v46  ;;  %v579_v46 = vadd.f32 %v4228_v2, %v123_v41  ;;  %v3590_v2 = vld [vmem:[%s4804_s7 + $0xf8] sm:$0xff]  }
 0x15c   :  { %2011 = vmatpush2.bf16.msra.mxu0 %v3527_v47  ;;  %v620_v47 = vadd.f32 %v4233_v5, %v131_v42  ;;  %v629_v5 = vmax.f32 %v579_v46, 0.0 }
 0x15d   :  { %2052 = vmatpush2.bf16.msra.mxu1 %v3530_v48  ;;  %2012 = vmatprep.subr.bf16.mxu0 %v3535_v49  ;;  %v3587_v48 = vld [vmem:[%s4803_s5] sm:$0xff]  }
 0x15e   :  { %2053 = vmatprep.subr.bf16.mxu1 %v3538_v50  ;;  %v3588_v49 = vld [vmem:[%s4803_s5 + $0x80] sm:$0xff]   ;;  %v3589_v50 = vld [vmem:[%s4804_s7 + $0x78] sm:$0xff]  }
 0x160   :  { %2013 = vmatpush2.bf16.msra.mxu0 %v3533_v51  ;;  %v631_v51 = vmax.f32 %v620_v47, 0.0 }
 0x161   :  { %2054 = vmatpush2.bf16.msra.mxu1 %v3536_v52  ;;  %2014 = vmatprep.subr.bf16.mxu0 %v3541_v53  ;;  %v3591_v52 = vld [vmem:[%s4804_s7 + $0x38] sm:$0xff]  }
 0x162   :  { %2055 = vmatprep.subr.bf16.mxu1 %v3544_v54  ;;  %v3592_v53 = vld [vmem:[%s4804_s7 + $0xb8] sm:$0xff]   ;;  %v3593_v54 = vld [vmem:[%s4804_s7 + $0x70] sm:$0xff]  }
 0x164   :  { %2015 = vmatpush2.bf16.msra.mxu0 %v3539_v55  ;;  %v637_v55 = vpack.c.bf16 %v629_v5, %v629_v5 }
 0x165   :  { %2056 = vmatpush2.bf16.msra.mxu1 %v3542_v56  ;;  %2016 = vmatprep.subr.bf16.mxu0 %v3547_v57  ;;  %v3594_v56 = vld [vmem:[%s4804_s7 + $0xf0] sm:$0xff]   ;;  %v639_v57 = vpack.c.bf16 %v631_v51, %v631_v51 }
 0x166   :  { %2057 = vmatprep.subr.bf16.mxu1 %v3550_v58  ;;  %v3595_v58 = vld [vmem:[%s4804_s7 + $0x30] sm:$0xff]  }
 0x168   :  { %2017 = vmatpush2.bf16.msra.mxu0 %v3545_v59  ;;  %v3596_v59 = vld [vmem:[%s4804_s7 + $0xb0] sm:$0xff]  }
 0x169   :  { %2058 = vmatpush2.bf16.msra.mxu1 %v3548_v60  ;;  %2018 = vmatprep.subr.bf16.mxu0 %v3553_v61  ;;  %v3599_v60 = vld [vmem:[%s4804_s7 + $0x28] sm:$0xff]  }
 0x16a   :  { %2059 = vmatprep.subr.bf16.mxu1 %v3556_v63  ;;  %v3600_v61 = vld [vmem:[%s4804_s7 + $0xa8] sm:$0xff]   ;;  %v3601_v63 = vld [vmem:[%s4804_s7 + $0x60] sm:$0xff]  }
 0x16c   :  { %2019 = vmatpush2.bf16.msra.mxu0 %v3551_v1  ;;  %v3602_v1 = vld [vmem:[%s4804_s7 + $0xe0] sm:$0xff]  }
 0x16d   :  { %2060 = vmatpush2.bf16.msra.mxu1 %v3554_v4  ;;  %3180 = vmatprep.subr.bf16.mxu0 %v3557_v13  ;;  %v3603_v4 = vld [vmem:[%s4804_s7 + $0x20] sm:$0xff]  }
 0x16e   :  { %3202 = vmatprep.subr.bf16.mxu1 %v3558_v14  ;;  %v3604_v13 = vld [vmem:[%s4804_s7 + $0xa0] sm:$0xff]   ;;  %v3605_v14 = vld [vmem:[%s4804_s7 + $0x58] sm:$0xff]  }
 0x16f   :  { %2021 = vmatmul.mubr.bf16.vlgmr.msra.gmra.mxu0 %v4130_v3 }
 0x170   :  { %2062 = vmatmul.mubr.bf16.vlgmr.msra.gmra.mxu1 %v4123_v31  ;;  %3181 = vmatpush3.bf16.msra.mxu0 %v3559_v15  ;;  %v3606_v15 = vld [vmem:[%s4804_s7 + $0xd8] sm:$0xff]  }
 0x171   :  { %2365 = vmatprep.mubr.bf16.mxu0 %v4125_v32  ;;  %3203 = vmatpush3.bf16.msra.mxu1 %v3560_v12  ;;  %v3567_v32 = vld [vmem:[%s4803_s5 + $0x28] sm:$0xff]   ;;  %v3607_v12 = vld [vmem:[%s4804_s7 + $0x18] sm:$0xff]  }
 0x172   :  { %2405 = vmatprep.mubr.bf16.mxu1 %v4132_v35  ;;  %3182 = vmatprep.subr.bf16.mxu0 %v3561_v16  ;;  %v3569_v35 = vld [vmem:[%s4803_s5 + $0x60] sm:$0xff]   ;;  %v118_v16 = vsub.s32 4, %v4100_v6 }
 0x173   :  { %3204 = vmatprep.subr.bf16.mxu1 %v3562_v17  ;;  %v3608_v17 = vld [vmem:[%s4804_s7 + $0x98] sm:$0xff]  }
 0x174   :  { %3183 = vmatpush3.bf16.msra.mxu0 %v3563_v18  ;;  %v3609_v18 = vld [vmem:[%s4804_s7 + $0x50] sm:$0xff]  }
 0x175   :  { %3205 = vmatpush3.bf16.msra.mxu1 %v3564_v19  ;;  %3184 = vmatprep.subr.bf16.mxu0 %v3565_v20  ;;  %v126_v19 = vsub.s32 6, %v4100_v6  ;;  %v3610_v20 = vld [vmem:[%s4804_s7 + $0xd0] sm:$0xff]  }
 0x176   :  { %3206 = vmatprep.subr.bf16.mxu1 %v3566_v21  ;;  %v3611_v21 = vld [vmem:[%s4804_s7 + $0x10] sm:$0xff]  }
 0x178   :  { %3185 = vmatpush3.bf16.msra.mxu0 %v3567_v32  ;;  %v3645_v32 = vld [vmem:[%s4802_s2] sm:$0xff] }
 0x179   :  { %3207 = vmatpush3.bf16.msra.mxu1 %v3568_v22  ;;  %3186 = vmatprep.subr.bf16.mxu0 %v3569_v35  ;;  %v119_v22 = vrot.slane %v3645_v32, %v118_v16  ;;  %v3612_v35 = vld [vmem:[%s4804_s7 + $0x90] sm:$0xff]  }
 0x17a   :  { %3208 = vmatprep.subr.bf16.mxu1 %v3570_v23  ;;  %v3613_v23 = vld [vmem:[%s4804_s7 + $0x48] sm:$0xff]  }
 0x17c   :  { %3187 = vmatpush3.bf16.msra.mxu0 %v3571_v24  ;;  %v127_v24 = vrot.slane %v3645_v32, %v126_v19 }
 0x17d   :  { %3209 = vmatpush3.bf16.msra.mxu1 %v3572_v25  ;;  %3188 = vmatprep.subr.bf16.mxu0 %v3573_v26  ;;  %v3614_v25 = vld [vmem:[%s4804_s7 + $0xc8] sm:$0xff]  }
 0x17e   :  { %3210 = vmatprep.subr.bf16.mxu1 %v3574_v27  ;;  %v3615_v26 = vld [vmem:[%s4804_s7 + $0x8] sm:$0xff]   ;;  %v577_v27 = vadd.f32 %v4218_v62, %v119_v22  ;;  %v3619_v62 = vld [vmem:[%s4804_s7] sm:$0xff]  }
 0x180   :  { %3189 = vmatpush3.bf16.msra.mxu0 %v3575_v28  ;;  %v3616_v28 = vld [vmem:[%s4804_s7 + $0x88] sm:$0xff]   ;;  %v628_v36 = vmax.f32 %v577_v27, 0.0 }
 0x181   :  { %3211 = vmatpush3.bf16.msra.mxu1 %v3576_v29  ;;  %3190 = vmatprep.subr.bf16.mxu0 %v3577_v30  ;;  %v3617_v29 = vld [vmem:[%s4804_s7 + $0x40] sm:$0xff]   ;;  %v618_v30 = vadd.f32 %v4223_v0, %v127_v24 }
 0x182   :  { %3212 = vmatprep.subr.bf16.mxu1 %v3578_v33  ;;  %v3618_v33 = vld [vmem:[%s4804_s7 + $0xc0] sm:$0xff]  }
 0x183   :  { %v832_v0 = vld [vmem:[%s4805_s4] sm:$0x3f] }
 0x184   :  { %3191 = vmatpush3.bf16.msra.mxu0 %v3579_v37  ;;  %v3620_v37 = vld [vmem:[%s4804_s7 + $0x80] sm:$0xff]   ;;  %v841_v42 = vrot.slane %v832_v0, %v106_v10  ;;  %v845_v51 = vrot.slane %v832_v0, %v110_v9  ;;  %v849_v10 = vrot.slane %v832_v0, %v114_v11  ;;  %v857_v9 = vrot.slane %v832_v0, %v122_v34 }
 0x185   :  { %3213 = vmatpush3.bf16.msra.mxu1 %v3580_v38  ;;  %3192 = vmatprep.subr.bf16.mxu0 %v3581_v39  ;;  %v630_v38 = vmax.f32 %v618_v30, 0.0  ;;  %v837_v39 = vrot.slane %v832_v0, %v102_v7 }
 0x186   :  { %3214 = vmatprep.subr.bf16.mxu1 %v3582_v40  ;;  %v636_v40 = vpack.c.bf16 %v628_v36, %v628_v36 }
 0x187   :  { %v638_v41 = vpack.c.bf16 %v630_v38, %v630_v38 }
 0x188   :  { %3193 = vmatpush3.bf16.msra.mxu0 %v3583_v43 }
 0x189   :  { %3215 = vmatpush3.bf16.msra.mxu1 %v3584_v44  ;;  %3194 = vmatprep.subr.bf16.mxu0 %v3585_v45 }
 0x18a   :  { %3216 = vmatprep.subr.bf16.mxu1 %v3586_v8 }
 0x18c   :  { %3195 = vmatpush3.bf16.msra.mxu0 %v3587_v48 }
 0x18d   :  { %3217 = vmatpush3.bf16.msra.mxu1 %v3588_v49  ;;  %3224 = vmatprep.subr.bf16.mxu0 %v3589_v50 }
 0x18e   :  { %3246 = vmatprep.subr.bf16.mxu1 %v3590_v2 }
 0x18f   :  { %2366 = vmatmul.mubr.bf16.vlgmr.msra.gmra.mxu0 %v4130_v3  ;;  %v3597_v3 = vld [vmem:[%s4804_s7 + $0x68] sm:$0xff]  }
 0x190   :  { %2406 = vmatmul.mubr.bf16.vlgmr.msra.gmra.mxu1 %v4123_v31  ;;  %3225 = vmatpush3.bf16.msra.mxu0 %v3591_v52  ;;  %v3598_v31 = vld [vmem:[%s4804_s7 + $0xe8] sm:$0xff]  }
 0x191   :  { %2708 = vmatprep.mubr.bf16.mxu0 %v637_v55  ;;  %3247 = vmatpush3.bf16.msra.mxu1 %v3592_v53 }
 0x192   :  { %2748 = vmatprep.mubr.bf16.mxu1 %v639_v57  ;;  %3226 = vmatprep.subr.bf16.mxu0 %v3593_v54 }
 0x193   :  { %3248 = vmatprep.subr.bf16.mxu1 %v3594_v56 }
 0x194   :  { %3227 = vmatpush3.bf16.msra.mxu0 %v3595_v58 }
 0x195   :  { %3249 = vmatpush3.bf16.msra.mxu1 %v3596_v59  ;;  %3228 = vmatprep.subr.bf16.mxu0 %v3597_v3 }
 0x196   :  { %3250 = vmatprep.subr.bf16.mxu1 %v3598_v31 }
 0x198   :  { %3229 = vmatpush3.bf16.msra.mxu0 %v3599_v60 }
 0x199   :  { %3251 = vmatpush3.bf16.msra.mxu1 %v3600_v61  ;;  %3230 = vmatprep.subr.bf16.mxu0 %v3601_v63  ;;  %v853_v63 = vrot.slane %v832_v0, %v118_v16 }
 0x19a   :  { %3252 = vmatprep.subr.bf16.mxu1 %v3602_v1 }
 0x19c   :  { %3231 = vmatpush3.bf16.msra.mxu0 %v3603_v4 }
 0x19d   :  { %3253 = vmatpush3.bf16.msra.mxu1 %v3604_v13  ;;  %3232 = vmatprep.subr.bf16.mxu0 %v3605_v14 }
 0x19e   :  { %3254 = vmatprep.subr.bf16.mxu1 %v3606_v15 }
 0x1a0   :  { %3233 = vmatpush3.bf16.msra.mxu0 %v3607_v12 }
 0x1a1   :  { %3255 = vmatpush3.bf16.msra.mxu1 %v3608_v17  ;;  %3234 = vmatprep.subr.bf16.mxu0 %v3609_v18 }
 0x1a2   :  { %3256 = vmatprep.subr.bf16.mxu1 %v3610_v20 }
 0x1a4   :  { %3235 = vmatpush3.bf16.msra.mxu0 %v3611_v21 }
 0x1a5   :  { %3257 = vmatpush3.bf16.msra.mxu1 %v3612_v35  ;;  %3236 = vmatprep.subr.bf16.mxu0 %v3613_v23 }
 0x1a6   :  { %3258 = vmatprep.subr.bf16.mxu1 %v3614_v25 }
 0x1a8   :  { %3237 = vmatpush3.bf16.msra.mxu0 %v3615_v26  ;;  %v3114_v26 = vld [vmem:[%s4806_s6] ss:$0 sm:$0xff] }
 0x1a9   :  { %3259 = vmatpush3.bf16.msra.mxu1 %v3616_v28  ;;  %3238 = vmatprep.subr.bf16.mxu0 %v3617_v29  ;;  %v3147_v29 = vld [vmem:[%s4807_s8] ss:$0 sm:$0xff] }
 0x1aa   :  { %3260 = vmatprep.subr.bf16.mxu1 %v3618_v33 }
 0x1ac   :  { %3239 = vmatpush3.bf16.msra.mxu0 %v3619_v62 }
 0x1ad   :  { %3261 = vmatpush3.bf16.msra.mxu1 %v3620_v37 }
 0x1af   :  { %2709 = vmatmul.mubr.bf16.vlgmr.msra.gmra.mxu0 %v636_v40  ;;  %v1858_v43 = vpop.f32.mrf.mxu0  ;;  %v1899_v45 = vpop.f32.mrf.mxu1 }
 0x1b0   :  { %2749 = vmatmul.mubr.bf16.vlgmr.msra.gmra.mxu1 %v638_v41  ;;  %v1859_v44 = vadd.f32 %v1858_v43, %v837_v39 }
 0x1b1   :  { %v1860_v8 = vpop.f32.mrf.mxu0  ;;  %v1901_v48 = vpop.f32.mrf.mxu1 }
 0x1b2   :  { %v4749_v46 = vadd.f32 %v1899_v45, %v1859_v44  ;;  %v1861_v47 = vadd.f32 %v1860_v8, %v841_v42 }
 0x1b3   :  { %v1862_v49 = vpop.f32.mrf.mxu0  ;;  %v1903_v7 = vpop.f32.mrf.mxu1 }
 0x1b4   :  { %v4751_v50 = vadd.f32 %v1901_v48, %v1861_v47 }
 0x1b5   :  { %v1863_v2 = vpop.f32.mrf.mxu0  ;;  %v1904_v5 = vpop.f32.mrf.mxu1 }
 0x1ef   :  { %v1940_v52 = vpop.f32.mrf.mxu0  ;;  %v1981_v54 = vpop.f32.mrf.mxu1 }
 0x1f0   :  { %v1941_v53 = vadd.f32 %v1940_v52, %v845_v51 }
 0x1f1   :  { %v1942_v55 = vpop.f32.mrf.mxu0  ;;  %v1983_v58 = vpop.f32.mrf.mxu1 }
 0x1f2   :  { %v1982_v56 = vadd.f32 %v1981_v54, %v1941_v53  ;;  %v1943_v57 = vadd.f32 %v1942_v55, %v849_v10 }
 0x1f3   :  { %v1944_v59 = vpop.f32.mrf.mxu0  ;;  %v1985_v31 = vpop.f32.mrf.mxu1 }
 0x1f4   :  { %v1984_v3 = vadd.f32 %v1983_v58, %v1943_v57 }
 0x1f5   :  { %v1945_v60 = vpop.f32.mrf.mxu0  ;;  %v1986_v61 = vpop.f32.mrf.mxu1 }
 0x22f   :  { %v2022_v1 = vpop.f32.mrf.mxu0 }
 0x230   :  { %v2023_v11 = vadd.f32 %v2022_v1, %v853_v63  ;;  %v2063_v4 = vpop.f32.mrf.mxu1 }
 0x231   :  { %v2024_v13 = vpop.f32.mrf.mxu0 }
 0x232   :  { %v2064_v14 = vadd.f32 %v2063_v4, %v2023_v11  ;;  %v2025_v15 = vadd.f32 %v2024_v13, %v857_v9  ;;  %v2065_v12 = vpop.f32.mrf.mxu1 }
 0x233   :  { %v2026_v17 = vpop.f32.mrf.mxu0 }
 0x234   :  { %v2066_v18 = vadd.f32 %v2065_v12, %v2025_v15  ;;  %v2067_v19 = vpop.f32.mrf.mxu1 }
 0x235   :  { %v2027_v20 = vpop.f32.mrf.mxu0 }
 0x236   :  { %v2068_v21 = vpop.f32.mrf.mxu1 }
 0x24f   :  { %v3196_v32 = vpop.f32.mrf.mxu0 }
 0x250   :  { %v3218_v22 = vpop.f32.mrf.mxu1 }
 0x251   :  { %v3197_v35 = vpop.f32.mrf.mxu0 }
 0x252   :  { %v3219_v23 = vpop.f32.mrf.mxu1  ;;  %v3198_v25 = vadd.f32 %v3197_v35, %v3196_v32 }
 0x253   :  { %v3199_v16 = vpop.f32.mrf.mxu0  ;;  %v3220_v0 = vadd.f32 %v3219_v23, %v3218_v22 }
 0x254   :  { %v3221_v24 = vpop.f32.mrf.mxu1  ;;  %v2368_v33 = vadd.f32 %v3198_v25, %v3114_v26 }
 0x255   :  { %v3200_v6 = vpop.f32.mrf.mxu0 }
 0x256   :  { %v3222_v34 = vpop.f32.mrf.mxu1  ;;  %v2408_v42 = vadd.f32 %v3220_v0, %v2368_v33 }
 0x26f   :  { %v3240_v27 = vpop.f32.mrf.mxu0 }
 0x270   :  { %v3262_v28 = vpop.f32.mrf.mxu1 }
 0x271   :  { %v3241_v30 = vpop.f32.mrf.mxu0 }
 0x272   :  { %v3242_v62 = vadd.f32 %v3241_v30, %v3240_v27  ;;  %v3263_v36 = vpop.f32.mrf.mxu1 }
 0x273   :  { %v3243_v37 = vpop.f32.mrf.mxu0  ;;  %v3264_v39 = vadd.f32 %v3263_v36, %v3262_v28 }
 0x274   :  { %v2711_v38 = vadd.f32 %v3242_v62, %v3147_v29  ;;  %v3265_v40 = vpop.f32.mrf.mxu1 }
 0x275   :  { %v3244_v41 = vpop.f32.mrf.mxu0 }
 0x276   :  { %v2751_v43 = vadd.f32 %v3264_v39, %v2711_v38  ;;  %v3266_v44 = vpop.f32.mrf.mxu1 }
 0x278   :  { %v2756_v45 = vsub.f32 %v2751_v43, %v2408_v42 }
 0x27a   :  { %v2790_v8 = vadd.f32 %v2756_v45, %v1982_v56  ;;  %v2757_v47 = vadd.f32 %v2756_v45, %v4749_v46  ;;  %v2806_v7 = vadd.f32 %v2756_v45, %v1984_v3  ;;  %v2774_v2 = vadd.f32 %v2756_v45, %v4751_v50 }
 0x27b   :  { %v2838_v10 = vadd.f32 %v2756_v45, %v2066_v18  ;;  %v2822_v52 = vadd.f32 %v2756_v45, %v2064_v14 }
 0x27c   :  { %v2791_v48 = vsel %vm2758_vm0, %v2790_v8, -inf  ;;  %v2759_v49 = vsel %vm2758_vm0, %v2757_v47, -inf  ;;  %v2807_v5 = vsel %vm2758_vm0, %v2806_v7, -inf  ;;  %v2775_v51 = vsel %vm2758_vm0, %v2774_v2, -inf }
 0x27d   :  { %2792 = vmax.xlane.f32.xlu1 %v2791_v48  ;;  %2760 = vmax.xlane.f32.xlu0 %v2759_v49  ;;  %v2839_v53 = vsel %vm2758_vm0, %v2838_v10, -inf  ;;  %v2823_v46 = vsel %vm2758_vm0, %v2822_v52, -inf }
 0x281   :  { %2808 = vmax.xlane.f32.xlu1 %v2807_v5  ;;  %2776 = vmax.xlane.f32.xlu0 %v2775_v51 }
 0x285   :  { %2840 = vmax.xlane.f32.xlu1 %v2839_v53  ;;  %2824 = vmax.xlane.f32.xlu0 %v2823_v46 }
 0x306   :  { %v2793_v54 = vpop.xlane.xlu1 %2792  ;;  %v2761_v55 = vpop.xlane.xlu0 %2760 }
 0x307   :  { %v2794_v56 = vsub.f32 %v2790_v8, %v2793_v54  ;;  %v2762_v50 = vsub.f32 %v2757_v47, %v2761_v55 }
 0x309   :  { %v2763_v57 = vmul.f32 1.442695, %v2762_v50  ;;  %v2795_v58 = vmul.f32 1.442695, %v2794_v56 }
 0x30a   :  { %v2809_v59 = vpop.xlane.xlu1 %2808  ;;  %v2777_v3 = vpop.xlane.xlu0 %2776 }
 0x30b   :  { %v2810_v31 = vsub.f32 %v2806_v7, %v2809_v59  ;;  %v2778_v60 = vsub.f32 %v2774_v2, %v2777_v3  ;;  %3621 = vpow2.f32 %v2763_v57 }
 0x30c   :  { %3623 = vpow2.f32 %v2795_v58 }
 0x30d   :  { %v2779_v61 = vmul.f32 1.442695, %v2778_v60  ;;  %v2811_v63 = vmul.f32 1.442695, %v2810_v31 }
 0x30e   :  { %v2841_v9 = vpop.xlane.xlu1 %2840  ;;  %v2825_v1 = vpop.xlane.xlu0 %2824 }
 0x30f   :  { %v2842_v11 = vsub.f32 %v2838_v10, %v2841_v9  ;;  %v2826_v4 = vsub.f32 %v2822_v52, %v2825_v1  ;;  %3625 = vpow2.f32 %v2779_v61 }
 0x310   :  { %3627 = vpow2.f32 %v2811_v63 }
 0x311   :  { %v2827_v13 = vmul.f32 1.442695, %v2826_v4  ;;  %v2843_v14 = vmul.f32 1.442695, %v2842_v11 }
 0x313   :  { %3629 = vpow2.f32 %v2827_v13 }
 0x314   :  { %3631 = vpow2.f32 %v2843_v14 }
 0x318   :  { %v3622_v15 = vpop.eup %3621 }
 0x319   :  { %v2765_v12 = vsel %vm2758_vm0, %v3622_v15, 0.0  ;;  %v3624_v17 = vpop.eup %3623 }
 0x31a   :  { %2766 = vadd.xlane.f32.xlu0 %v2765_v12  ;;  %v2797_v19 = vsel %vm2758_vm0, %v3624_v17, 0.0 }
 0x31c   :  { %v3626_v18 = vpop.eup %3625 }
 0x31d   :  { %v2781_v20 = vsel %vm2758_vm0, %v3626_v18, 0.0  ;;  %v3628_v21 = vpop.eup %3627 }
 0x31e   :  { %2798 = vadd.xlane.f32.xlu0 %v2797_v19  ;;  %2782 = vadd.xlane.f32.xlu1 %v2781_v20  ;;  %v2813_v22 = vsel %vm2758_vm0, %v3628_v21, 0.0 }
 0x320   :  { %v3630_v32 = vpop.eup %3629 }
 0x321   :  { %v2829_v35 = vsel %vm2758_vm0, %v3630_v32, 0.0  ;;  %v3632_v23 = vpop.eup %3631 }
 0x322   :  { %2814 = vadd.xlane.f32.xlu1 %v2813_v22  ;;  %2830 = vadd.xlane.f32.xlu0 %v2829_v35  ;;  %v2845_v16 = vsel %vm2758_vm0, %v3632_v23, 0.0 }
 0x326   :  { %2846 = vadd.xlane.f32.xlu1 %v2845_v16 }
 0x3a3   :  { %v2767_v24 = vpop.xlane.xlu0 %2766 }
 0x3a4   :  { %3633 = vrcp.f32 %v2767_v24 }
 0x3a7   :  { %v2783_v6 = vpop.xlane.xlu1 %2782  ;;  %v2799_v34 = vpop.xlane.xlu0 %2798 }
 0x3a8   :  { %3635 = vrcp.f32 %v2783_v6 }
 0x3a9   :  { %3637 = vrcp.f32 %v2799_v34 }
 0x3ab   :  { %v2815_v25 = vpop.xlane.xlu1 %2814  ;;  %v2831_v26 = vpop.xlane.xlu0 %2830 }
 0x3ac   :  { %3639 = vrcp.f32 %v2815_v25 }
 0x3ad   :  { %3641 = vrcp.f32 %v2831_v26 }
 0x3af   :  { %v2847_v27 = vpop.xlane.xlu1 %2846 }
 0x3b0   :  { %3643 = vrcp.f32 %v2847_v27 }
 0x3b1   :  { %v3634_v28 = vpop.eup %3633 }
 0x3b2   :  { %v2769_v29 = vmul.f32 %v3634_v28, %v2767_v24 }
 0x3b4   :  { %v2770_v30 = vsub.f32 2.0, %v2769_v29 }
 0x3b5   :  { %v3636_v33 = vpop.eup %3635 }
 0x3b6   :  { %v3638_v62 = vpop.eup %3637  ;;  %v2771_v36 = vmul.f32 %v3634_v28, %v2770_v30  ;;  %v2785_v37 = vmul.f32 %v3636_v33, %v2783_v6 }
 0x3b7   :  { %v2801_v0 = vmul.f32 %v3638_v62, %v2799_v34 }
 0x3b8   :  { %v2772_v38 = vmul.f32 %v3622_v15, %v2771_v36  ;;  %v2786_v39 = vsub.f32 2.0, %v2785_v37 }
 0x3b9   :  { %v3640_v40 = vpop.eup %3639  ;;  %v2802_v41 = vsub.f32 2.0, %v2801_v0 }
 0x3ba   :  { %v3642_v42 = vpop.eup %3641  ;;  %2773 = vst [vmem:[%s4808_s9] sm:$0x3] %v2772_v38  ;;  %v2787_v43 = vmul.f32 %v3636_v33, %v2786_v39  ;;  %v2817_v44 = vmul.f32 %v3640_v40, %v2815_v25 }
 0x3bb   :  { %v2803_v45 = vmul.f32 %v3638_v62, %v2802_v41  ;;  %v2833_v8 = vmul.f32 %v3642_v42, %v2831_v26 }
 0x3bc   :  { %v2788_v47 = vmul.f32 %v3626_v18, %v2787_v43  ;;  %v2818_v48 = vsub.f32 2.0, %v2817_v44 }
 0x3bd   :  { %v3644_v49 = vpop.eup %3643  ;;  %v2804_v7 = vmul.f32 %v3624_v17, %v2803_v45  ;;  %v2834_v2 = vsub.f32 2.0, %v2833_v8 }
 0x3be   :  { %2789 = vst [vmem:[%s4808_s9 + $0x2] sm:$0x3] %v2788_v47  ;;  %v2819_v5 = vmul.f32 %v3640_v40, %v2818_v48  ;;  %v2849_v51 = vmul.f32 %v3644_v49, %v2847_v27 }
 0x3bf   :  { %2805 = vst [vmem:[%s4808_s9 + $0x4] sm:$0x3] %v2804_v7  ;;  %v2835_v10 = vmul.f32 %v3642_v42, %v2834_v2 }
 0x3c0   :  { %v2820_v52 = vmul.f32 %v3628_v21, %v2819_v5  ;;  %v2850_v53 = vsub.f32 2.0, %v2849_v51 }
 0x3c1   :  { %v2836_v46 = vmul.f32 %v3630_v32, %v2835_v10 }
 0x3c2   :  { %2821 = vst [vmem:[%s4808_s9 + $0x6] sm:$0x3] %v2820_v52  ;;  %v2851_v54 = vmul.f32 %v3644_v49, %v2850_v53 }
 0x3c3   :  { %2837 = vst [vmem:[%s4808_s9 + $0x8] sm:$0x3] %v2836_v46 }
 0x3c4   :  { %v2852_v55 = vmul.f32 %v3632_v23, %v2851_v54 }
 0x3c6   :  { %2853 = vst [vmem:[%s4808_s9 + $0xa] sm:$0x3] %v2852_v55 }

</bundles_post_ra>
